<compile_context>
chip_gen: v5e
topology: v5e:2x2
jax: 0.10.0
libtpu: 0.0.40
codegen_flags: <defaults>
</compile_context>

<pallas_src>
import jax
import jax.numpy as jnp
import numpy as np
from jax.experimental import pallas as pl
from jax.experimental.pallas import tpu as pltpu


def _up2x_conv3x3_kernel(x_ref, h_ref, w_ref, b_ref, o_ref):
    """One (batch, row-tile) step of conv3x3(nearest_upsample_2x(x)).

    x_ref: (TH, W+2, C)   width-padded ORIGINAL-resolution center rows (no overlap)
    h_ref: (2, W+2, C)    width-padded halo rows [row above tile, row below tile]
                          (zero rows at the image borders)
    w_ref: (2, 2, 2C, 2C) folded phase weights, [col-phase b, row-phase a];
                          K axis = [width-tap 0 ; width-tap 1] input channels,
                          N axis = [row-tap 0 | row-tap 1] output channels
    b_ref: (1, C)         bias (f32)
    o_ref: (TH, 2, W, 2C) phase layout: o[p, a, q, b*C + cc] = y[2p+a, 2q+b, cc]
    """
    th, wp, c = x_ref.shape
    w = wp - 2
    bias = b_ref[...].astype(jnp.float32)                     # (1, C)

    def col_patches(arr):
        # (..., W+2, C) -> two (..., W, 2C) patches, width taps folded on lanes
        s0 = arr[..., 0:w, :]
        s1 = arr[..., 1:w + 1, :]
        s2 = arr[..., 2:w + 2, :]
        return (jnp.concatenate([s0, s1], axis=-1),           # column phase b = 0
                jnp.concatenate([s1, s2], axis=-1))           # column phase b = 1

    pc = col_patches(x_ref[...])                              # each (TH, W, 2C)
    ph = col_patches(h_ref[...])                              # each (2,  W, 2C)
    lhs = (pc[0].reshape(th * w, 2 * c), pc[1].reshape(th * w, 2 * c))

    lane_aligned = (c % 128 == 0)     # quadrant stores stay on lane-tile bounds
    for a in range(2):                                        # output row phase
        parts = []
        for b in range(2):                                    # output col phase
            wk = w_ref[b, a]                                  # (2C, 2C)
            # One deep matmul per (a, b) phase: both row taps stacked on N.
            r = jnp.dot(lhs[b], wk,
                        preferred_element_type=jnp.float32).reshape(th, w, 2 * c)
            g0 = r[..., 0:c]                                  # row-tap t = 0
            g1 = r[..., c:2 * c]                              # row-tap t = 1
            if a == 0:
                # output row p: tap0 <- X[p] (halo above for p = 0), tap1 <- X[p+1]
                top = jnp.dot(ph[b][0], wk,
                              preferred_element_type=jnp.float32)[:, 0:c]
                top = top.reshape(1, w, c)
                shifted = (jnp.concatenate([top, g0[:th - 1]], axis=0)
                           if th > 1 else top)
                y = shifted + g1 + bias
            else:
                # output row p: tap0 <- X[p+1], tap1 <- X[p+2] (halo below at p=TH-1)
                bot = jnp.dot(ph[b][1], wk,
                              preferred_element_type=jnp.float32)[:, c:2 * c]
                bot = bot.reshape(1, w, c)
                shifted = (jnp.concatenate([g1[1:], bot], axis=0)
                           if th > 1 else bot)
                y = g0 + shifted + bias
            if lane_aligned:
                o_ref[:, a, :, b * c:(b + 1) * c] = y.astype(o_ref.dtype)
            else:
                parts.append(y)
        if not lane_aligned:
            o_ref[:, a, :, :] = jnp.concatenate(parts, axis=-1).astype(o_ref.dtype)


def _pick_row_tile(batch, h, w, c, in_itemsize, out_itemsize, budget_bytes):
    """Largest divisor of H whose per-step VMEM footprint fits the budget."""
    def footprint(th):
        in_tile = th * (w + 2) * c * in_itemsize
        halo = 2 * (w + 2) * c * in_itemsize
        out_tile = th * 2 * w * 2 * c * out_itemsize
        patches = 2 * th * w * 2 * c * in_itemsize            # lane-folded col patches
        work = 20 * th * w * c                                 # live f32 intermediates
        wts = 2 * (2 * 2 * 2 * c * 2 * c) * in_itemsize        # (2,2,2C,2C) dbl-buffered
        return 2 * (in_tile + halo + out_tile) + patches + work + wts

    divisors = [d for d in range(1, h + 1) if h % d == 0]
    fitting = [d for d in divisors if footprint(d) <= budget_bytes] or [1]
    tile = max(fitting)
    # Ensure >= 2 grid steps so both v7x TensorCores / the megacore get work
    # even at batch size 1.
    if batch * (h // tile) < 2:
        split = [d for d in fitting if batch * (h // d) >= 2]
        if split:
            tile = max(split)
    return tile


def upsample_forward(x_nchw, weight_oihw=None, bias=None, *, with_conv=True,
                     compute_dtype=jnp.bfloat16, row_tile=None,
                     vmem_budget_bytes=28 * 1024 * 1024):
    """Equivalent of Upsample.forward.  x_nchw: (B, C, H, W)."""
    batch, c, h, w = x_nchw.shape

    if not with_conv:
        # nearest-neighbour 2x only: out[i, j] = in[i // 2, j // 2]
        # TODO(synk): a Pallas kernel adds nothing here (single mem-bound pass
        # that XLA already emits as one fusion); keep the XLA broadcast.
        return jnp.repeat(jnp.repeat(x_nchw, 2, axis=2), 2, axis=3)

    if weight_oihw is None or bias is None:
        raise ValueError("with_conv=True requires conv weight and bias")

    out_dtype = x_nchw.dtype
    in_itemsize = jnp.dtype(compute_dtype).itemsize
    out_itemsize = jnp.dtype(out_dtype).itemsize

    # ---- layout prep: ORIGINAL resolution, zero-padded on width only --------
    x_nhwc = jnp.transpose(x_nchw, (0, 2, 3, 1)).astype(compute_dtype)
    x_padw = jnp.pad(x_nhwc, ((0, 0), (0, 0), (1, 1), (0, 0)))   # (B, H, W+2, C)

    if row_tile is None:
        row_tile = _pick_row_tile(batch, h, w, c, in_itemsize, out_itemsize,
                                  vmem_budget_bytes)
    th = row_tile
    if h % th != 0:
        raise ValueError("row_tile must divide H")
    nt = h // th

    # Tiny per-tile halo rows (single row above / below each tile, zeros at the
    # image borders).  The big activation tensor is consumed through a plain
    # non-overlapping BlockSpec -> no duplicated HBM copy of the input.
    if nt == 1:
        halos = jnp.zeros((batch, 1, 2, w + 2, c), compute_dtype)
    else:
        zrow = jnp.zeros((batch, 1, w + 2, c), compute_dtype)
        top = jnp.concatenate([zrow, x_padw[:, th - 1:h - 1:th]], axis=1)
        bot = jnp.concatenate([x_padw[:, th:h:th], zrow], axis=1)
        halos = jnp.stack([top, bot], axis=2)                    # (B, nt, 2, W+2, C)
    # TODO(synk): add width tiling for extreme W*C where a single padded row
    # tile cannot fit VMEM.

    # ---- sub-pixel weight folding --------------------------------------------
    #   y[2p+a, 2q+b] = sum_{t,s in {0,1}} Weff[a,b,t,s]^T . x_pad[p+a+t, q+b+s]
    #   Weff[a,b,t,s] = sum_{dh in G[a][t], dw in G[b][s]} w3x3[dh, dw]
    # Width taps s stacked on K (=2C), row taps t stacked on N (=2C): every
    # output phase is a single deep MXU matmul.
    w_hwio = jnp.transpose(weight_oihw, (2, 3, 1, 0)).astype(jnp.float32)  # (3,3,Ci,Co)
    groups = (((0,), (1, 2)),        # phase 0: tap0 <- {0},    tap1 <- {1, 2}
              ((0, 1), (2,)))        # phase 1: tap0 <- {0, 1}, tap1 <- {2}
    per_b = []
    for b in range(2):
        per_a = []
        for a in range(2):
            cols = []
            for t in range(2):                        # row tap  -> stacked on N
                taps = []
                for s in range(2):                    # width tap -> stacked on K
                    acc = jnp.zeros((c, c), jnp.float32)
                    for dh in groups[a][t]:
                        for dw in groups[b][s]:
                            acc = acc + w_hwio[dh, dw]
                    taps.append(acc)
                cols.append(jnp.concatenate(taps, axis=0))        # (2C, C)
            per_a.append(jnp.concatenate(cols, axis=1))           # (2C, 2C)
        per_b.append(jnp.stack(per_a, axis=0))                    # (2, 2C, 2C)
    w_fold = jnp.stack(per_b, axis=0).astype(compute_dtype)       # (2, 2, 2C, 2C)

    bias2d = bias.reshape(1, c).astype(jnp.float32)

    # ---- pallas call ----------------------------------------------------------
    flops = 2 * batch * h * w * (2 * c) * (2 * c) * 4             # 4 matmuls, K=N=2C
    bytes_accessed = (batch * h * (w + 2) * c * in_itemsize
                      + batch * nt * 2 * (w + 2) * c * in_itemsize
                      + 16 * c * c * in_itemsize + c * 4
                      + batch * h * 2 * w * 2 * c * out_itemsize)

    out_raw = pl.pallas_call(
        _up2x_conv3x3_kernel,
        out_shape=jax.ShapeDtypeStruct((batch, h, 2, w, 2 * c), out_dtype),
        grid=(batch, nt),
        in_specs=[
            pl.BlockSpec((None, th, w + 2, c), lambda i, j: (i, j, 0, 0)),
            pl.BlockSpec((None, None, 2, w + 2, c), lambda i, j: (i, j, 0, 0, 0)),
            pl.BlockSpec((2, 2, 2 * c, 2 * c), lambda i, j: (0, 0, 0, 0)),
            pl.BlockSpec((1, c), lambda i, j: (0, 0)),
        ],
        out_specs=pl.BlockSpec((None, th, 2, w, 2 * c),
                               lambda i, j: (i, j, 0, 0, 0)),
        compiler_params=pltpu.CompilerParams(
            dimension_semantics=("parallel", "parallel"),
            vmem_limit_bytes=48 * 1024 * 1024),
        cost_estimate=pl.CostEstimate(flops=flops, transcendentals=0,
                                      bytes_accessed=bytes_accessed),
    )(x_padw, halos, w_fold, bias2d)

    # (B, H, 2, W, 2C) -> (B, 2H, 2W, C) is a FREE row-major reshape (the kernel
    # wrote the phases already interleaved in memory order), then back to NCHW.
    # TODO(synk): the NHWC->NCHW transpose stays an XLA pass to match the
    # PyTorch interface; NHWC consumers can take `out_nhwc` directly.
    out_nhwc = out_raw.reshape(batch, 2 * h, 2 * w, c)
    return jnp.transpose(out_nhwc, (0, 3, 1, 2))


if __name__ == "__main__":
    key = jax.random.PRNGKey(0)
    kx, kw, kb = jax.random.split(key, 3)

    B, C, H, W = 2, 4, 16, 16
    x = jax.random.normal(kx, (B, C, H, W), dtype=jnp.float32)

    # deterministic Conv2d-style init (uniform(-1/sqrt(fan_in), 1/sqrt(fan_in)))
    fan_in = C * 3 * 3
    bound = 1.0 / np.sqrt(fan_in)
    weight = jax.random.uniform(kw, (C, C, 3, 3), jnp.float32, -bound, bound)  # OIHW
    bias = jax.random.uniform(kb, (C,), jnp.float32, -bound, bound)

    # plain-JAX reference: nearest-2x upsample + same-padded conv3x3
    up_ref = jnp.repeat(jnp.repeat(x, 2, axis=2), 2, axis=3)
    ref = jax.lax.conv_general_dilated(
        up_ref, weight, window_strides=(1, 1), padding=((1, 1), (1, 1)),
        dimension_numbers=("NCHW", "OIHW", "NCHW"),
        precision=jax.lax.Precision.HIGHEST,
    ) + bias[None, :, None, None]

    # f32 compute path, single row tile (tight tolerance)
    out_f32 = jax.block_until_ready(
        upsample_forward(x, weight, bias, with_conv=True,
                         compute_dtype=jnp.float32))
    assert out_f32.shape == (B, C, 2 * H, 2 * W)
    np.testing.assert_allclose(np.asarray(out_f32), np.asarray(ref),
                               rtol=1e-4, atol=1e-4)

    # f32 compute path, forced multi-row-tile (exercises the halo-row path)
    out_tiled = jax.block_until_ready(
        upsample_forward(x, weight, bias, with_conv=True,
                         compute_dtype=jnp.float32, row_tile=4))
    np.testing.assert_allclose(np.asarray(out_tiled), np.asarray(ref),
                               rtol=1e-4, atol=1e-4)

    # default bf16 MXU path (loose tolerance: bf16 operands, f32 accumulation)
    out_bf16 = jax.block_until_ready(
        upsample_forward(x, weight, bias, with_conv=True))
    np.testing.assert_allclose(np.asarray(out_bf16), np.asarray(ref),
                               rtol=5e-2, atol=5e-2)

    # with_conv=False branch (pure nearest upsample)
    up_only = jax.block_until_ready(upsample_forward(x, with_conv=False))
    np.testing.assert_allclose(np.asarray(up_only), np.asarray(up_ref),
                               rtol=0, atol=0)

    print("KERNEL_OK")
</pallas_src>

<mosaic_0001>
module attributes {stable_mosaic.version = 11 : i64} {
  func.func @_up2x_conv3x3_kernel(%arg0: i32, %arg1: i32, %arg2: memref<1x16x18x4xf32, #tpu.memory_space<vmem>>, %arg3: memref<1x1x2x18x4xf32, #tpu.memory_space<vmem>>, %arg4: memref<2x2x8x8xf32, #tpu.memory_space<vmem>>, %arg5: memref<1x4xf32, #tpu.memory_space<vmem>>, %arg6: memref<1x16x2x16x8xf32, #tpu.memory_space<vmem>>) attributes {dimension_semantics = [#tpu.dimension_semantics<parallel>, #tpu.dimension_semantics<parallel>], iteration_bounds = array<i64: 2, 1>, scalar_prefetch = 0 : i64, scratch_operands = 0 : i64, tpu.core_type = #tpu.core_type<tc>, window_params = [{transform_indices = @transform_0, window_bounds = array<i64: 1, 16, 18, 4>}, {transform_indices = @transform_1, window_bounds = array<i64: 1, 1, 2, 18, 4>}, {pipeline_mode = #tpu.pipeline_mode<synchronous>, transform_indices = @transform_2, window_bounds = array<i64: 2, 2, 8, 8>}, {pipeline_mode = #tpu.pipeline_mode<synchronous>, transform_indices = @transform_3, window_bounds = array<i64: 1, 4>}, {transform_indices = @transform_4, window_bounds = array<i64: 1, 16, 2, 16, 8>}]} {
    %c0 = arith.constant 0 : index
    %c0_0 = arith.constant 0 : index
    %0 = vector.load %arg5[%c0, %c0_0] : memref<1x4xf32, #tpu.memory_space<vmem>>, vector<1x4xf32>
    %c0_1 = arith.constant 0 : index
    %c0_2 = arith.constant 0 : index
    %c0_3 = arith.constant 0 : index
    %c0_4 = arith.constant 0 : index
    %1 = vector.load %arg2[%c0_1, %c0_2, %c0_3, %c0_4] : memref<1x16x18x4xf32, #tpu.memory_space<vmem>>, vector<1x16x18x4xf32>
    %2 = vector.shape_cast %1 : vector<1x16x18x4xf32> to vector<16x18x4xf32>
    %3 = vector.extract_strided_slice %2 {offsets = [0, 0, 0], sizes = [16, 16, 4], strides = [1, 1, 1]} : vector<16x18x4xf32> to vector<16x16x4xf32>
    %4 = vector.extract_strided_slice %2 {offsets = [0, 1, 0], sizes = [16, 16, 4], strides = [1, 1, 1]} : vector<16x18x4xf32> to vector<16x16x4xf32>
    %5 = vector.extract_strided_slice %2 {offsets = [0, 2, 0], sizes = [16, 16, 4], strides = [1, 1, 1]} : vector<16x18x4xf32> to vector<16x16x4xf32>
    %6 = tpu.concatenate %3, %4 in 2 : vector<16x16x4xf32>, vector<16x16x4xf32> -> vector<16x16x8xf32>
    %7 = tpu.concatenate %4, %5 in 2 : vector<16x16x4xf32>, vector<16x16x4xf32> -> vector<16x16x8xf32>
    %c0_5 = arith.constant 0 : index
    %c0_6 = arith.constant 0 : index
    %c0_7 = arith.constant 0 : index
    %c0_8 = arith.constant 0 : index
    %c0_9 = arith.constant 0 : index
    %8 = vector.load %arg3[%c0_5, %c0_6, %c0_7, %c0_8, %c0_9] : memref<1x1x2x18x4xf32, #tpu.memory_space<vmem>>, vector<1x1x2x18x4xf32>
    %9 = vector.shape_cast %8 : vector<1x1x2x18x4xf32> to vector<2x18x4xf32>
    %10 = vector.extract_strided_slice %9 {offsets = [0, 0, 0], sizes = [2, 16, 4], strides = [1, 1, 1]} : vector<2x18x4xf32> to vector<2x16x4xf32>
    %11 = vector.extract_strided_slice %9 {offsets = [0, 1, 0], sizes = [2, 16, 4], strides = [1, 1, 1]} : vector<2x18x4xf32> to vector<2x16x4xf32>
    %12 = vector.extract_strided_slice %9 {offsets = [0, 2, 0], sizes = [2, 16, 4], strides = [1, 1, 1]} : vector<2x18x4xf32> to vector<2x16x4xf32>
    %13 = tpu.concatenate %10, %11 in 2 : vector<2x16x4xf32>, vector<2x16x4xf32> -> vector<2x16x8xf32>
    %14 = tpu.concatenate %11, %12 in 2 : vector<2x16x4xf32>, vector<2x16x4xf32> -> vector<2x16x8xf32>
    %15 = vector.shape_cast %6 : vector<16x16x8xf32> to vector<256x8xf32>
    %16 = vector.shape_cast %7 : vector<16x16x8xf32> to vector<256x8xf32>
    %c0_10 = arith.constant 0 : index
    %c0_11 = arith.constant 0 : index
    %c0_12 = arith.constant 0 : index
    %c0_13 = arith.constant 0 : index
    %17 = vector.load %arg4[%c0_10, %c0_11, %c0_12, %c0_13] : memref<2x2x8x8xf32, #tpu.memory_space<vmem>>, vector<1x1x8x8xf32>
    %18 = vector.shape_cast %17 : vector<1x1x8x8xf32> to vector<8x8xf32>
    %cst = arith.constant dense<0.000000e+00> : vector<256x8xf32>
    %19 = tpu.matmul %15, %18, %cst {dimension_numbers = #tpu.dot_dimension_numbers<[1], [0], [0], [1], [0, 0, 1, 1], [], []>} : vector<256x8xf32>, vector<8x8xf32>, vector<256x8xf32> -> vector<256x8xf32>
    %20 = vector.shape_cast %19 : vector<256x8xf32> to vector<16x16x8xf32>
    %21 = vector.extract_strided_slice %20 {offsets = [0, 0, 0], sizes = [16, 16, 4], strides = [1, 1, 1]} : vector<16x16x8xf32> to vector<16x16x4xf32>
    %22 = vector.extract_strided_slice %20 {offsets = [0, 0, 4], sizes = [16, 16, 4], strides = [1, 1, 1]} : vector<16x16x8xf32> to vector<16x16x4xf32>
    %23 = vector.extract_strided_slice %13 {offsets = [0, 0, 0], sizes = [1, 16, 8], strides = [1, 1, 1]} : vector<2x16x8xf32> to vector<1x16x8xf32>
    %24 = vector.shape_cast %23 : vector<1x16x8xf32> to vector<16x8xf32>
    %cst_14 = arith.constant dense<0.000000e+00> : vector<16x8xf32>
    %25 = tpu.matmul %24, %18, %cst_14 {dimension_numbers = #tpu.dot_dimension_numbers<[1], [0], [0], [1], [0, 0, 1, 1], [], []>} : vector<16x8xf32>, vector<8x8xf32>, vector<16x8xf32> -> vector<16x8xf32>
    %26 = vector.extract_strided_slice %25 {offsets = [0, 0], sizes = [16, 4], strides = [1, 1]} : vector<16x8xf32> to vector<16x4xf32>
    %27 = vector.shape_cast %26 : vector<16x4xf32> to vector<1x16x4xf32>
    %28 = vector.extract_strided_slice %21 {offsets = [0, 0, 0], sizes = [15, 16, 4], strides = [1, 1, 1]} : vector<16x16x4xf32> to vector<15x16x4xf32>
    %29 = tpu.concatenate %27, %28 in 0 : vector<1x16x4xf32>, vector<15x16x4xf32> -> vector<16x16x4xf32>
    %30 = arith.addf %29, %22 : vector<16x16x4xf32>
    %31 = vector.shape_cast %0 : vector<1x4xf32> to vector<1x1x4xf32>
    %32 = vector.broadcast %31 : vector<1x1x4xf32> to vector<16x16x4xf32>
    %33 = arith.addf %30, %32 : vector<16x16x4xf32>
    %c1 = arith.constant 1 : index
    %c0_15 = arith.constant 0 : index
    %c0_16 = arith.constant 0 : index
    %c0_17 = arith.constant 0 : index
    %34 = vector.load %arg4[%c1, %c0_15, %c0_16, %c0_17] : memref<2x2x8x8xf32, #tpu.memory_space<vmem>>, vector<1x1x8x8xf32>
    %35 = vector.shape_cast %34 : vector<1x1x8x8xf32> to vector<8x8xf32>
    %cst_18 = arith.constant dense<0.000000e+00> : vector<256x8xf32>
    %36 = tpu.matmul %16, %35, %cst_18 {dimension_numbers = #tpu.dot_dimension_numbers<[1], [0], [0], [1], [0, 0, 1, 1], [], []>} : vector<256x8xf32>, vector<8x8xf32>, vector<256x8xf32> -> vector<256x8xf32>
    %37 = vector.shape_cast %36 : vector<256x8xf32> to vector<16x16x8xf32>
    %38 = vector.extract_strided_slice %37 {offsets = [0, 0, 0], sizes = [16, 16, 4], strides = [1, 1, 1]} : vector<16x16x8xf32> to vector<16x16x4xf32>
    %39 = vector.extract_strided_slice %37 {offsets = [0, 0, 4], sizes = [16, 16, 4], strides = [1, 1, 1]} : vector<16x16x8xf32> to vector<16x16x4xf32>
    %40 = vector.extract_strided_slice %14 {offsets = [0, 0, 0], sizes = [1, 16, 8], strides = [1, 1, 1]} : vector<2x16x8xf32> to vector<1x16x8xf32>
    %41 = vector.shape_cast %40 : vector<1x16x8xf32> to vector<16x8xf32>
    %cst_19 = arith.constant dense<0.000000e+00> : vector<16x8xf32>
    %42 = tpu.matmul %41, %35, %cst_19 {dimension_numbers = #tpu.dot_dimension_numbers<[1], [0], [0], [1], [0, 0, 1, 1], [], []>} : vector<16x8xf32>, vector<8x8xf32>, vector<16x8xf32> -> vector<16x8xf32>
    %43 = vector.extract_strided_slice %42 {offsets = [0, 0], sizes = [16, 4], strides = [1, 1]} : vector<16x8xf32> to vector<16x4xf32>
    %44 = vector.shape_cast %43 : vector<16x4xf32> to vector<1x16x4xf32>
    %45 = vector.extract_strided_slice %38 {offsets = [0, 0, 0], sizes = [15, 16, 4], strides = [1, 1, 1]} : vector<16x16x4xf32> to vector<15x16x4xf32>
    %46 = tpu.concatenate %44, %45 in 0 : vector<1x16x4xf32>, vector<15x16x4xf32> -> vector<16x16x4xf32>
    %47 = arith.addf %46, %39 : vector<16x16x4xf32>
    %48 = vector.shape_cast %0 : vector<1x4xf32> to vector<1x1x4xf32>
    %49 = vector.broadcast %48 : vector<1x1x4xf32> to vector<16x16x4xf32>
    %50 = arith.addf %47, %49 : vector<16x16x4xf32>
    %51 = tpu.concatenate %33, %50 in 2 : vector<16x16x4xf32>, vector<16x16x4xf32> -> vector<16x16x8xf32>
    %c0_20 = arith.constant 0 : index
    %c0_21 = arith.constant 0 : index
    %c0_22 = arith.constant 0 : index
    %c0_23 = arith.constant 0 : index
    %c0_24 = arith.constant 0 : index
    %52 = vector.load %arg6[%c0_20, %c0_21, %c0_22, %c0_23, %c0_24] : memref<1x16x2x16x8xf32, #tpu.memory_space<vmem>>, vector<1x16x1x16x8xf32>
    %53 = vector.shape_cast %52 : vector<1x16x1x16x8xf32> to vector<16x16x8xf32>
    %54 = vector.shape_cast %51 : vector<16x16x8xf32> to vector<1x16x1x16x8xf32>
    tpu.vector_store %arg6[%c0_20, %c0_21, %c0_22, %c0_23, %c0_24], %54 {strides = array<i32>} : memref<1x16x2x16x8xf32, #tpu.memory_space<vmem>>, vector<1x16x1x16x8xf32>,
    %c0_25 = arith.constant 0 : index
    %c1_26 = arith.constant 1 : index
    %c0_27 = arith.constant 0 : index
    %c0_28 = arith.constant 0 : index
    %55 = vector.load %arg4[%c0_25, %c1_26, %c0_27, %c0_28] : memref<2x2x8x8xf32, #tpu.memory_space<vmem>>, vector<1x1x8x8xf32>
    %56 = vector.shape_cast %55 : vector<1x1x8x8xf32> to vector<8x8xf32>
    %cst_29 = arith.constant dense<0.000000e+00> : vector<256x8xf32>
    %57 = tpu.matmul %15, %56, %cst_29 {dimension_numbers = #tpu.dot_dimension_numbers<[1], [0], [0], [1], [0, 0, 1, 1], [], []>} : vector<256x8xf32>, vector<8x8xf32>, vector<256x8xf32> -> vector<256x8xf32>
    %58 = vector.shape_cast %57 : vector<256x8xf32> to vector<16x16x8xf32>
    %59 = vector.extract_strided_slice %58 {offsets = [0, 0, 0], sizes = [16, 16, 4], strides = [1, 1, 1]} : vector<16x16x8xf32> to vector<16x16x4xf32>
    %60 = vector.extract_strided_slice %58 {offsets = [0, 0, 4], sizes = [16, 16, 4], strides = [1, 1, 1]} : vector<16x16x8xf32> to vector<16x16x4xf32>
    %61 = vector.extract_strided_slice %13 {offsets = [1, 0, 0], sizes = [1, 16, 8], strides = [1, 1, 1]} : vector<2x16x8xf32> to vector<1x16x8xf32>
    %62 = vector.shape_cast %61 : vector<1x16x8xf32> to vector<16x8xf32>
    %cst_30 = arith.constant dense<0.000000e+00> : vector<16x8xf32>
    %63 = tpu.matmul %62, %56, %cst_30 {dimension_numbers = #tpu.dot_dimension_numbers<[1], [0], [0], [1], [0, 0, 1, 1], [], []>} : vector<16x8xf32>, vector<8x8xf32>, vector<16x8xf32> -> vector<16x8xf32>
    %64 = vector.extract_strided_slice %63 {offsets = [0, 4], sizes = [16, 4], strides = [1, 1]} : vector<16x8xf32> to vector<16x4xf32>
    %65 = vector.shape_cast %64 : vector<16x4xf32> to vector<1x16x4xf32>
    %66 = vector.extract_strided_slice %60 {offsets = [1, 0, 0], sizes = [15, 16, 4], strides = [1, 1, 1]} : vector<16x16x4xf32> to vector<15x16x4xf32>
    %67 = tpu.concatenate %66, %65 in 0 : vector<15x16x4xf32>, vector<1x16x4xf32> -> vector<16x16x4xf32>
    %68 = arith.addf %59, %67 : vector<16x16x4xf32>
    %69 = vector.shape_cast %0 : vector<1x4xf32> to vector<1x1x4xf32>
    %70 = vector.broadcast %69 : vector<1x1x4xf32> to vector<16x16x4xf32>
    %71 = arith.addf %68, %70 : vector<16x16x4xf32>
    %c1_31 = arith.constant 1 : index
    %c1_32 = arith.constant 1 : index
    %c0_33 = arith.constant 0 : index
    %c0_34 = arith.constant 0 : index
    %72 = vector.load %arg4[%c1_31, %c1_32, %c0_33, %c0_34] : memref<2x2x8x8xf32, #tpu.memory_space<vmem>>, vector<1x1x8x8xf32>
    %73 = vector.shape_cast %72 : vector<1x1x8x8xf32> to vector<8x8xf32>
    %cst_35 = arith.constant dense<0.000000e+00> : vector<256x8xf32>
    %74 = tpu.matmul %16, %73, %cst_35 {dimension_numbers = #tpu.dot_dimension_numbers<[1], [0], [0], [1], [0, 0, 1, 1], [], []>} : vector<256x8xf32>, vector<8x8xf32>, vector<256x8xf32> -> vector<256x8xf32>
    %75 = vector.shape_cast %74 : vector<256x8xf32> to vector<16x16x8xf32>
    %76 = vector.extract_strided_slice %75 {offsets = [0, 0, 0], sizes = [16, 16, 4], strides = [1, 1, 1]} : vector<16x16x8xf32> to vector<16x16x4xf32>
    %77 = vector.extract_strided_slice %75 {offsets = [0, 0, 4], sizes = [16, 16, 4], strides = [1, 1, 1]} : vector<16x16x8xf32> to vector<16x16x4xf32>
    %78 = vector.extract_strided_slice %14 {offsets = [1, 0, 0], sizes = [1, 16, 8], strides = [1, 1, 1]} : vector<2x16x8xf32> to vector<1x16x8xf32>
    %79 = vector.shape_cast %78 : vector<1x16x8xf32> to vector<16x8xf32>
    %cst_36 = arith.constant dense<0.000000e+00> : vector<16x8xf32>
    %80 = tpu.matmul %79, %73, %cst_36 {dimension_numbers = #tpu.dot_dimension_numbers<[1], [0], [0], [1], [0, 0, 1, 1], [], []>} : vector<16x8xf32>, vector<8x8xf32>, vector<16x8xf32> -> vector<16x8xf32>
    %81 = vector.extract_strided_slice %80 {offsets = [0, 4], sizes = [16, 4], strides = [1, 1]} : vector<16x8xf32> to vector<16x4xf32>
    %82 = vector.shape_cast %81 : vector<16x4xf32> to vector<1x16x4xf32>
    %83 = vector.extract_strided_slice %77 {offsets = [1, 0, 0], sizes = [15, 16, 4], strides = [1, 1, 1]} : vector<16x16x4xf32> to vector<15x16x4xf32>
    %84 = tpu.concatenate %83, %82 in 0 : vector<15x16x4xf32>, vector<1x16x4xf32> -> vector<16x16x4xf32>
    %85 = arith.addf %76, %84 : vector<16x16x4xf32>
    %86 = vector.shape_cast %0 : vector<1x4xf32> to vector<1x1x4xf32>
    %87 = vector.broadcast %86 : vector<1x1x4xf32> to vector<16x16x4xf32>
    %88 = arith.addf %85, %87 : vector<16x16x4xf32>
    %89 = tpu.concatenate %71, %88 in 2 : vector<16x16x4xf32>, vector<16x16x4xf32> -> vector<16x16x8xf32>
    %c0_37 = arith.constant 0 : index
    %c0_38 = arith.constant 0 : index
    %c1_39 = arith.constant 1 : index
    %c0_40 = arith.constant 0 : index
    %c0_41 = arith.constant 0 : index
    %90 = vector.load %arg6[%c0_37, %c0_38, %c1_39, %c0_40, %c0_41] : memref<1x16x2x16x8xf32, #tpu.memory_space<vmem>>, vector<1x16x1x16x8xf32>
    %91 = vector.shape_cast %90 : vector<1x16x1x16x8xf32> to vector<16x16x8xf32>
    %92 = vector.shape_cast %89 : vector<16x16x8xf32> to vector<1x16x1x16x8xf32>
    tpu.vector_store %arg6[%c0_37, %c0_38, %c1_39, %c0_40, %c0_41], %92 {strides = array<i32>} : memref<1x16x2x16x8xf32, #tpu.memory_space<vmem>>, vector<1x16x1x16x8xf32>,
    return
  }
  func.func @transform_0(%arg0: i32, %arg1: i32) -> (i32, i32, i32, i32) {
    %c0_i32 = arith.constant 0 : i32
    %c0_i32_0 = arith.constant 0 : i32
    %c0_i32_1 = arith.constant 0 : i32
    return %arg0, %arg1, %c0_i32, %c0_i32_0 : i32, i32, i32, i32
  }
  func.func @transform_1(%arg0: i32, %arg1: i32) -> (i32, i32, i32, i32, i32) {
    %c0_i32 = arith.constant 0 : i32
    %c0_i32_0 = arith.constant 0 : i32
    %c0_i32_1 = arith.constant 0 : i32
    %c0_i32_2 = arith.constant 0 : i32
    return %arg0, %arg1, %c0_i32, %c0_i32_0, %c0_i32_1 : i32, i32, i32, i32, i32
  }
  func.func @transform_2(%arg0: i32, %arg1: i32) -> (i32, i32, i32, i32) {
    %c0_i32 = arith.constant 0 : i32
    %c0_i32_0 = arith.constant 0 : i32
    %c0_i32_1 = arith.constant 0 : i32
    %c0_i32_2 = arith.constant 0 : i32
    %c0_i32_3 = arith.constant 0 : i32
    return %c0_i32, %c0_i32_0, %c0_i32_1, %c0_i32_2 : i32, i32, i32, i32
  }
  func.func @transform_3(%arg0: i32, %arg1: i32) -> (i32, i32) {
    %c0_i32 = arith.constant 0 : i32
    %c0_i32_0 = arith.constant 0 : i32
    %c0_i32_1 = arith.constant 0 : i32
    return %c0_i32, %c0_i32_0 : i32, i32
  }
  func.func @transform_4(%arg0: i32, %arg1: i32) -> (i32, i32, i32, i32, i32) {
    %c0_i32 = arith.constant 0 : i32
    %c0_i32_0 = arith.constant 0 : i32
    %c0_i32_1 = arith.constant 0 : i32
    %c0_i32_2 = arith.constant 0 : i32
    return %arg0, %arg1, %c0_i32, %c0_i32_0, %c0_i32_1 : i32, i32, i32, i32, i32
  }
}

</mosaic_0001>

<bundles_post_ra>
// kernel: tpu_custom_call.1
= control target key start
LH: loop header
LB: loop body
LE: loop exit
PB: predicated region body
PF: predicated region fallthrough
CT: control target
= control target key end

     0   :  { %s3070_s15 = smov 0   ;;  %s3072_s16 = smov 0   ;;  %s5538_s0 = inlined_call_operand.vmem [shape: f32[2,16,18,4], index: 0, kind: input, shape index: {}]   ;;  %s5539_s1 = inlined_call_operand.vmem [shape: f32[2,1,2,18,4], index: 1, kind: input, shape index: {}]   ;;  %s5540_s2 = inlined_call_operand.vmem [shape: f32[2,2,8,8], index: 2, kind: input, shape index: {}]   ;;  %s5541_s3 = inlined_call_operand.vmem [shape: f32[1,4], index: 3, kind: input, shape index: {}]   ;;  %s5542_s4 = inlined_call_operand.vmem [shape: f32[2,16,2,16,8], index: 4, kind: output, shape index: {}]  }
   0x1   :  { %s3074_s17 = smov 0  }
   0x2 LB: > { %s26_s18 = sadd.s32 1, %s3037_s16  ;;  %p2810_p0 = scmp.ge.s32.totalorder %s3041_s17, 1  ;;  %s3041_s17 = sphi %s3074_s17, %s14_s17   ;;  %s3037_s16 = sphi %s3072_s16, %s5954_s16   ;;  %s3033_s15 = sphi %s3070_s15, %s5953_s15  }
   0x3   : > { %p28_p1 = scmp.ge.s32.totalorder %s26_s18, 2  ;;  %p200_p2 = scmp.lt.s32.totalorder %s3041_s17, 3 }
   0x5   : > { %s5956_s18 = smov (%p28_p1, %s26_s18), 0  ;;  %p201_p3 = pnand %p2810_p0, %p200_p2 }
   0x7   : > { %204 = sbr.rel (%p201_p3) target bundleno = 1022 (0x3fe), region = 36 }
   0xc   : > { %p246_p4 = scmp.lt.s32.totalorder %s3033_s15, 1  ;;  %vm373_vm0 = vcmask 1046528   ;;  %s3043_s23 = smov 4   ;;  %vm550_vm1 = vcmask 31744   ;;  %vm822_vm2 = vcmask 64512  }
   0xd   : > { %s3044_s10 = smov 124  }
   0xe   : > { %s5958_s15 = smov (!%p246_p4, %s3033_s15), 1 }
   0xf   : > { %s2989_s19 = smul.u32 384, %s5958_s15  ;;  %s2988_s13 = sshll.u32 %s5958_s15, 9 }
  0x10   : > { %s2990_s28 = smul.u32 48, %s5958_s15  ;;  %s4764_s20 = scalar_lea.vmem %s5542_s4, %s2988_s13 }
  0x11   : > { %s3094_s22 = scalar_lea.vmem %s5538_s0, %s2989_s19 }
  0x12   : > { %v3097_v0 = vld [vmem:[%s3094_s22 + $0x30] sm:$0xff]  ;;  %v3100_v1 = vld [vmem:[%s3094_s22 + $0x38] sm:$0xff]  ;;  %v3108_v5 = vld [vmem:[%s3094_s22 + $0x20] sm:$0xff]  ;;  %s264_s5 = scalar_lea.vmem %s5539_s1, %s2990_s28 }
  0x13   : > { %v3103_v2 = vld [vmem:[%s3094_s22 + $0x18] sm:$0xff]  ;;  %v384_v3 = vrot.slane %v3097_v0, 1  ;;  %v385_v4 = vrot.slane %v3100_v1, 1  ;;  %v3112_v7 = vld [vmem:[%s3094_s22] sm:$0xff]  ;;  %v3115_v8 = vld [vmem:[%s3094_s22 + $0x8] sm:$0xff]  ;;  %v380_v9 = vrot.slane %v3108_v5, 1 }
  0x14   : > { %v379_v6 = vrot.slane %v3103_v2, 1  ;;  %v374_v10 = vrot.slane %v3112_v7, 1  ;;  %v375_v11 = vrot.slane %v3115_v8, 1  ;;  %v3121_v12 = vld [vmem:[%s3094_s22 + $0x40] sm:$0x3]  ;;  %v3151_v25 = vld [vmem:[%s3094_s22 + $0x68] sm:$0xff] }
  0x15   : > { %v386_v13 = vsel %vm373_vm0, %v384_v3, %v385_v4  ;;  %v3125_v14 = vld [vmem:[%s3094_s22 + $0x28] sm:$0x3]  ;;  %v3128_v15 = vld [vmem:[%s3094_s22 + $0x10] sm:$0x3]  ;;  %v387_v18 = vrot.slane %v3121_v12, 1  ;;  %v3148_v24 = vld [vmem:[%s3094_s22 + $0x60] sm:$0xff] }
  0x16   : > { %462 = vrot.lane.b32.xlu2 %v386_v13, %s3043_s23  ;;  %v381_v16 = vsel %vm373_vm0, %v379_v6, %v380_v9  ;;  %v376_v17 = vsel %vm373_vm0, %v374_v10, %v375_v11  ;;  %v382_v19 = vrot.slane %v3125_v14, 1  ;;  %v377_v20 = vrot.slane %v3128_v15, 1  ;;  %v3154_v26 = vld [vmem:[%s3094_s22 + $0x50] sm:$0xff]  ;;  %v3157_v27 = vld [vmem:[%s3094_s22 + $0x58] sm:$0x3]  ;;  %v3160_v28 = vld [vmem:[%s3094_s22 + $0x48] sm:$0xff] }
  0x17   : > { %458 = vrot.lane.b32.xlu1 %v381_v16, %s3043_s23  ;;  %454 = vrot.lane.b32.xlu0 %v376_v17, %s3043_s23  ;;  %v388_v21 = vsel %vm373_vm0, %v385_v4, %v387_v18  ;;  %v394_v29 = vrot.slane %v3148_v24, 1  ;;  %v395_v30 = vrot.slane %v3151_v25, 1  ;;  %v390_v31 = vrot.slane %v3154_v26, 1  ;;  %v3176_v37 = vld [vmem:[%s3094_s22 + $0x80] sm:$0xff]  ;;  %v3179_v38 = vld [vmem:[%s3094_s22 + $0x88] sm:$0x3] }
  0x18   : > { %v383_v22 = vsel %vm373_vm0, %v380_v9, %v382_v19  ;;  %v378_v23 = vsel %vm373_vm0, %v375_v11, %v377_v20  ;;  %v392_v32 = vrot.slane %v3157_v27, 1  ;;  %v389_v33 = vrot.slane %v3160_v28, 1  ;;  %v3182_v39 = vld [vmem:[%s3094_s22 + $0x78] sm:$0xff]  ;;  %v3185_v40 = vld [vmem:[%s3094_s22 + $0x70] sm:$0x3]  ;;  %v3202_v48 = vld [vmem:[%s3094_s22 + $0xa8] sm:$0xff] }
  0x19   : > { %v396_v34 = vsel %vm373_vm0, %v394_v29, %v395_v30  ;;  %v400_v41 = vrot.slane %v3176_v37, 1  ;;  %v5549_v42 = vrot.slane %v3179_v38, 1  ;;  %v399_v43 = vrot.slane %v3182_v39, 1  ;;  %v3205_v49 = vld [vmem:[%s3094_s22 + $0xb0] sm:$0xff]  ;;  %v3208_v50 = vld [vmem:[%s3094_s22 + $0x98] sm:$0xff]  ;;  %v3230_v61 = vld [vmem:[%s3094_s22 + $0xc8] sm:$0xff] }
  0x1a   : > { %v393_v35 = vsel %vm373_vm0, %v390_v31, %v392_v32  ;;  %v391_v36 = vsel %vm373_vm0, %v389_v33, %v390_v31  ;;  %v5548_v44 = vrot.slane %v3185_v40, 1  ;;  %v3211_v51 = vld [vmem:[%s3094_s22 + $0xa0] sm:$0x3]  ;;  %v3214_v52 = vld [vmem:[%s3094_s22 + $0x90] sm:$0xff]  ;;  %v409_v53 = vrot.slane %v3202_v48, 1  ;;  %v3268_v29 = vld [vmem:[%s3094_s22 + $0xd8] sm:$0xff] }
  0x1b   : > { %v403_v45 = vsel %vm373_vm0, %v400_v41, %v5549_v42  ;;  %v401_v46 = vsel %vm373_vm0, %v399_v43, %v400_v41  ;;  %v410_v54 = vrot.slane %v3205_v49, 1  ;;  %v405_v55 = vrot.slane %v3208_v50, 1  ;;  %v3233_v62 = vld [vmem:[%s3094_s22 + $0xd0] sm:$0x3]  ;;  %v3236_v63 = vld [vmem:[%s3094_s22 + $0xc0] sm:$0xff] }
  0x1c   : > { %v398_v47 = vsel %vm373_vm0, %v395_v30, %v5548_v44  ;;  %v407_v56 = vrot.slane %v3211_v51, 1  ;;  %v404_v57 = vrot.slane %v3214_v52, 1  ;;  %5644 = vst [vmem:[#allocation2_spill] sm:$0xff] %v3233_v62  ;;  %v3239_v3 = vld [vmem:[%s3094_s22 + $0xb8] sm:$0x3]  ;;  %v415_v4 = vrot.slane %v3230_v61, 1 }
  0x1d   : > { %v411_v58 = vsel %vm373_vm0, %v409_v53, %v410_v54  ;;  %v5546_v6 = vrot.slane %v3233_v62, 1  ;;  %v414_v9 = vrot.slane %v3236_v63, 1  ;;  %v5545_v10 = vrot.slane %v3239_v3, 1  ;;  %v3256_v17 = vld [vmem:[%s3094_s22 + $0xf0] sm:$0xff]  ;;  %v3293_v53 = vld [vmem:[%s3094_s22 + $0x100] sm:$0x3] }
  0x1e   : > { %464 = vrot.lane.b32.xlu2 %v388_v21, %s3043_s23  ;;  %v408_v59 = vsel %vm373_vm0, %v405_v55, %v407_v56  ;;  %v406_v60 = vsel %vm373_vm0, %v404_v57, %v405_v55  ;;  %v3259_v21 = vld [vmem:[%s3094_s22 + $0xf8] sm:$0xff]  ;;  %v424_v30 = vrot.slane %v3256_v17, 1  ;;  %5647 = vst [vmem:[#allocation5_spill] sm:$0xff] %v3293_v53  ;;  %v3358_v44 = vld [vmem:[%s3094_s22 + $0x170] sm:$0xff] }
  0x1f   : > { %460 = vrot.lane.b32.xlu1 %v383_v22, %s3043_s23  ;;  %456 = vrot.lane.b32.xlu0 %v378_v23, %s3043_s23  ;;  %v418_v11 = vsel %vm373_vm0, %v415_v4, %v5546_v6  ;;  %v416_v13 = vsel %vm373_vm0, %v414_v9, %v415_v4  ;;  %v413_v16 = vsel %vm373_vm0, %v410_v54, %v5545_v10  ;;  %v3262_v22 = vld [vmem:[%s3094_s22 + $0xe0] sm:$0xff]  ;;  %v3265_v23 = vld [vmem:[%s3094_s22 + $0xe8] sm:$0x3]  ;;  %v425_v31 = vrot.slane %v3259_v21, 1 }
  0x20   : > { %5645 = vst [vmem:[#allocation3_spill] sm:$0xff] %v3265_v23  ;;  %v420_v33 = vrot.slane %v3262_v22, 1  ;;  %v3310_v9 = vld [vmem:[%s3094_s22 + $0x138] sm:$0xff] }
  0x21   : > { %5648 = vst [vmem:[#allocation6_spill] sm:$0xff] %v3310_v9 }
  0x22   : > { %5657 = vst [vmem:[#allocation15_spill] sm:$0xff] %v3358_v44 }
  0x26   : > { %470 = vrot.lane.b32.xlu2 %v396_v34, %s3043_s23  ;;  %v5547_v34 = vrot.slane %v3265_v23, 1 }
  0x27   : > { %468 = vrot.lane.b32.xlu1 %v393_v35, %s3043_s23  ;;  %466 = vrot.lane.b32.xlu0 %v391_v36, %s3043_s23  ;;  %v419_v35 = vrot.slane %v3268_v29, 1  ;;  %v426_v36 = vsel %vm373_vm0, %v424_v30, %v425_v31  ;;  %v3322_v30 = vld [vmem:[%s3094_s22 + $0x120] sm:$0xff] }
  0x28   : > { %v423_v41 = vsel %vm373_vm0, %v420_v33, %v5547_v34  ;;  %5652 = vst [vmem:[#allocation10_spill] sm:$0xff] %v3322_v30 }
  0x29   : > { %v421_v43 = vsel %vm373_vm0, %v419_v35, %v420_v33 }
  0x2e   : > { %476 = vrot.lane.b32.xlu2 %v403_v45, %s3043_s23  ;;  %v3284_v45 = vld [vmem:[%s3094_s22 + $0x110] sm:$0xff] }
  0x2f   : > { %474 = vrot.lane.b32.xlu1 %v401_v46, %s3043_s23  ;;  %472 = vrot.lane.b32.xlu0 %v398_v47, %s3043_s23  ;;  %v3287_v46 = vld [vmem:[%s3094_s22 + $0x118] sm:$0x3]  ;;  %v3290_v47 = vld [vmem:[%s3094_s22 + $0x108] sm:$0xff]  ;;  %v430_v54 = vrot.slane %v3284_v45, 1 }
  0x30   : > { %5646 = vst [vmem:[#allocation4_spill] sm:$0xff] %v3287_v46  ;;  %v5544_v55 = vrot.slane %v3287_v46, 1  ;;  %v429_v57 = vrot.slane %v3290_v47, 1 }
  0x36   : > { %482 = vrot.lane.b32.xlu2 %v411_v58, %s3043_s23  ;;  %v5543_v58 = vrot.slane %v3293_v53, 1 }
  0x37   : > { %480 = vrot.lane.b32.xlu1 %v408_v59, %s3043_s23  ;;  %478 = vrot.lane.b32.xlu0 %v406_v60, %s3043_s23  ;;  %v433_v59 = vsel %vm373_vm0, %v430_v54, %v5544_v55  ;;  %v431_v60 = vsel %vm373_vm0, %v429_v57, %v430_v54 }
  0x38   : > { %v428_v4 = vsel %vm373_vm0, %v425_v31, %v5543_v58  ;;  %v439_v31 = vrot.slane %v3310_v9, 1  ;;  %v3345_v58 = vld [vmem:[%s3094_s22 + $0x148] sm:$0x3] }
  0x39   : > { %5656 = vst [vmem:[#allocation14_spill] sm:$0xff] %v3345_v58  ;;  %v442_v55 = vrot.slane %v3345_v58, 1 }
  0x3e   : > { %488 = vrot.lane.b32.xlu2 %v418_v11, %s3043_s23  ;;  %v3313_v11 = vld [vmem:[%s3094_s22 + $0x140] sm:$0xff] }
  0x3f   : > { %486 = vrot.lane.b32.xlu1 %v416_v13, %s3043_s23  ;;  %484 = vrot.lane.b32.xlu0 %v413_v16, %s3043_s23  ;;  %5649 = vst [vmem:[#allocation7_spill] sm:$0xff] %v3313_v11  ;;  %v3316_v13 = vld [vmem:[%s3094_s22 + $0x128] sm:$0xff]  ;;  %v3319_v16 = vld [vmem:[%s3094_s22 + $0x130] sm:$0x3]  ;;  %v440_v33 = vrot.slane %v3313_v11, 1 }
  0x40   : > { %5650 = vst [vmem:[#allocation8_spill] sm:$0xff] %v3316_v13  ;;  %v435_v35 = vrot.slane %v3316_v13, 1 }
  0x41   : > { %5651 = vst [vmem:[#allocation9_spill] sm:$0xff] %v3319_v16  ;;  %v443_v34 = vsel %vm373_vm0, %v440_v33, %v442_v55 }
  0x46   : > { %494 = vrot.lane.b32.xlu2 %v426_v36, %s3043_s23  ;;  %v437_v36 = vrot.slane %v3319_v16, 1 }
  0x47   : > { %492 = vrot.lane.b32.xlu1 %v423_v41, %s3043_s23  ;;  %490 = vrot.lane.b32.xlu0 %v421_v43, %s3043_s23  ;;  %v434_v41 = vrot.slane %v3322_v30, 1  ;;  %v441_v43 = vsel %vm373_vm0, %v439_v31, %v440_v33 }
  0x48   : > { %v438_v54 = vsel %vm373_vm0, %v435_v35, %v437_v36 }
  0x49   : > { %v436_v57 = vsel %vm373_vm0, %v434_v41, %v435_v35 }
  0x4e   : > { %500 = vrot.lane.b32.xlu2 %v433_v59, %s3043_s23  ;;  %v3336_v59 = vld [vmem:[%s3094_s22 + $0x158] sm:$0xff] }
  0x4f   : > { %498 = vrot.lane.b32.xlu1 %v431_v60, %s3043_s23  ;;  %496 = vrot.lane.b32.xlu0 %v428_v4, %s3043_s23  ;;  %5653 = vst [vmem:[#allocation11_spill] sm:$0xff] %v3336_v59  ;;  %v3339_v60 = vld [vmem:[%s3094_s22 + $0x160] sm:$0x3]  ;;  %v3342_v4 = vld [vmem:[%s3094_s22 + $0x150] sm:$0xff]  ;;  %v445_v31 = vrot.slane %v3336_v59, 1 }
  0x50   : > { %5654 = vst [vmem:[#allocation12_spill] sm:$0xff] %v3339_v60  ;;  %v447_v35 = vrot.slane %v3339_v60, 1  ;;  %v444_v41 = vrot.slane %v3342_v4, 1 }
  0x51   : > { %5655 = vst [vmem:[#allocation13_spill] sm:$0xff] %v3342_v4 }
  0x52   : > { %v448_v10 = vsel %vm373_vm0, %v445_v31, %v447_v35  ;;  %v446_v6 = vsel %vm373_vm0, %v444_v41, %v445_v31 }
  0x56   : > { %506 = vrot.lane.b32.xlu2 %v441_v43, %s3043_s23  ;;  %v3361_v43 = vld [vmem:[%s3094_s22 + $0x178] sm:$0x3] }
  0x57   : > { %504 = vrot.lane.b32.xlu1 %v438_v54, %s3043_s23  ;;  %502 = vrot.lane.b32.xlu0 %v436_v57, %s3043_s23  ;;  %5658 = vst [vmem:[#allocation16_spill] sm:$0xff] %v3361_v43  ;;  %v3364_v54 = vld [vmem:[%s3094_s22 + $0x168] sm:$0xff]  ;;  %v450_v57 = vrot.slane %v3358_v44, 1  ;;  %v452_v42 = vrot.slane %v3361_v43, 1 }
  0x58   : > { %5659 = vst [vmem:[#allocation17_spill] sm:$0xff] %v3364_v54  ;;  %v449_v31 = vrot.slane %v3364_v54, 1 }
  0x59   : > { %v453_v33 = vsel %vm373_vm0, %v450_v57, %v452_v42 }
  0x5a   : > { %v451_v41 = vsel %vm373_vm0, %v449_v31, %v450_v57  ;;  %v5663_v57 = vrot.slane %v3233_v62, 1 }
  0x5e   : > { %512 = vrot.lane.b32.xlu2 %v448_v10, %s3043_s23  ;;  %v2849_v10 = vld [vmem:[%s5540_s2 + $0x10] sm:$0xff] }
  0x5f   : > { %510 = vrot.lane.b32.xlu1 %v446_v6, %s3043_s23  ;;  %508 = vrot.lane.b32.xlu0 %v443_v34, %s3043_s23  ;;  %v821_v6 = vld [vmem:[%s5540_s2] sm:$0xff]  ;;  %v5662_v34 = vrot.slane %v3265_v23, 1 }
  0x60   : > { %902 = vmatpush.msra.mxu0 %v821_v6  ;;  %1021 = vmatpush.msra.mxu1 %v821_v6 }
  0x61   : > { %1305 = vmatpush.msra.mxu2 %v2849_v10 }
  0x63   : > { %1428 = vmatpush.msrb.mxu2 %v2849_v10 }
  0x66   : > { %583 = vrot.lane.b32.xlu2 %v377_v20, %s3043_s23 }
  0x67   : > { %516 = vrot.lane.b32.xlu1 %v453_v33, %s3043_s23  ;;  %514 = vrot.lane.b32.xlu0 %v451_v41, %s3043_s23  ;;  %v5665_v33 = vrot.slane %v3287_v46, 1  ;;  %v5666_v41 = vrot.slane %v3293_v53, 1  ;;  %v3471_v53 = vld [vmem:[%s264_s5 + $0x28] sm:$0x3] }
  0x68   : > { %5668 = vst [vmem:[#allocation19_spill] sm:$0xff] %v3471_v53 }
  0x6e   : > { %589 = vrot.lane.b32.xlu2 %v392_v32, %s3043_s23  ;;  %v5660_v32 = vrot.slane %v3179_v38, 1 }
  0x6f   : > { %587 = vrot.lane.b32.xlu1 %v387_v18, %s3043_s23  ;;  %585 = vrot.lane.b32.xlu0 %v382_v19, %s3043_s23  ;;  %v5661_v18 = vrot.slane %v3185_v40, 1 }
  0x70   : > { %v3391_v20 = vpop.permute.xlu2 %462 }
  0x76   : > { %595 = vrot.lane.b32.xlu2 %v407_v56, %s3043_s23  ;;  %v5664_v56 = vrot.slane %v3239_v3, 1 }
  0x77   : > { %593 = vrot.lane.b32.xlu1 %v5660_v32, %s3043_s23  ;;  %591 = vrot.lane.b32.xlu0 %v5661_v18, %s3043_s23  ;;  %v3437_v18 = vld [vmem:[%s264_s5 + $0x18] sm:$0xff] }
  0x78   : > { %v3405_v19 = vpop.permute.xlu2 %464 }
  0x7e   : > { %601 = vrot.lane.b32.xlu2 %v5662_v34, %s3043_s23  ;;  %v3439_v34 = vld [vmem:[%s264_s5 + $0x20] sm:$0xff] }
  0x7f   : > { %599 = vrot.lane.b32.xlu1 %v5663_v57, %s3043_s23  ;;  %597 = vrot.lane.b32.xlu0 %v5664_v56, %s3043_s23  ;;  %v3441_v57 = vld [vmem:[%s264_s5 + $0x8] sm:$0xff]  ;;  %v3443_v56 = vld [vmem:[%s264_s5 + $0x10] sm:$0x3] }
  0x80   : > { %v3416_v31 = vpop.permute.xlu2 %470  ;;  %5667 = vst [vmem:[#allocation18_spill] sm:$0xff] %v3443_v56  ;;  %v660_v43 = vrot.slane %v3441_v57, 1  ;;  %v662_v60 = vrot.slane %v3443_v56, 1 }
  0x82   : > { %v663_v54 = vsel %vm373_vm0, %v660_v43, %v662_v60 }
  0x86   : > { %607 = vrot.lane.b32.xlu2 %v437_v36, %s3043_s23 }
  0x87   : > { %605 = vrot.lane.b32.xlu1 %v5665_v33, %s3043_s23  ;;  %603 = vrot.lane.b32.xlu0 %v5666_v41, %s3043_s23  ;;  %v3445_v33 = vld [vmem:[%s264_s5] sm:$0xff]  ;;  %v665_v41 = vrot.slane %v3439_v34, 1 }
  0x88   : > { %v3426_v6 = vpop.permute.xlu2 %476  ;;  %v659_v58 = vrot.slane %v3445_v33, 1 }
  0x89   : > { %v459_v10 = vpop.permute.xlu1 %458  ;;  %v455_v32 = vpop.permute.xlu0 %454 }
  0x8a   : > { %v3433_v36 = vsel %vm550_vm1, %v3112_v7, %v455_v32  ;;  %v664_v7 = vrot.slane %v3437_v18, 1  ;;  %v661_v56 = vsel %vm373_vm0, %v659_v58, %v660_v43  ;;  %v3483_v43 = vsel %vm550_vm1, %v3103_v2, %v459_v10 }
  0x8b   : > { %2815 = vmatmul.msk.f32.vlgmr.msra.gmra.mxu0 %vm822_vm2, %v3433_v36 }
  0x8c   : > { %v666_v46 = vsel %vm373_vm0, %v664_v7, %v665_v41 }
  0x8e   : > { %613 = vrot.lane.b32.xlu2 %v452_v42, %s3043_s23 }
  0x8f   : > { %611 = vrot.lane.b32.xlu1 %v447_v35, %s3043_s23  ;;  %609 = vrot.lane.b32.xlu0 %v442_v55, %s3043_s23  ;;  %v741_v55 = vrot.slane %v3433_v36, 1 }
  0x90   : > { %v3452_v32 = vpop.permute.xlu2 %482 }
  0x91   : > { %v461_v16 = vpop.permute.xlu1 %460  ;;  %v457_v44 = vpop.permute.xlu0 %456 }
  0x92   : > { %v3459_v42 = vsel %vm550_vm1, %v3115_v8, %v457_v44  ;;  %v667_v44 = vrot.slane %v3471_v53, 1  ;;  %v3495_v53 = vsel %vm550_vm1, %v3108_v5, %v461_v16 }
  0x93   : > { %v742_v35 = vrot.slane %v3459_v42, 1  ;;  %2816 = vmatmul.msk.f32.gmra.mxu0 %vm822_vm2, %v3459_v42 }
  0x95   : > { %v3469_v59 = vsel %vm373_vm0, %v741_v55, %v742_v35  ;;  %v668_v55 = vsel %vm373_vm0, %v665_v41, %v667_v44 }
  0x96   : > { %2850 = vmatmul.msk.f32.vlgmr.msra.gmra.mxu2 %vm822_vm2, %v3469_v59  ;;  %673 = vrot.lane.b32.xlu2 %v666_v46, %s3043_s23 }
  0x97   : > { %671 = vrot.lane.b32.xlu1 %v663_v54, %s3043_s23  ;;  %669 = vrot.lane.b32.xlu0 %v661_v56, %s3043_s23 }
  0x98   : > { %v3478_v8 = vpop.permute.xlu2 %488 }
  0x99   : > { %v469_v7 = vpop.permute.xlu1 %468  ;;  %v467_v58 = vpop.permute.xlu0 %466 }
  0x9a   : > { %v3531_v11 = vsel %vm550_vm1, %v3160_v28, %v467_v58  ;;  %v746_v58 = vrot.slane %v3483_v43, 1 }
  0x9b   : > { %2817 = vmatmul.msk.f32.gmra.mxu0 %vm822_vm2, %v3483_v43 }
  0x9e   : > { %687 = vrot.lane.b32.xlu2 %v667_v44, %s3043_s23 }
  0x9f   : > { %685 = vrot.lane.b32.xlu1 %v662_v60, %s3043_s23  ;;  %675 = vrot.lane.b32.xlu0 %v668_v55, %s3043_s23  ;;  %v3506_v60 = vsel %vm550_vm1, %v3097_v0, %v3391_v20  ;;  %v3519_v55 = vsel %vm550_vm1, %v3100_v1, %v3405_v19 }
  0xa0   : > { %v3491_v46 = vpop.permute.xlu2 %494 }
  0xa1   : > { %v475_v54 = vpop.permute.xlu1 %474  ;;  %v473_v56 = vpop.permute.xlu0 %472 }
  0xa3   : > { %2818 = vmatmul.msk.f32.gmra.mxu0 %vm822_vm2, %v3495_v53 }
  0xa8   : > { %v3499_v2 = vpop.permute.xlu2 %500 }
  0xa9   : > { %v3501_v10 = vpop.permute.xlu1 %480  ;;  %v479_v41 = vpop.permute.xlu0 %478 }
  0xab   : > { %2819 = vmatmul.msk.f32.gmra.mxu0 %vm822_vm2, %v3506_v60 }
  0xb0   : > { %v3510_v44 = vpop.permute.xlu2 %506 }
  0xb1   : > { %5669 = vst [vmem:[#allocation20_spill] sm:$0xff] %v3510_v44  ;;  %v3512_v5 = vpop.permute.xlu1 %486  ;;  %v3514_v16 = vpop.permute.xlu0 %484  ;;  %v3543_v44 = vsel %vm550_vm1, %v3154_v26, %v469_v7  ;;  %v3561_v26 = vsel %vm550_vm1, %v3148_v24, %v3416_v31  ;;  %v2884_v24 = vld [vmem:[%s5540_s2 + $0x8] sm:$0xff]  ;;  %v3581_v31 = vsel %vm550_vm1, %v3151_v25, %v473_v56 }
  0xb2   : > { %1956 = vmatpush.msra.mxu3 %v2884_v24  ;;  %1837 = vmatpush.msrb.mxu1 %v2884_v24 }
  0xb3   : > { %2820 = vmatmul.msk.f32.gmra.mxu0 %vm822_vm2, %v3519_v55 }
  0xb8   : > { %v3523_v4 = vpop.permute.xlu2 %512 }
  0xb9   : > { %5670 = vst [vmem:[#allocation21_spill] sm:$0xff] %v3523_v4  ;;  %v3525_v0 = vpop.permute.xlu1 %492  ;;  %v3527_v20 = vpop.permute.xlu0 %490 }
  0xbb   : > { %2821 = vmatmul.msk.f32.gmra.mxu0 %vm822_vm2, %v3531_v11 }
  0xc0   : > { %v584_v23 = vpop.permute.xlu2 %583 }
  0xc1   : > { %v3535_v9 = vpop.permute.xlu1 %498  ;;  %v631_v1 = vsel %vm550_vm1, %v3128_v15, %v584_v23  ;;  %v3539_v19 = vpop.permute.xlu0 %496  ;;  %v747_v15 = vrot.slane %v3495_v53, 1 }
  0xc2   : > { %v744_v4 = vrot.slane %v631_v1, 1 }
  0xc3   : > { %2822 = vmatmul.msk.f32.gmra.mxu0 %vm822_vm2, %v3543_v44 }
  0xc4   : > { %v3548_v28 = vsel %vm373_vm0, %v742_v35, %v744_v4  ;;  %v3566_v4 = vsel %vm373_vm0, %v746_v58, %v747_v15 }
  0xc5   : > { %2851 = vmatmul.msk.f32.gmra.mxu2 %vm822_vm2, %v3548_v28 }
  0xc8   : > { %v590_v23 = vpop.permute.xlu2 %589 }
  0xc9   : > { %v3554_v13 = vpop.permute.xlu1 %504  ;;  %v3556_v1 = vpop.permute.xlu0 %502 }
  0xca   : > { %5671 = vst [vmem:[#allocation22_spill] sm:$0xff] %v3554_v13 }
  0xcb   : > { %5672 = vst [vmem:[#allocation23_spill] sm:$0xff] %v3556_v1  ;;  %2823 = vmatmul.msk.f32.gmra.mxu0 %vm822_vm2, %v3561_v26 }
  0xcd   : > { %2852 = vmatmul.msk.f32.gmra.mxu2 %vm822_vm2, %v3566_v4 }
  0xd0   : > { %v3570_v35 = vpop.permute.xlu2 %595 }
  0xd1   : > { %v3572_v7 = vpop.permute.xlu1 %510  ;;  %v3574_v13 = vpop.permute.xlu0 %508 }
  0xd2   : > { %5673 = vst [vmem:[#allocation24_spill] sm:$0xff] %v3572_v7 }
  0xd3   : > { %5674 = vst [vmem:[#allocation25_spill] sm:$0xff] %v3574_v13  ;;  %2824 = vmatmul.msk.f32.gmra.mxu0 %vm822_vm2, %v3581_v31  ;;  %v3593_v13 = vsel %vm550_vm1, %v3182_v39, %v475_v54 }
  0xd8   : > { %v3585_v58 = vpop.permute.xlu2 %601 }
  0xd9   : > { %5675 = vst [vmem:[#allocation26_spill] sm:$0xff] %v3585_v58  ;;  %v3587_v62 = vpop.permute.xlu1 %516  ;;  %v3589_v7 = vpop.permute.xlu0 %514 }
  0xda   : > { %5676 = vst [vmem:[#allocation27_spill] sm:$0xff] %v3587_v62  ;;  %v3604_v62 = vsel %vm550_vm1, %v3176_v37, %v3426_v6  ;;  %v2919_v6 = vld [vmem:[%s5540_s2 + $0x18] sm:$0xff] }
  0xdb   : > { %5677 = vst [vmem:[#allocation28_spill] sm:$0xff] %v3589_v7  ;;  %2825 = vmatmul.msk.f32.gmra.mxu0 %vm822_vm2, %v3593_v13  ;;  %2173 = vmatpush.msrb.mxu3 %v2919_v6 }
  0xdc   : > { %2296 = vmatpush.msrb.mxu0 %v2919_v6 }
  0xe0   : > { %v3597_v25 = vpop.permute.xlu2 %607 }
  0xe1   : > { %5678 = vst [vmem:[#allocation29_spill] sm:$0xff] %v3597_v25  ;;  %v588_v56 = vpop.permute.xlu1 %587  ;;  %v586_v24 = vpop.permute.xlu0 %585  ;;  %v751_v25 = vrot.slane %v3506_v60, 1 }
  0xe2   : > { %v632_v30 = vsel %vm550_vm1, %v3125_v14, %v586_v24  ;;  %v752_v14 = vrot.slane %v3519_v55, 1 }
  0xe3   : > { %v749_v7 = vrot.slane %v632_v30, 1  ;;  %2826 = vmatmul.msk.f32.gmra.mxu0 %vm822_vm2, %v3604_v62  ;;  %v3621_v30 = vsel %vm550_vm1, %v3214_v52, %v479_v41 }
  0xe5   : > { %v3609_v39 = vsel %vm373_vm0, %v747_v15, %v749_v7  ;;  %v3629_v15 = vsel %vm373_vm0, %v751_v25, %v752_v14  ;;  %v633_v7 = vsel %vm550_vm1, %v3121_v12, %v588_v56  ;;  %v3644_v25 = vsel %vm550_vm1, %v3208_v50, %v3501_v10 }
  0xe6   : > { %2853 = vmatmul.msk.f32.gmra.mxu2 %vm822_vm2, %v3609_v39  ;;  %v754_v41 = vrot.slane %v633_v7, 1  ;;  %v756_v56 = vrot.slane %v3531_v11, 1  ;;  %v3663_v50 = vsel %vm550_vm1, %v3202_v48, %v3452_v32  ;;  %v3681_v48 = vsel %vm550_vm1, %v3205_v49, %v3514_v16 }
  0xe7   : > { %v3698_v16 = vsel %vm550_vm1, %v3236_v63, %v3512_v5 }
  0xe8   : > { %v3613_v54 = vpop.permute.xlu2 %613  ;;  %v3650_v12 = vsel %vm373_vm0, %v752_v14, %v754_v41  ;;  %v634_v14 = vsel %vm550_vm1, %v3157_v27, %v590_v23  ;;  %v762_v23 = vrot.slane %v3581_v31, 1 }
  0xe9   : > { %5679 = vst [vmem:[#allocation30_spill] sm:$0xff] %v3613_v54  ;;  %v3617_v24 = vpop.permute.xlu1 %593  ;;  %v592_v37 = vpop.permute.xlu0 %591 }
  0xeb   : > { %2827 = vmatmul.msk.f32.gmra.mxu0 %vm822_vm2, %v3621_v30 }
  0xee   : > { %2854 = vmatmul.msk.f32.gmra.mxu2 %vm822_vm2, %v3629_v15 }
  0xf0   : > { %v674_v52 = vpop.permute.xlu2 %673 }
  0xf1   : > { %v3635_v54 = vpop.permute.xlu1 %599  ;;  %v3637_v58 = vpop.permute.xlu0 %597  ;;  %v683_v1 = vsel %vm550_vm1, %v3437_v18, %v674_v52  ;;  %v757_v18 = vrot.slane %v3543_v44, 1  ;;  %v759_v52 = vrot.slane %v634_v14, 1 }
  0xf2   : > { %2917 = vmatmul.msk.f32.vlgmr.msra.gmra.mxu3 %vm822_vm2, %v683_v1 }
  0xf3   : > { %2828 = vmatmul.msk.f32.gmra.mxu0 %vm822_vm2, %v3644_v25  ;;  %v3668_v10 = vsel %vm373_vm0, %v756_v56, %v757_v18  ;;  %v3686_v32 = vsel %vm373_vm0, %v757_v18, %v759_v52  ;;  %v761_v52 = vrot.slane %v3561_v26, 1 }
  0xf5   : > { %v3712_v63 = vsel %vm373_vm0, %v761_v52, %v762_v23 }
  0xf6   : > { %2855 = vmatmul.msk.f32.gmra.mxu2 %vm822_vm2, %v3650_v12 }
  0xf9   : > { %v3656_v6 = vpop.permute.xlu1 %605  ;;  %v3658_v7 = vpop.permute.xlu0 %603 }
  0xfa   : > { %5680 = vst [vmem:[#allocation31_spill] sm:$0xff] %v3656_v6 }
  0xfb   : > { %2829 = vmatmul.msk.f32.gmra.mxu0 %vm822_vm2, %v3663_v50 }
  0xfe   : > { %2856 = vmatmul.msk.f32.gmra.mxu2 %vm822_vm2, %v3668_v10 }
 0x101   : > { %v3674_v41 = vpop.permute.xlu1 %611  ;;  %v3676_v6 = vpop.permute.xlu0 %609 }
 0x102   : > { %5681 = vst [vmem:[#allocation32_spill] sm:$0xff] %v3674_v41 }
 0x103   : > { %2830 = vmatmul.msk.f32.gmra.mxu0 %vm822_vm2, %v3681_v48 }
 0x106   : > { %2857 = vmatmul.msk.f32.gmra.mxu2 %vm822_vm2, %v3686_v32 }
 0x108   : > { %v3690_v27 = vpop.f32.mrf.mxu0 }
 0x109   : > { %5682 = vst [vmem:[#allocation33_spill] sm:$0xff] %v3690_v27  ;;  %v672_v56 = vpop.permute.xlu1 %671  ;;  %1061 = vrot.lane.b32.xlu0 %v3690_v27, %s3044_s10  ;;  %v670_v49 = vpop.permute.xlu0 %669 }
 0x10a   : > { %v681_v18 = vsel %vm550_vm1, %v3445_v33, %v670_v49  ;;  %v3704_v14 = vsel %vm550_vm1, %v3441_v57, %v672_v56  ;;  %v635_v57 = vsel %vm550_vm1, %v3185_v40, %v592_v37  ;;  %v2272_v40 = vrot.slane %v683_v1, 1 }
 0x10b   : > { %2831 = vmatmul.msk.f32.gmra.mxu0 %vm822_vm2, %v3698_v16  ;;  %2847 = vmatmul.msk.f32.vlgmr.msra.gmra.mxu1 %vm822_vm2, %v681_v18  ;;  %v1404_v27 = vrot.slane %v681_v18, 1  ;;  %v1405_v41 = vrot.slane %v3704_v14, 1  ;;  %v764_v56 = vrot.slane %v635_v57, 1  ;;  %v3730_v18 = vsel %vm550_vm1, %v3230_v61, %v3478_v8 }
 0x10c   : > { %v767_v8 = vrot.slane %v3604_v62, 1 }
 0x10d   : > { %v3717_v33 = vsel %vm373_vm0, %v1404_v27, %v1405_v41  ;;  %v3744_v52 = vsel %vm373_vm0, %v762_v23, %v764_v56  ;;  %v3762_v23 = vsel %vm550_vm1, %v3268_v29, %v3527_v20  ;;  %v636_v56 = vsel %vm550_vm1, %v3179_v38, %v3617_v24 }
 0x10e   : > { %2858 = vmatmul.msk.f32.gmra.mxu2 %vm822_vm2, %v3712_v63  ;;  %v769_v29 = vrot.slane %v636_v56, 1  ;;  %v5688_v56 = vld [vmem:[#allocation20_spill] sm:$0xff] }
 0x110   : > { %v3723_v5 = vpop.f32.mrf.mxu0  ;;  %v3794_v38 = vsel %vm373_vm0, %v767_v8, %v769_v29  ;;  %v5689_v29 = vld [vmem:[#allocation6_spill] sm:$0xff] }
 0x111   : > { %1063 = vrot.lane.b32.xlu1 %v3723_v5, %s3044_s10  ;;  %v676_v49 = vpop.permute.xlu0 %675 }
 0x112   : > { %v3734_v27 = vsel %vm550_vm1, %v3439_v34, %v676_v49  ;;  %v766_v34 = vrot.slane %v3593_v13, 1  ;;  %v5687_v49 = vld [vmem:[#allocation8_spill] sm:$0xff] }
 0x113   : > { %2832 = vmatmul.msk.f32.gmra.mxu0 %vm822_vm2, %v3730_v18  ;;  %2848 = vmatmul.msk.f32.gmra.mxu1 %vm822_vm2, %v3704_v14  ;;  %v2273_v37 = vrot.slane %v3734_v27, 1 }
 0x114   : > { %2918 = vmatmul.msk.f32.gmra.mxu3 %vm822_vm2, %v3734_v27  ;;  %v3771_v57 = vsel %vm373_vm0, %v766_v34, %v767_v8  ;;  %v786_v34 = vrot.slane %v3762_v23, 1 }
 0x115   : > { %v3749_v61 = vsel %vm373_vm0, %v2272_v40, %v2273_v37 }
 0x116   : > { %2859 = vmatmul.msk.f32.gmra.mxu2 %vm822_vm2, %v3744_v52 }
 0x118   : > { %v3778_v20 = vpop.f32.mrf.mxu0 }
 0x119   : > { %v3755_v1 = vpop.f32.mrf.mxu2 }
 0x11a   : > { %1468 = vrot.lane.b32.xlu2 %v3755_v1, %s3044_s10 }
 0x11b   : > { %2833 = vmatmul.msk.f32.gmra.mxu0 %vm822_vm2, %v3762_v23  ;;  %2885 = vmatmul.msk.f32.vlgmr.msrb.gmra.mxu1 %vm822_vm2, %v3433_v36  ;;  %v771_v36 = vrot.slane %v3621_v30, 1 }
 0x11c   : > { %2920 = vmatmul.msk.f32.vlgmr.msrb.gmra.mxu3 %vm822_vm2, %v3469_v59  ;;  %v3785_v59 = vsel %vm550_vm1, %v3262_v22, %v3525_v0  ;;  %v772_v22 = vrot.slane %v3644_v25, 1  ;;  %v3803_v0 = vsel %vm550_vm1, %v3256_v17, %v3491_v46  ;;  %v3822_v46 = vsel %vm550_vm1, %v3259_v21, %v3539_v19 }
 0x11d   : > { %v3839_v21 = vsel %vm550_vm1, %v3290_v47, %v3535_v9  ;;  %v776_v19 = vrot.slane %v3663_v50, 1  ;;  %v3859_v9 = vsel %vm550_vm1, %v3284_v45, %v3499_v2  ;;  %v782_v45 = vrot.slane %v3730_v18, 1  ;;  %v5683_v2 = vld [vmem:[#allocation23_spill] sm:$0xff] }
 0x11e   : > { %2860 = vmatmul.msk.f32.gmra.mxu2 %vm822_vm2, %v3771_v57  ;;  %v787_v8 = vrot.slane %v3785_v59, 1 }
 0x122   : > { %1065 = vrot.lane.b32.xlu2 %v3778_v20, %s3044_s10 }
 0x123   : > { %2834 = vmatmul.msk.f32.gmra.mxu0 %vm822_vm2, %v3785_v59  ;;  %2886 = vmatmul.msk.f32.gmra.mxu1 %vm822_vm2, %v3459_v42  ;;  %v3812_v42 = vsel %vm373_vm0, %v771_v36, %v772_v22  ;;  %v5690_v36 = vld [vmem:[#allocation26_spill] sm:$0xff] }
 0x124   : > { %2921 = vmatmul.msk.f32.gmra.mxu3 %vm822_vm2, %v3548_v28  ;;  %v637_v28 = vsel %vm550_vm1, %v3211_v51, %v3570_v35  ;;  %v5684_v35 = vld [vmem:[#allocation10_spill] sm:$0xff] }
 0x125   : > { %v774_v17 = vrot.slane %v637_v28, 1 }
 0x126   : > { %2861 = vmatmul.msk.f32.gmra.mxu2 %vm822_vm2, %v3794_v38 }
 0x127   : > { %v3831_v51 = vsel %vm373_vm0, %v772_v22, %v774_v17  ;;  %v5691_v22 = vld [vmem:[#allocation3_spill] sm:$0xff] }
 0x128   : > { %v640_v28 = vsel %vm550_vm1, %v5691_v22, %v5690_v36  ;;  %v797_v36 = vrot.slane %v3859_v9, 1  ;;  %v5699_v22 = vld [vmem:[#allocation28_spill] sm:$0xff] }
 0x129   : > { %v789_v17 = vrot.slane %v640_v28, 1 }
 0x12b   : > { %2835 = vmatmul.msk.f32.gmra.mxu0 %vm822_vm2, %v3803_v0  ;;  %2887 = vmatmul.msk.f32.gmra.mxu1 %vm822_vm2, %v3483_v43  ;;  %v777_v43 = vrot.slane %v3681_v48, 1 }
 0x12c   : > { %2922 = vmatmul.msk.f32.gmra.mxu3 %vm822_vm2, %v3566_v4  ;;  %v638_v4 = vsel %vm550_vm1, %v3239_v3, %v3637_v58  ;;  %v3877_v58 = vsel %vm550_vm1, %v5684_v35, %v5683_v2  ;;  %v5694_v2 = vld [vmem:[#allocation24_spill] sm:$0xff]  ;;  %v5695_v35 = vld [vmem:[#allocation13_spill] sm:$0xff] }
 0x12d   : > { %v779_v47 = vrot.slane %v638_v4, 1  ;;  %v5692_v4 = vld [vmem:[#allocation25_spill] sm:$0xff] }
 0x12e   : > { %2862 = vmatmul.msk.f32.gmra.mxu2 %vm822_vm2, %v3812_v42 }
 0x12f   : > { %v3868_v3 = vsel %vm373_vm0, %v777_v43, %v779_v47 }
 0x133   : > { %2836 = vmatmul.msk.f32.gmra.mxu0 %vm822_vm2, %v3822_v46  ;;  %2888 = vmatmul.msk.f32.gmra.mxu1 %vm822_vm2, %v3495_v53  ;;  %v3849_v53 = vsel %vm373_vm0, %v776_v19, %v777_v43 }
 0x134   : > { %2923 = vmatmul.msk.f32.gmra.mxu3 %vm822_vm2, %v3609_v39  ;;  %v5685_v39 = vld [vmem:[#allocation2_spill] sm:$0xff] }
 0x135   : > { %v639_v24 = vsel %vm550_vm1, %v5685_v39, %v3635_v54  ;;  %v3909_v54 = vpop.f32.mrf.mxu0  ;;  %v3960_v39 = vsel %vm550_vm1, %v5695_v35, %v5694_v2  ;;  %v5704_v35 = vld [vmem:[#allocation15_spill] sm:$0xff] }
 0x136   : > { %2863 = vmatmul.msk.f32.gmra.mxu2 %vm822_vm2, %v3831_v51 }
 0x13b   : > { %2837 = vmatmul.msk.f32.gmra.mxu0 %vm822_vm2, %v3839_v21  ;;  %2889 = vmatmul.msk.f32.gmra.mxu1 %vm822_vm2, %v3506_v60  ;;  %v781_v60 = vrot.slane %v3698_v16, 1 }
 0x13c   : > { %2924 = vmatmul.msk.f32.gmra.mxu3 %vm822_vm2, %v3629_v15  ;;  %v784_v15 = vrot.slane %v639_v24, 1 }
 0x13d   : > { %v3934_v43 = vpop.f32.mrf.mxu0 }
 0x13e   : > { %2864 = vmatmul.msk.f32.gmra.mxu2 %vm822_vm2, %v3849_v53 }
 0x143   : > { %2838 = vmatmul.msk.f32.gmra.mxu0 %vm822_vm2, %v3859_v9  ;;  %2890 = vmatmul.msk.f32.gmra.mxu1 %vm822_vm2, %v3519_v55  ;;  %v3886_v55 = vsel %vm373_vm0, %v781_v60, %v782_v45  ;;  %v792_v60 = vrot.slane %v3822_v46, 1 }
 0x144   : > { %2925 = vmatmul.msk.f32.gmra.mxu3 %vm822_vm2, %v3650_v12  ;;  %v5686_v12 = vld [vmem:[#allocation22_spill] sm:$0xff] }
 0x145   : > { %v3896_v40 = vsel %vm550_vm1, %v5687_v49, %v5686_v12 }
 0x146   : > { %2865 = vmatmul.msk.f32.gmra.mxu2 %vm822_vm2, %v3868_v3 }
 0x14b   : > { %2839 = vmatmul.msk.f32.gmra.mxu0 %vm822_vm2, %v3877_v58  ;;  %2891 = vmatmul.msk.f32.gmra.mxu1 %vm822_vm2, %v3531_v11  ;;  %v3905_v11 = vsel %vm373_vm0, %v782_v45, %v784_v15  ;;  %v5696_v15 = vld [vmem:[#allocation5_spill] sm:$0xff] }
 0x14c   : > { %2926 = vmatmul.msk.f32.gmra.mxu3 %vm822_vm2, %v3668_v10  ;;  %v3911_v10 = vpop.f32.mrf.mxu2  ;;  %v641_v12 = vsel %vm550_vm1, %v5696_v15, %v3658_v7  ;;  %v688_v15 = vpop.permute.xlu2 %687 }
 0x14d   : > { %v794_v49 = vrot.slane %v641_v12, 1 }
 0x14e   : > { %2866 = vmatmul.msk.f32.gmra.mxu2 %vm822_vm2, %v3886_v55 }
 0x14f   : > { %v3995_v7 = vsel %vm373_vm0, %v792_v60, %v794_v49  ;;  %v802_v49 = vrot.slane %v3896_v40, 1 }
 0x153   : > { %2840 = vmatmul.msk.f32.gmra.mxu0 %vm822_vm2, %v3896_v40  ;;  %2892 = vmatmul.msk.f32.gmra.mxu1 %vm822_vm2, %v3543_v44  ;;  %v3918_v44 = vsel %vm550_vm1, %v5689_v29, %v5688_v56  ;;  %v796_v29 = vrot.slane %v3839_v21, 1 }
 0x154   : > { %2927 = vmatmul.msk.f32.gmra.mxu3 %vm822_vm2, %v3686_v32  ;;  %v3927_v32 = vsel %vm373_vm0, %v786_v34, %v787_v8  ;;  %v3936_v19 = vpop.f32.mrf.mxu2  ;;  %v5697_v34 = vld [vmem:[#allocation21_spill] sm:$0xff] }
 0x156   : > { %2867 = vmatmul.msk.f32.gmra.mxu2 %vm822_vm2, %v3905_v11 }
 0x15b   : > { %2841 = vmatmul.msk.f32.gmra.mxu0 %vm822_vm2, %v3918_v44  ;;  %2893 = vmatmul.msk.f32.gmra.mxu1 %vm822_vm2, %v3561_v26  ;;  %v5693_v26 = vld [vmem:[#allocation7_spill] sm:$0xff] }
 0x15c   : > { %2928 = vmatmul.msk.f32.gmra.mxu3 %vm822_vm2, %v3712_v63  ;;  %v3941_v47 = vsel %vm550_vm1, %v5693_v26, %v5692_v4  ;;  %v3950_v63 = vsel %vm373_vm0, %v787_v8, %v789_v17  ;;  %v5698_v8 = vld [vmem:[#allocation11_spill] sm:$0xff]  ;;  %v5702_v4 = vld [vmem:[#allocation4_spill] sm:$0xff] }
 0x15d   : > { %v3984_v56 = vsel %vm550_vm1, %v5698_v8, %v5697_v34  ;;  %v5701_v17 = vld [vmem:[#allocation31_spill] sm:$0xff]  ;;  %v801_v34 = vrot.slane %v3877_v58, 1 }
 0x15e   : > { %2868 = vmatmul.msk.f32.gmra.mxu2 %vm822_vm2, %v3927_v32  ;;  %v642_v26 = vsel %vm550_vm1, %v5702_v4, %v5701_v17  ;;  %v5706_v8 = vld [vmem:[#allocation19_spill] sm:$0xff] }
 0x15f   : > { %v799_v2 = vrot.slane %v642_v26, 1 }
 0x163   : > { %2842 = vmatmul.msk.f32.gmra.mxu0 %vm822_vm2, %v3941_v47  ;;  %2894 = vmatmul.msk.f32.gmra.mxu1 %vm822_vm2, %v3581_v31  ;;  %v791_v31 = vrot.slane %v3803_v0, 1 }
 0x164   : > { %2929 = vmatmul.msk.f32.gmra.mxu3 %vm822_vm2, %v3744_v52  ;;  %v3965_v52 = vpop.f32.mrf.mxu0 }
 0x165   : > { %v3974_v24 = vsel %vm373_vm0, %v791_v31, %v792_v60  ;;  %v4037_v31 = vsel %vm373_vm0, %v797_v36, %v799_v2  ;;  %v5712_v2 = vld [vmem:[#allocation14_spill] sm:$0xff] }
 0x166   : > { %2869 = vmatmul.msk.f32.gmra.mxu2 %vm822_vm2, %v3950_v63 }
 0x169   : > { %v3955_v45 = vpop.f32.mrf.mxu2 }
 0x16a   : > { %1474 = vrot.lane.b32.xlu2 %v3955_v45, %s3044_s10 }
 0x16b   : > { %2843 = vmatmul.msk.f32.gmra.mxu0 %vm822_vm2, %v3960_v39  ;;  %2895 = vmatmul.msk.f32.gmra.mxu1 %vm822_vm2, %v3593_v13 }
 0x16c   : > { %2930 = vmatmul.msk.f32.gmra.mxu3 %vm822_vm2, %v3771_v57  ;;  %v3992_v13 = vpop.f32.mrf.mxu0 }
 0x16e   : > { %2870 = vmatmul.msk.f32.gmra.mxu2 %vm822_vm2, %v3974_v24 }
 0x173   : > { %2844 = vmatmul.msk.f32.gmra.mxu0 %vm822_vm2, %v3984_v56  ;;  %2896 = vmatmul.msk.f32.gmra.mxu1 %vm822_vm2, %v3604_v62  ;;  %v5700_v62 = vld [vmem:[#allocation17_spill] sm:$0xff] }
 0x174   : > { %2931 = vmatmul.msk.f32.gmra.mxu3 %vm822_vm2, %v3794_v38  ;;  %v4005_v28 = vsel %vm550_vm1, %v5700_v62, %v5699_v22  ;;  %v4014_v38 = vsel %vm373_vm0, %v796_v29, %v797_v36  ;;  %v4023_v60 = vpop.f32.mrf.mxu0  ;;  %v5707_v29 = vld [vmem:[#allocation29_spill] sm:$0xff] }
 0x175   : > { %v1958_v57 = vpop.f32.mrf.mxu3  ;;  %v5708_v36 = vld [vmem:[#allocation9_spill] sm:$0xff] }
 0x176   : > { %2871 = vmatmul.msk.f32.gmra.mxu2 %vm822_vm2, %v3995_v7  ;;  %2056 = vrot.lane.b32.xlu0 %v1958_v57, %s3044_s10  ;;  %v4058_v57 = vsel %vm373_vm0, %v801_v34, %v802_v49  ;;  %v643_v22 = vsel %vm550_vm1, %v5708_v36, %v5707_v29  ;;  %v5716_v29 = vld [vmem:[#allocation12_spill] sm:$0xff] }
 0x17b   : > { %2845 = vmatmul.msk.f32.gmra.mxu0 %vm822_vm2, %v4005_v28  ;;  %2897 = vmatmul.msk.f32.gmra.mxu1 %vm822_vm2, %v3621_v30  ;;  %v5703_v30 = vld [vmem:[#allocation27_spill] sm:$0xff] }
 0x17c   : > { %2932 = vmatmul.msk.f32.gmra.mxu3 %vm822_vm2, %v3812_v42  ;;  %v4028_v42 = vsel %vm550_vm1, %v5704_v35, %v5703_v30  ;;  %v644_v30 = vsel %vm550_vm1, %v5712_v2, %v3676_v6  ;;  %v5719_v2 = vld [vmem:[#allocation30_spill] sm:$0xff] }
 0x17e   : > { %2872 = vmatmul.msk.f32.gmra.mxu2 %vm822_vm2, %v4014_v38  ;;  %1470 = vrot.lane.b32.xlu0 %v3911_v10, %s3044_s10 }
 0x183   : > { %2846 = vmatmul.msk.f32.gmra.mxu0 %vm822_vm2, %v4028_v42  ;;  %2898 = vmatmul.msk.f32.gmra.mxu1 %vm822_vm2, %v3644_v25  ;;  %v4047_v25 = vpop.f32.mrf.mxu0 }
 0x184   : > { %2933 = vmatmul.msk.f32.gmra.mxu3 %vm822_vm2, %v3831_v51  ;;  %v692_v51 = vsel %vm550_vm1, %v5706_v8, %v688_v15  ;;  %v811_v8 = vrot.slane %v3960_v39, 1 }
 0x185   : > { %v2275_v62 = vrot.slane %v692_v51, 1  ;;  %v5715_v51 = vld [vmem:[#allocation32_spill] sm:$0xff] }
 0x186   : > { %2873 = vmatmul.msk.f32.gmra.mxu2 %vm822_vm2, %v4037_v31  ;;  %1067 = vrot.lane.b32.xlu0 %v3909_v54, %s3044_s10  ;;  %v645_v36 = vsel %vm550_vm1, %v5716_v29, %v5715_v51 }
 0x188   : > { %v4043_v12 = vpop.f32.mrf.mxu1 }
 0x189   : > { %5705 = vst [vmem:[#allocation23_spill] sm:$0xff] %v4043_v12 }
 0x18b   : > { %2899 = vmatmul.msk.f32.gmra.mxu1 %vm822_vm2, %v3663_v50  ;;  %2952 = vmatmul.msk.f32.vlgmr.msrb.gmra.mxu0 %vm822_vm2, %v3749_v61  ;;  %v804_v50 = vrot.slane %v643_v22, 1  ;;  %v2276_v61 = vsel %vm373_vm0, %v2273_v37, %v2275_v62  ;;  %v4070_v4 = vpop.f32.mrf.mxu0  ;;  %v807_v37 = vrot.slane %v3941_v47, 1 }
 0x18c   : > { %2934 = vmatmul.msk.f32.gmra.mxu3 %vm822_vm2, %v3849_v53  ;;  %5710 = vst [vmem:[#allocation2_spill] sm:$0xff] %v4070_v4 }
 0x18d   : > { %v4078_v53 = vsel %vm373_vm0, %v802_v49, %v804_v50 }
 0x18e   : > { %2874 = vmatmul.msk.f32.gmra.mxu2 %vm822_vm2, %v4058_v57 }
 0x190   : > { %v4065_v17 = vpop.f32.mrf.mxu1 }
 0x191   : > { %5709 = vst [vmem:[#allocation10_spill] sm:$0xff] %v4065_v17 }
 0x193   : > { %2900 = vmatmul.msk.f32.gmra.mxu1 %vm822_vm2, %v3681_v48  ;;  %2953 = vmatmul.msk.f32.gmra.mxu0 %vm822_vm2, %v2276_v61  ;;  %v806_v48 = vrot.slane %v3918_v44, 1 }
 0x194   : > { %2935 = vmatmul.msk.f32.gmra.mxu3 %vm822_vm2, %v3868_v3 }
 0x195   : > { %v4092_v3 = vsel %vm373_vm0, %v806_v48, %v807_v37 }
 0x196   : > { %2875 = vmatmul.msk.f32.gmra.mxu2 %vm822_vm2, %v4078_v53 }
 0x197   : > { %v1961_v26 = vpop.f32.mrf.mxu3 }
 0x198   : > { %2058 = vrot.lane.b32.xlu1 %v1961_v26, %s3044_s10  ;;  %v4083_v27 = vpop.f32.mrf.mxu1 }
 0x199   : > { %5711 = vst [vmem:[#allocation22_spill] sm:$0xff] %v4083_v27 }
 0x19b   : > { %2901 = vmatmul.msk.f32.gmra.mxu1 %vm822_vm2, %v3698_v16  ;;  %v809_v16 = vrot.slane %v644_v30, 1  ;;  %v5720_v30 = vld [vmem:[#allocation16_spill] sm:$0xff] }
 0x19c   : > { %2936 = vmatmul.msk.f32.gmra.mxu3 %vm822_vm2, %v3886_v55  ;;  %v4107_v55 = vpop.f32.mrf.mxu2 }
 0x19d   : > { %v4112_v6 = vsel %vm373_vm0, %v807_v37, %v809_v16  ;;  %v817_v37 = vrot.slane %v4028_v42, 1  ;;  %v646_v16 = vsel %vm550_vm1, %v5720_v30, %v5719_v2  ;;  %v4304_v2 = vpop.permute.xlu0 %1061 }
 0x19e   : > { %2876 = vmatmul.msk.f32.gmra.mxu2 %vm822_vm2, %v4092_v3  ;;  %5734 = vst [vmem:[#allocation27_spill] sm:$0xff] %v4304_v2 }
 0x19f   : > { %v4099_v35 = vpop.f32.mrf.mxu3 }
 0x1a0   : > { %1472 = vrot.lane.b32.xlu1 %v3936_v19, %s3044_s10  ;;  %v4103_v15 = vpop.f32.mrf.mxu1 }
 0x1a1   : > { %5713 = vst [vmem:[#allocation8_spill] sm:$0xff] %v4103_v15 }
 0x1a3   : > { %2902 = vmatmul.msk.f32.gmra.mxu1 %vm822_vm2, %v3730_v18  ;;  %v812_v18 = vrot.slane %v3984_v56, 1 }
 0x1a4   : > { %2937 = vmatmul.msk.f32.gmra.mxu3 %vm822_vm2, %v3905_v11  ;;  %v4136_v22 = vpop.f32.mrf.mxu2 }
 0x1a5   : > { %v4131_v11 = vsel %vm373_vm0, %v811_v8, %v812_v18 }
 0x1a6   : > { %2877 = vmatmul.msk.f32.gmra.mxu2 %vm822_vm2, %v4112_v6 }
 0x1a7   : > { %v4116_v49 = vpop.f32.mrf.mxu3 }
 0x1a8   : > { %1069 = vrot.lane.b32.xlu1 %v3934_v43, %s3044_s10  ;;  %v4120_v34 = vpop.f32.mrf.mxu1 }
 0x1a9   : > { %5714 = vst [vmem:[#allocation20_spill] sm:$0xff] %v4120_v34  ;;  %1996 = vrot.lane.b32.xlu0 %v4120_v34, %s3044_s10 }
 0x1ab   : > { %2903 = vmatmul.msk.f32.gmra.mxu1 %vm822_vm2, %v3762_v23 }
 0x1ac   : > { %2938 = vmatmul.msk.f32.gmra.mxu3 %vm822_vm2, %v3927_v32  ;;  %v814_v32 = vrot.slane %v645_v36, 1  ;;  %v4161_v26 = vpop.f32.mrf.mxu2  ;;  %v5723_v36 = vld [vmem:[#allocation18_spill] sm:$0xff] }
 0x1ae   : > { %2878 = vmatmul.msk.f32.gmra.mxu2 %vm822_vm2, %v4131_v11  ;;  %v4155_v50 = vsel %vm373_vm0, %v812_v18, %v814_v32 }
 0x1af   : > { %v4140_v62 = vpop.f32.mrf.mxu3 }
 0x1b0   : > { %2336 = vrot.lane.b32.xlu2 %v4140_v62, %s3044_s10  ;;  %v4144_v23 = vpop.f32.mrf.mxu1 }
 0x1b1   : > { %5717 = vst [vmem:[#allocation6_spill] sm:$0xff] %v4144_v23  ;;  %1476 = vrot.lane.b32.xlu0 %v4107_v55, %s3044_s10  ;;  %1998 = vrot.lane.b32.xlu1 %v4144_v23, %s3044_s10 }
 0x1b3   : > { %2904 = vmatmul.msk.f32.gmra.mxu1 %vm822_vm2, %v3785_v59  ;;  %v816_v59 = vrot.slane %v4005_v28, 1 }
 0x1b4   : > { %2939 = vmatmul.msk.f32.gmra.mxu3 %vm822_vm2, %v3950_v63 }
 0x1b5   : > { %v4178_v48 = vsel %vm373_vm0, %v816_v59, %v817_v37 }
 0x1b6   : > { %2879 = vmatmul.msk.f32.gmra.mxu2 %vm822_vm2, %v4155_v50 }
 0x1b7   : > { %v4159_v61 = vpop.f32.mrf.mxu3 }
 0x1b8   : > { %1071 = vrot.lane.b32.xlu2 %v3965_v52, %s3044_s10  ;;  %v4173_v63 = vpop.f32.mrf.mxu1 }
 0x1b9   : > { %1478 = vrot.lane.b32.xlu1 %v4136_v22, %s3044_s10  ;;  %2338 = vrot.lane.b32.xlu0 %v4159_v61, %s3044_s10  ;;  %5718 = vst [vmem:[#allocation26_spill] sm:$0xff] %v4173_v63 }
 0x1bb   : > { %2905 = vmatmul.msk.f32.gmra.mxu1 %vm822_vm2, %v3803_v0  ;;  %v819_v0 = vrot.slane %v646_v16, 1 }
 0x1bc   : > { %2940 = vmatmul.msk.f32.gmra.mxu3 %vm822_vm2, %v3974_v24  ;;  %v4193_v24 = vpop.f32.mrf.mxu2 }
 0x1bd   : > { %v4200_v8 = vsel %vm373_vm0, %v817_v37, %v819_v0 }
 0x1be   : > { %2880 = vmatmul.msk.f32.gmra.mxu2 %vm822_vm2, %v4178_v48 }
 0x1bf   : > { %v4185_v18 = vpop.f32.mrf.mxu3 }
 0x1c0   : > { %2000 = vrot.lane.b32.xlu2 %v4173_v63, %s3044_s10  ;;  %v4202_v51 = vpop.f32.mrf.mxu1 }
 0x1c1   : > { %1073 = vrot.lane.b32.xlu0 %v3992_v13, %s3044_s10  ;;  %2340 = vrot.lane.b32.xlu1 %v4185_v18, %s3044_s10  ;;  %5721 = vst [vmem:[#allocation3_spill] sm:$0xff] %v4202_v51 }
 0x1c3   : > { %2906 = vmatmul.msk.f32.gmra.mxu1 %vm822_vm2, %v3822_v46  ;;  %v686_v46 = vpop.permute.xlu1 %685 }
 0x1c4   : > { %2941 = vmatmul.msk.f32.gmra.mxu3 %vm822_vm2, %v3995_v7  ;;  %v4214_v7 = vpop.f32.mrf.mxu2  ;;  %v691_v32 = vsel %vm550_vm1, %v5723_v36, %v686_v46 }
 0x1c5   : > { %v1407_v59 = vrot.slane %v691_v32, 1 }
 0x1c6   : > { %2881 = vmatmul.msk.f32.gmra.mxu2 %vm822_vm2, %v4200_v8 }
 0x1c7   : > { %v4216_v29 = vpop.f32.mrf.mxu3 }
 0x1c8   : > { %1480 = vrot.lane.b32.xlu2 %v4161_v26, %s3044_s10  ;;  %5722 = vst [vmem:[#allocation25_spill] sm:$0xff] %v4216_v29  ;;  %v4224_v37 = vpop.f32.mrf.mxu1 }
 0x1c9   : > { %2002 = vrot.lane.b32.xlu0 %v4202_v51, %s3044_s10  ;;  %1075 = vrot.lane.b32.xlu1 %v4023_v60, %s3044_s10  ;;  %5724 = vst [vmem:[#allocation7_spill] sm:$0xff] %v4224_v37 }
 0x1cb   : > { %2907 = vmatmul.msk.f32.gmra.mxu1 %vm822_vm2, %v3839_v21 }
 0x1cc   : > { %2942 = vmatmul.msk.f32.gmra.mxu3 %vm822_vm2, %v4014_v38  ;;  %v4239_v21 = vpop.f32.mrf.mxu2 }
 0x1ce   : > { %2882 = vmatmul.msk.f32.vlgmr.msrb.gmra.mxu2 %vm822_vm2, %v3717_v33  ;;  %v1408_v33 = vsel %vm373_vm0, %v1405_v41, %v1407_v59 }
 0x1cf   : > { %v4241_v38 = vpop.f32.mrf.mxu3 }
 0x1d0   : > { %2342 = vrot.lane.b32.xlu2 %v4216_v29, %s3044_s10  ;;  %5725 = vst [vmem:[#allocation24_spill] sm:$0xff] %v4241_v38  ;;  %v4252_v14 = vpop.f32.mrf.mxu1 }
 0x1d1   : > { %1482 = vrot.lane.b32.xlu0 %v4193_v24, %s3044_s10  ;;  %2004 = vrot.lane.b32.xlu1 %v4224_v37, %s3044_s10  ;;  %5726 = vst [vmem:[#allocation13_spill] sm:$0xff] %v4252_v14 }
 0x1d3   : > { %2908 = vmatmul.msk.f32.gmra.mxu1 %vm822_vm2, %v3859_v9 }
 0x1d4   : > { %2943 = vmatmul.msk.f32.gmra.mxu3 %vm822_vm2, %v4037_v31  ;;  %v4284_v31 = vpop.f32.mrf.mxu2 }
 0x1d6   : > { %2883 = vmatmul.msk.f32.gmra.mxu2 %vm822_vm2, %v1408_v33 }
 0x1d7   : > { %v4256_v41 = vpop.f32.mrf.mxu3 }
 0x1d8   : > { %1077 = vrot.lane.b32.xlu2 %v4047_v25, %s3044_s10  ;;  %5727 = vst [vmem:[#allocation5_spill] sm:$0xff] %v4256_v41  ;;  %v4268_v9 = vpop.f32.mrf.mxu1 }
 0x1d9   : > { %1484 = vrot.lane.b32.xlu1 %v4214_v7, %s3044_s10  ;;  %2344 = vrot.lane.b32.xlu0 %v4241_v38, %s3044_s10  ;;  %5728 = vst [vmem:[#allocation21_spill] sm:$0xff] %v4268_v9 }
 0x1db   : > { %2909 = vmatmul.msk.f32.gmra.mxu1 %vm822_vm2, %v3877_v58  ;;  %v4270_v58 = vpop.f32.mrf.mxu0 }
 0x1dc   : > { %2944 = vmatmul.msk.f32.gmra.mxu3 %vm822_vm2, %v4058_v57  ;;  %5729 = vst [vmem:[#allocation11_spill] sm:$0xff] %v4270_v58  ;;  %v4286_v57 = vpop.permute.xlu2 %1468  ;;  %v4306_v30 = vpop.f32.mrf.mxu2 }
 0x1e0   : > { %2006 = vrot.lane.b32.xlu2 %v4252_v14, %s3044_s10 }
 0x1e1   : > { %1079 = vrot.lane.b32.xlu0 %v4070_v4, %s3044_s10  ;;  %2346 = vrot.lane.b32.xlu1 %v4256_v41, %s3044_s10 }
 0x1e3   : > { %2910 = vmatmul.msk.f32.gmra.mxu1 %vm822_vm2, %v3896_v40  ;;  %v4280_v40 = vpop.f32.mrf.mxu3 }
 0x1e4   : > { %2945 = vmatmul.msk.f32.gmra.mxu3 %vm822_vm2, %v4078_v53  ;;  %5730 = vst [vmem:[#allocation28_spill] sm:$0xff] %v4280_v40  ;;  %v4288_v53 = vpop.f32.mrf.mxu1 }
 0x1e5   : > { %5731 = vst [vmem:[#allocation17_spill] sm:$0xff] %v4288_v53 }
 0x1e8   : > { %1486 = vrot.lane.b32.xlu2 %v4239_v21, %s3044_s10  ;;  %v4324_v0 = vpop.permute.xlu0 %2056 }
 0x1e9   : > { %2008 = vrot.lane.b32.xlu0 %v4268_v9, %s3044_s10  ;;  %1081 = vrot.lane.b32.xlu1 %v4270_v58, %s3044_s10  ;;  %5737 = vst [vmem:[#allocation29_spill] sm:$0xff] %v4324_v0 }
 0x1eb   : > { %2911 = vmatmul.msk.f32.gmra.mxu1 %vm822_vm2, %v3918_v44  ;;  %v4298_v44 = vpop.f32.mrf.mxu0 }
 0x1ec   : > { %2946 = vmatmul.msk.f32.gmra.mxu3 %vm822_vm2, %v4092_v3  ;;  %5732 = vst [vmem:[#allocation31_spill] sm:$0xff] %v4298_v44  ;;  %v4302_v3 = vpop.f32.mrf.mxu3 }
 0x1ed   : > { %5733 = vst [vmem:[#allocation4_spill] sm:$0xff] %v4302_v3 }
 0x1f0   : > { %2348 = vrot.lane.b32.xlu2 %v4280_v40, %s3044_s10  ;;  %v4350_v33 = vpop.permute.xlu0 %1470 }
 0x1f1   : > { %1488 = vrot.lane.b32.xlu0 %v4284_v31, %s3044_s10  ;;  %2010 = vrot.lane.b32.xlu1 %v4288_v53, %s3044_s10 }
 0x1f3   : > { %2912 = vmatmul.msk.f32.gmra.mxu1 %vm822_vm2, %v3941_v47  ;;  %v4314_v47 = vpop.permute.xlu2 %1065  ;;  %v4322_v16 = vpop.f32.mrf.mxu0 }
 0x1f4   : > { %2947 = vmatmul.msk.f32.gmra.mxu3 %vm822_vm2, %v4112_v6  ;;  %v4318_v6 = vpop.f32.mrf.mxu1  ;;  %5736 = vst [vmem:[#allocation19_spill] sm:$0xff] %v4322_v16  ;;  %v4326_v46 = vpop.f32.mrf.mxu3 }
 0x1f5   : > { %5735 = vst [vmem:[#allocation15_spill] sm:$0xff] %v4318_v6 }
 0x1f6   : > { %5738 = vst [vmem:[#allocation9_spill] sm:$0xff] %v4326_v46 }
 0x1f8   : > { %1083 = vrot.lane.b32.xlu2 %v4298_v44, %s3044_s10 }
 0x1f9   : > { %1490 = vrot.lane.b32.xlu1 %v4306_v30, %s3044_s10  ;;  %2350 = vrot.lane.b32.xlu0 %v4302_v3, %s3044_s10 }
 0x1fb   : > { %2913 = vmatmul.msk.f32.gmra.mxu1 %vm822_vm2, %v3960_v39  ;;  %v4334_v39 = vpop.permute.xlu1 %1063  ;;  %v4336_v36 = vpop.permute.xlu2 %1474 }
 0x1fc   : > { %2948 = vmatmul.msk.f32.gmra.mxu3 %vm822_vm2, %v4131_v11  ;;  %5739 = vst [vmem:[#allocation14_spill] sm:$0xff] %v4334_v39  ;;  %v4340_v11 = vpop.f32.mrf.mxu2  ;;  %v4344_v32 = vpop.f32.mrf.mxu1 }
 0x1fd   : > { %5740 = vst [vmem:[#allocation32_spill] sm:$0xff] %v4344_v32  ;;  %v4346_v59 = vpop.f32.mrf.mxu0 }
 0x1fe   : > { %5741 = vst [vmem:[#allocation12_spill] sm:$0xff] %v4346_v59 }
 0x200   : > { %2012 = vrot.lane.b32.xlu2 %v4318_v6, %s3044_s10 }
 0x201   : > { %1085 = vrot.lane.b32.xlu0 %v4322_v16, %s3044_s10  ;;  %2352 = vrot.lane.b32.xlu1 %v4326_v46, %s3044_s10  ;;  %v4496_v46 = vld [vmem:[%s5541_s3] ss:$0 sm:$0xff] }
 0x203   : > { %2914 = vmatmul.msk.f32.gmra.mxu1 %vm822_vm2, %v3984_v56 }
 0x204   : > { %2949 = vmatmul.msk.f32.gmra.mxu3 %vm822_vm2, %v4155_v50  ;;  %v4362_v50 = vpop.f32.mrf.mxu3  ;;  %v4366_v53 = vpop.f32.mrf.mxu2 }
 0x205   : > { %5743 = vst [vmem:[#allocation16_spill] sm:$0xff] %v4362_v50  ;;  %v4368_v9 = vpop.f32.mrf.mxu1 }
 0x206   : > { %5744 = vst [vmem:[#allocation18_spill] sm:$0xff] %v4368_v9 }
 0x208   : > { %1492 = vrot.lane.b32.xlu2 %v4340_v11, %s3044_s10 }
 0x209   : > { %2014 = vrot.lane.b32.xlu0 %v4344_v32, %s3044_s10  ;;  %1087 = vrot.lane.b32.xlu1 %v4346_v59, %s3044_s10  ;;  %v4378_v32 = vpop.permute.xlu0 %1067 }
 0x20a   : > { %v4356_v56 = vpop.permute.xlu1 %2058  ;;  %v4358_v0 = vpop.permute.xlu2 %2336 }
 0x20b   : > { %5742 = vst [vmem:[#allocation30_spill] sm:$0xff] %v4356_v56  ;;  %2915 = vmatmul.msk.f32.gmra.mxu1 %vm822_vm2, %v4005_v28 }
 0x20c   : > { %2950 = vmatmul.msk.f32.gmra.mxu3 %vm822_vm2, %v4178_v48  ;;  %v4382_v48 = vpop.f32.mrf.mxu0  ;;  %v4386_v37 = vpop.f32.mrf.mxu3 }
 0x20d   : > { %5745 = vst [vmem:[#allocation34_spill] sm:$0xff] %v4382_v48  ;;  %v4388_v51 = vpop.f32.mrf.mxu2 }
 0x20e   : > { %5746 = vst [vmem:[#allocation35_spill] sm:$0xff] %v4386_v37 }
 0x210   : > { %2354 = vrot.lane.b32.xlu2 %v4362_v50, %s3044_s10 }
 0x211   : > { %1494 = vrot.lane.b32.xlu0 %v4366_v53, %s3044_s10  ;;  %2016 = vrot.lane.b32.xlu1 %v4368_v9, %s3044_s10 }
 0x212   : > { %v1473_v56 = vpop.permute.xlu1 %1472  ;;  %v4376_v28 = vpop.permute.xlu2 %1071 }
 0x213   : > { %2916 = vmatmul.msk.f32.gmra.mxu1 %vm822_vm2, %v4028_v42 }
 0x214   : > { %2951 = vmatmul.msk.f32.gmra.mxu3 %vm822_vm2, %v4200_v8  ;;  %v4402_v8 = vpop.f32.mrf.mxu1  ;;  %v4404_v6 = vpop.f32.mrf.mxu0 }
 0x215   : > { %5749 = vst [vmem:[#allocation38_spill] sm:$0xff] %v4402_v8  ;;  %v4406_v34 = vpop.f32.mrf.mxu3  ;;  %v4420_v27 = vpop.f32.mrf.mxu2 }
 0x216   : > { %5750 = vst [vmem:[#allocation39_spill] sm:$0xff] %v4404_v6 }
 0x217   : > { %5751 = vst [vmem:[#allocation40_spill] sm:$0xff] %v4406_v34 }
 0x218   : > { %1089 = vrot.lane.b32.xlu2 %v4382_v48, %s3044_s10 }
 0x219   : > { %1496 = vrot.lane.b32.xlu1 %v4388_v51, %s3044_s10  ;;  %2356 = vrot.lane.b32.xlu0 %v4386_v37, %s3044_s10 }
 0x21a   : > { %v4396_v9 = vpop.permute.xlu2 %2000  ;;  %v4398_v42 = vpop.permute.xlu1 %1069 }
 0x21b   : > { %5747 = vst [vmem:[#allocation36_spill] sm:$0xff] %v4396_v9  ;;  %v4400_v23 = vpop.permute.xlu0 %1996 }
 0x21c   : > { %5748 = vst [vmem:[#allocation37_spill] sm:$0xff] %v4400_v23  ;;  %v4422_v63 = vpop.f32.mrf.mxu1  ;;  %v4424_v15 = vpop.f32.mrf.mxu0 }
 0x21d   : > { %5753 = vst [vmem:[#allocation42_spill] sm:$0xff] %v4422_v63  ;;  %v4438_v12 = vpop.f32.mrf.mxu3 }
 0x21e   : > { %5754 = vst [vmem:[#allocation43_spill] sm:$0xff] %v4424_v15 }
 0x21f   : > { %5755 = vst [vmem:[#allocation44_spill] sm:$0xff] %v4438_v12 }
 0x220   : > { %2018 = vrot.lane.b32.xlu2 %v4402_v8, %s3044_s10 }
 0x221   : > { %1091 = vrot.lane.b32.xlu0 %v4404_v6, %s3044_s10  ;;  %2358 = vrot.lane.b32.xlu1 %v4406_v34, %s3044_s10  ;;  %v4440_v6 = vpop.f32.mrf.mxu2 }
 0x222   : > { %v4414_v9 = vpop.permute.xlu2 %1480 }
 0x223   : > { %v4416_v14 = vpop.permute.xlu1 %1998  ;;  %v4418_v23 = vpop.permute.xlu0 %1476 }
 0x224   : > { %5752 = vst [vmem:[#allocation41_spill] sm:$0xff] %v4416_v14  ;;  %v4442_v39 = vpop.f32.mrf.mxu1  ;;  %v4456_v59 = vpop.f32.mrf.mxu0 }
 0x225   : > { %5756 = vst [vmem:[#allocation45_spill] sm:$0xff] %v4442_v39  ;;  %v4458_v16 = vpop.f32.mrf.mxu3 }
 0x226   : > { %5757 = vst [vmem:[#allocation46_spill] sm:$0xff] %v4456_v59 }
 0x227   : > { %5758 = vst [vmem:[#allocation47_spill] sm:$0xff] %v4458_v16 }
 0x228   : > { %1498 = vrot.lane.b32.xlu2 %v4420_v27, %s3044_s10 }
 0x229   : > { %2020 = vrot.lane.b32.xlu0 %v4422_v63, %s3044_s10  ;;  %1093 = vrot.lane.b32.xlu1 %v4424_v15, %s3044_s10  ;;  %v4460_v34 = vpop.f32.mrf.mxu2 }
 0x22a   : > { %v4432_v8 = vpop.permute.xlu2 %2342 }
 0x22b   : > { %v4434_v14 = vpop.permute.xlu1 %1478  ;;  %v4436_v2 = vpop.permute.xlu0 %2338 }
 0x22c   : > { %v4474_v50 = vpop.f32.mrf.mxu0  ;;  %v4476_v37 = vpop.f32.mrf.mxu1 }
 0x22d   : > { %5761 = vst [vmem:[#allocation50_spill] sm:$0xff] %v4474_v50  ;;  %v4478_v3 = vpop.f32.mrf.mxu3 }
 0x22e   : > { %5762 = vst [vmem:[#allocation51_spill] sm:$0xff] %v4476_v37 }
 0x22f   : > { %5763 = vst [vmem:[#allocation52_spill] sm:$0xff] %v4478_v3 }
 0x230   : > { %2360 = vrot.lane.b32.xlu2 %v4438_v12, %s3044_s10 }
 0x231   : > { %1500 = vrot.lane.b32.xlu0 %v4440_v6, %s3044_s10  ;;  %2022 = vrot.lane.b32.xlu1 %v4442_v39, %s3044_s10 }
 0x232   : > { %v4450_v63 = vpop.permute.xlu2 %1077 }
 0x233   : > { %v4452_v15 = vpop.permute.xlu1 %2340  ;;  %v4454_v17 = vpop.permute.xlu0 %1073 }
 0x234   : > { %v4501_v58 = vpop.f32.mrf.mxu0 }
 0x235   : > { %5765 = vst [vmem:[#allocation54_spill] sm:$0xff] %v4501_v58  ;;  %v4519_v41 = vpop.f32.mrf.mxu3 }
 0x236   : > { %5768 = vst [vmem:[#allocation57_spill] sm:$0xff] %v4519_v41 }
 0x238   : > { %1095 = vrot.lane.b32.xlu2 %v4456_v59, %s3044_s10  ;;  %v1566_v59 = vadd.f32 %v1473_v56, %v3755_v1  ;;  %v1567_v56 = vadd.f32 %v4336_v36, %v3911_v10 }
 0x239   : > { %1502 = vrot.lane.b32.xlu1 %v4460_v34, %s3044_s10  ;;  %2362 = vrot.lane.b32.xlu0 %v4458_v16, %s3044_s10 }
 0x23a   : > { %v4468_v39 = vpop.permute.xlu2 %2006  ;;  %v1599_v40 = vadd.f32 %v4496_v46, %v1567_v56 }
 0x23b   : > { %5759 = vst [vmem:[#allocation48_spill] sm:$0xff] %v4468_v39  ;;  %v4470_v12 = vpop.permute.xlu1 %1075  ;;  %v4472_v48 = vpop.permute.xlu0 %2002 }
 0x23c   : > { %5760 = vst [vmem:[#allocation49_spill] sm:$0xff] %v4472_v48  ;;  %v4534_v4 = vpop.f32.mrf.mxu0 }
 0x23d   : > { %5771 = vst [vmem:[#allocation60_spill] sm:$0xff] %v4534_v4 }
 0x240   : > { %2024 = vrot.lane.b32.xlu2 %v4476_v37, %s3044_s10  ;;  %v4498_v37 = vpop.f32.mrf.mxu2 }
 0x241   : > { %1097 = vrot.lane.b32.xlu0 %v4474_v50, %s3044_s10  ;;  %2364 = vrot.lane.b32.xlu1 %v4478_v3, %s3044_s10  ;;  %v1598_v50 = vadd.f32 %v4496_v46, %v1566_v59  ;;  %v4516_v59 = vpop.f32.mrf.mxu1 }
 0x242   : > { %v4486_v39 = vpop.permute.xlu2 %1486  ;;  %5767 = vst [vmem:[#allocation56_spill] sm:$0xff] %v4516_v59 }
 0x243   : > { %v4489_v48 = vpop.permute.xlu1 %2004  ;;  %v4491_v16 = vpop.permute.xlu0 %1482 }
 0x244   : > { %5764 = vst [vmem:[#allocation53_spill] sm:$0xff] %v4489_v48 }
 0x248   : > { %1504 = vrot.lane.b32.xlu2 %v4498_v37, %s3044_s10 }
 0x249   : > { %1664 = vrot.lane.b32.xlu0 %v1598_v50, %s3043_s23  ;;  %1099 = vrot.lane.b32.xlu1 %v4501_v58, %s3044_s10  ;;  %v4532_v58 = vpop.f32.mrf.mxu2  ;;  %v4536_v56 = vpop.f32.mrf.mxu1 }
 0x24a   : > { %v4508_v1 = vpop.permute.xlu2 %2348  ;;  %5772 = vst [vmem:[#allocation61_spill] sm:$0xff] %v4536_v56 }
 0x24b   : > { %5766 = vst [vmem:[#allocation55_spill] sm:$0xff] %v4508_v1  ;;  %v4512_v48 = vpop.permute.xlu1 %1484  ;;  %v4514_v3 = vpop.permute.xlu0 %2344 }
 0x250   : > { %2366 = vrot.lane.b32.xlu2 %v4519_v41, %s3044_s10 }
 0x251   : > { %2026 = vrot.lane.b32.xlu0 %v4516_v59, %s3044_s10  ;;  %1666 = vrot.lane.b32.xlu1 %v1599_v40, %s3043_s23  ;;  %v1568_v40 = vadd.f32 %v4418_v23, %v3936_v19 }
 0x252   : > { %v4526_v50 = vpop.permute.xlu2 %1083 }
 0x253   : > { %5769 = vst [vmem:[#allocation58_spill] sm:$0xff] %v4526_v50  ;;  %v4528_v10 = vpop.permute.xlu1 %2346  ;;  %v4530_v36 = vpop.permute.xlu0 %1079  ;;  %v1600_v44 = vadd.f32 %v4496_v46, %v1568_v40 }
 0x254   : > { %5770 = vst [vmem:[#allocation59_spill] sm:$0xff] %v4528_v10  ;;  %v4553_v10 = vpop.f32.mrf.mxu3  ;;  %v4570_v40 = vpop.f32.mrf.mxu1 }
 0x255   : > { %5775 = vst [vmem:[#allocation64_spill] sm:$0xff] %v4553_v10 }
 0x256   : > { %5778 = vst [vmem:[#allocation67_spill] sm:$0xff] %v4570_v40 }
 0x258   : > { %1101 = vrot.lane.b32.xlu2 %v4534_v4, %s3044_s10  ;;  %v4555_v4 = vpop.f32.mrf.mxu2 }
 0x259   : > { %1506 = vrot.lane.b32.xlu0 %v4532_v58, %s3044_s10  ;;  %2028 = vrot.lane.b32.xlu1 %v4536_v56, %s3044_s10 }
 0x25a   : > { %v4546_v59 = vpop.permute.xlu2 %2012 }
 0x25b   : > { %5773 = vst [vmem:[#allocation62_spill] sm:$0xff] %v4546_v59  ;;  %v4548_v41 = vpop.permute.xlu1 %1081  ;;  %v4550_v50 = vpop.permute.xlu0 %2008 }
 0x25c   : > { %5774 = vst [vmem:[#allocation63_spill] sm:$0xff] %v4550_v50  ;;  %v4568_v59 = vpop.f32.mrf.mxu0  ;;  %v4572_v50 = vpop.f32.mrf.mxu3 }
 0x25d   : > { %5777 = vst [vmem:[#allocation66_spill] sm:$0xff] %v4568_v59 }
 0x25e   : > { %5779 = vst [vmem:[#allocation68_spill] sm:$0xff] %v4572_v50 }
 0x260   : > { %1668 = vrot.lane.b32.xlu2 %v1600_v44, %s3043_s23  ;;  %v4588_v1 = vpop.f32.mrf.mxu2 }
 0x261   : > { %1508 = vrot.lane.b32.xlu1 %v4555_v4, %s3044_s10  ;;  %2368 = vrot.lane.b32.xlu0 %v4553_v10, %s3044_s10 }
 0x262   : > { %v4562_v19 = vpop.permute.xlu2 %1492 }
 0x263   : > { %v4564_v23 = vpop.permute.xlu1 %2010  ;;  %v4566_v56 = vpop.permute.xlu0 %1488 }
 0x264   : > { %5776 = vst [vmem:[#allocation65_spill] sm:$0xff] %v4564_v23  ;;  %v1569_v23 = vadd.f32 %v4434_v14, %v3955_v45  ;;  %v1570_v45 = vadd.f32 %v4414_v9, %v4107_v55 }
 0x266   : > { %v1601_v38 = vadd.f32 %v4496_v46, %v1569_v23  ;;  %v4606_v23 = vpop.f32.mrf.mxu1 }
 0x267   : > { %5786 = vst [vmem:[#allocation75_spill] sm:$0xff] %v4606_v23 }
 0x268   : > { %2030 = vrot.lane.b32.xlu2 %v4570_v40, %s3044_s10  ;;  %v4591_v40 = vpop.f32.mrf.mxu0 }
 0x269   : > { %1103 = vrot.lane.b32.xlu0 %v4568_v59, %s3044_s10  ;;  %2370 = vrot.lane.b32.xlu1 %v4572_v50, %s3044_s10  ;;  %5782 = vst [vmem:[#allocation71_spill] sm:$0xff] %v4591_v40 }
 0x26a   : > { %v4580_v44 = vpop.permute.xlu2 %2354 }
 0x26b   : > { %5780 = vst [vmem:[#allocation69_spill] sm:$0xff] %v4580_v44  ;;  %v4584_v10 = vpop.permute.xlu1 %1490  ;;  %v4586_v29 = vpop.permute.xlu0 %2350  ;;  %v1602_v44 = vadd.f32 %v4496_v46, %v1570_v45 }
 0x26c   : > { %5781 = vst [vmem:[#allocation70_spill] sm:$0xff] %v4586_v29  ;;  %v4609_v29 = vpop.f32.mrf.mxu3 }
 0x26d   : > { %5787 = vst [vmem:[#allocation76_spill] sm:$0xff] %v4609_v29 }
 0x26e   : > { %v4626_v45 = vpop.f32.mrf.mxu1 }
 0x26f   : > { %5792 = vst [vmem:[#allocation81_spill] sm:$0xff] %v4626_v45 }
 0x270   : > { %1510 = vrot.lane.b32.xlu2 %v4588_v1, %s3044_s10 }
 0x271   : > { %1670 = vrot.lane.b32.xlu0 %v1601_v38, %s3043_s23  ;;  %1105 = vrot.lane.b32.xlu1 %v4591_v40, %s3044_s10  ;;  %v4622_v40 = vpop.f32.mrf.mxu2 }
 0x272   : > { %v4598_v59 = vpop.permute.xlu2 %1089  ;;  %5790 = vst [vmem:[#allocation79_spill] sm:$0xff] %v4622_v40 }
 0x273   : > { %5783 = vst [vmem:[#allocation72_spill] sm:$0xff] %v4598_v59  ;;  %v4602_v14 = vpop.permute.xlu1 %2352  ;;  %v4604_v50 = vpop.permute.xlu0 %1085 }
 0x274   : > { %5784 = vst [vmem:[#allocation73_spill] sm:$0xff] %v4602_v14  ;;  %v4624_v59 = vpop.f32.mrf.mxu0 }
 0x275   : > { %5785 = vst [vmem:[#allocation74_spill] sm:$0xff] %v4604_v50  ;;  %v4643_v50 = vpop.f32.mrf.mxu3 }
 0x276   : > { %5791 = vst [vmem:[#allocation80_spill] sm:$0xff] %v4624_v59 }
 0x277   : > { %5794 = vst [vmem:[#allocation83_spill] sm:$0xff] %v4643_v50 }
 0x278   : > { %2372 = vrot.lane.b32.xlu2 %v4609_v29, %s3044_s10 }
 0x279   : > { %2032 = vrot.lane.b32.xlu0 %v4606_v23, %s3044_s10  ;;  %1672 = vrot.lane.b32.xlu1 %v1602_v44, %s3043_s23  ;;  %v1571_v44 = vadd.f32 %v4491_v16, %v4136_v22 }
 0x27a   : > { %v4616_v38 = vpop.permute.xlu2 %2018 }
 0x27b   : > { %5788 = vst [vmem:[#allocation77_spill] sm:$0xff] %v4616_v38  ;;  %v4618_v55 = vpop.permute.xlu1 %1087  ;;  %v4620_v9 = vpop.permute.xlu0 %2014  ;;  %v1603_v29 = vadd.f32 %v4496_v46, %v1571_v44 }
 0x27c   : > { %5789 = vst [vmem:[#allocation78_spill] sm:$0xff] %v4620_v9  ;;  %v4660_v44 = vpop.f32.mrf.mxu1 }
 0x27d   : > { %5799 = vst [vmem:[#allocation88_spill] sm:$0xff] %v4660_v44 }
 0x280   : > { %1107 = vrot.lane.b32.xlu2 %v4624_v59, %s3044_s10  ;;  %v4645_v59 = vpop.f32.mrf.mxu2 }
 0x281   : > { %1512 = vrot.lane.b32.xlu0 %v4622_v40, %s3044_s10  ;;  %2034 = vrot.lane.b32.xlu1 %v4626_v45, %s3044_s10  ;;  %5795 = vst [vmem:[#allocation84_spill] sm:$0xff] %v4645_v59  ;;  %v4662_v40 = vpop.f32.mrf.mxu3 }
 0x282   : > { %v4636_v23 = vpop.permute.xlu2 %1498  ;;  %5800 = vst [vmem:[#allocation89_spill] sm:$0xff] %v4662_v40 }
 0x283   : > { %v4638_v38 = vpop.permute.xlu1 %2016  ;;  %v4640_v9 = vpop.permute.xlu0 %1494 }
 0x284   : > { %5793 = vst [vmem:[#allocation82_spill] sm:$0xff] %v4638_v38  ;;  %v4658_v38 = vpop.f32.mrf.mxu0 }
 0x285   : > { %5798 = vst [vmem:[#allocation87_spill] sm:$0xff] %v4658_v38 }
 0x288   : > { %1674 = vrot.lane.b32.xlu2 %v1603_v29, %s3043_s23 }
 0x289   : > { %1514 = vrot.lane.b32.xlu1 %v4645_v59, %s3044_s10  ;;  %2374 = vrot.lane.b32.xlu0 %v4643_v50, %s3044_s10  ;;  %v1572_v50 = vadd.f32 %v4512_v48, %v4161_v26  ;;  %v1573_v26 = vadd.f32 %v4486_v39, %v4193_v24 }
 0x28a   : > { %v4652_v22 = vpop.permute.xlu2 %2360 }
 0x28b   : > { %5796 = vst [vmem:[#allocation85_spill] sm:$0xff] %v4652_v22  ;;  %v4654_v16 = vpop.permute.xlu1 %1496  ;;  %v4656_v45 = vpop.permute.xlu0 %2356  ;;  %v1604_v14 = vadd.f32 %v4496_v46, %v1572_v50 }
 0x28c   : > { %5797 = vst [vmem:[#allocation86_spill] sm:$0xff] %v4656_v45  ;;  %v4678_v45 = vpop.f32.mrf.mxu2  ;;  %v4696_v50 = vpop.f32.mrf.mxu1 }
 0x28d   : > { %5807 = vst [vmem:[#allocation96_spill] sm:$0xff] %v4696_v50 }
 0x290   : > { %2036 = vrot.lane.b32.xlu2 %v4660_v44, %s3044_s10  ;;  %v4681_v44 = vpop.f32.mrf.mxu0 }
 0x291   : > { %1109 = vrot.lane.b32.xlu0 %v4658_v38, %s3044_s10  ;;  %2376 = vrot.lane.b32.xlu1 %v4662_v40, %s3044_s10  ;;  %5803 = vst [vmem:[#allocation92_spill] sm:$0xff] %v4681_v44 }
 0x292   : > { %v4670_v29 = vpop.permute.xlu2 %1095 }
 0x293   : > { %5801 = vst [vmem:[#allocation90_spill] sm:$0xff] %v4670_v29  ;;  %v4674_v22 = vpop.permute.xlu1 %2358  ;;  %v4676_v59 = vpop.permute.xlu0 %1091  ;;  %v1605_v29 = vadd.f32 %v4496_v46, %v1573_v26 }
 0x294   : > { %5802 = vst [vmem:[#allocation91_spill] sm:$0xff] %v4676_v59  ;;  %v4699_v59 = vpop.f32.mrf.mxu3  ;;  %v4716_v26 = vpop.f32.mrf.mxu1 }
 0x295   : > { %5808 = vst [vmem:[#allocation97_spill] sm:$0xff] %v4699_v59 }
 0x296   : > { %5812 = vst [vmem:[#allocation101_spill] sm:$0xff] %v4716_v26 }
 0x298   : > { %1516 = vrot.lane.b32.xlu2 %v4678_v45, %s3044_s10 }
 0x299   : > { %1676 = vrot.lane.b32.xlu0 %v1604_v14, %s3043_s23  ;;  %1111 = vrot.lane.b32.xlu1 %v4681_v44, %s3044_s10  ;;  %v4712_v44 = vpop.f32.mrf.mxu2 }
 0x29a   : > { %v4688_v38 = vpop.permute.xlu2 %2024  ;;  %5810 = vst [vmem:[#allocation99_spill] sm:$0xff] %v4712_v44 }
 0x29b   : > { %5804 = vst [vmem:[#allocation93_spill] sm:$0xff] %v4688_v38  ;;  %v4692_v48 = vpop.permute.xlu1 %1093  ;;  %v4694_v40 = vpop.permute.xlu0 %2020 }
 0x29c   : > { %5805 = vst [vmem:[#allocation94_spill] sm:$0xff] %v4692_v48  ;;  %v4714_v38 = vpop.f32.mrf.mxu0 }
 0x29d   : > { %5806 = vst [vmem:[#allocation95_spill] sm:$0xff] %v4694_v40 }
 0x29e   : > { %5811 = vst [vmem:[#allocation100_spill] sm:$0xff] %v4714_v38 }
 0x2a0   : > { %2378 = vrot.lane.b32.xlu2 %v4699_v59, %s3044_s10  ;;  %v4732_v59 = vpop.f32.mrf.mxu3 }
 0x2a1   : > { %2038 = vrot.lane.b32.xlu0 %v4696_v50, %s3044_s10  ;;  %1678 = vrot.lane.b32.xlu1 %v1605_v29, %s3043_s23  ;;  %v1574_v29 = vadd.f32 %v4566_v56, %v4214_v7  ;;  %v4735_v48 = vpop.f32.mrf.mxu2 }
 0x2a2   : > { %v4706_v14 = vpop.permute.xlu2 %1504  ;;  %5815 = vst [vmem:[#allocation104_spill] sm:$0xff] %v4735_v48 }
 0x2a3   : > { %v4708_v24 = vpop.permute.xlu1 %2022  ;;  %v4710_v39 = vpop.permute.xlu0 %1500 }
 0x2a4   : > { %5809 = vst [vmem:[#allocation98_spill] sm:$0xff] %v4708_v24 }
 0x2a8   : > { %1113 = vrot.lane.b32.xlu2 %v4714_v38, %s3044_s10  ;;  %v1606_v38 = vadd.f32 %v4496_v46, %v1574_v29  ;;  %v5818_v29 = vld [vmem:[#allocation33_spill] sm:$0xff] }
 0x2a9   : > { %1518 = vrot.lane.b32.xlu0 %v4712_v44, %s3044_s10  ;;  %2040 = vrot.lane.b32.xlu1 %v4716_v26, %s3044_s10  ;;  %v1159_v44 = vadd.f32 %v4314_v47, %v5818_v29  ;;  %v1575_v29 = vadd.f32 %v4584_v10, %v4239_v21 }
 0x2aa   : > { %v4726_v50 = vpop.permute.xlu2 %2366 }
 0x2ab   : > { %5813 = vst [vmem:[#allocation102_spill] sm:$0xff] %v4726_v50  ;;  %v4728_v40 = vpop.permute.xlu1 %1502  ;;  %v4730_v24 = vpop.permute.xlu0 %2362  ;;  %v1161_v50 = vadd.f32 %v4398_v42, %v3778_v20  ;;  %v1194_v47 = vadd.f32 %v4496_v46, %v1159_v44 }
 0x2ac   : > { %5814 = vst [vmem:[#allocation103_spill] sm:$0xff] %v4730_v24  ;;  %v4755_v24 = vpop.f32.mrf.mxu1  ;;  %v4784_v44 = vpop.f32.mrf.mxu2 }
 0x2ad   : > { %5820 = vst [vmem:[#allocation107_spill] sm:$0xff] %v4755_v24  ;;  %v1196_v20 = vadd.f32 %v4496_v46, %v1161_v50 }
 0x2b0   : > { %1680 = vrot.lane.b32.xlu2 %v1606_v38, %s3043_s23  ;;  %v4753_v38 = vpop.f32.mrf.mxu0 }
 0x2b1   : > { %1520 = vrot.lane.b32.xlu1 %v4735_v48, %s3044_s10  ;;  %2380 = vrot.lane.b32.xlu0 %v4732_v59, %s3044_s10  ;;  %5819 = vst [vmem:[#allocation33_spill] sm:$0xff] %v4753_v38  ;;  %v4757_v48 = vpop.f32.mrf.mxu3 }
 0x2b2   : > { %v4742_v7 = vpop.permute.xlu2 %1101  ;;  %5821 = vst [vmem:[#allocation108_spill] sm:$0xff] %v4757_v48 }
 0x2b3   : > { %5816 = vst [vmem:[#allocation105_spill] sm:$0xff] %v4742_v7  ;;  %v4744_v56 = vpop.permute.xlu1 %2364  ;;  %v4746_v26 = vpop.permute.xlu0 %1097 }
 0x2b4   : > { %5817 = vst [vmem:[#allocation106_spill] sm:$0xff] %v4746_v26 }
 0x2b8   : > { %2042 = vrot.lane.b32.xlu2 %v4755_v24, %s3044_s10  ;;  %v4787_v21 = vpop.f32.mrf.mxu0 }
 0x2b9   : > { %1115 = vrot.lane.b32.xlu0 %v4753_v38, %s3044_s10  ;;  %2382 = vrot.lane.b32.xlu1 %v4757_v48, %s3044_s10  ;;  %v1160_v38 = vadd.f32 %v4378_v32, %v3723_v5  ;;  %v1607_v48 = vadd.f32 %v4496_v46, %v1575_v29  ;;  %5822 = vst [vmem:[#allocation109_spill] sm:$0xff] %v4787_v21 }
 0x2ba   : > { %v1669_v42 = vpop.permute.xlu2 %1668  ;;  %v1576_v5 = vadd.f32 %v4562_v19, %v4284_v31 }
 0x2bb   : > { %v1760_v24 = vsel %vm550_vm1, %v1196_v20, %v1669_v42  ;;  %v4775_v7 = vpop.permute.xlu1 %1099  ;;  %v1665_v26 = vpop.permute.xlu0 %1664  ;;  %v1195_v10 = vadd.f32 %v4496_v46, %v1160_v38 }
 0x2bc   : > { %1792 = vst.msk [vmem:[%s4764_s20 + $0x40] sm:$0xff] %vm822_vm2, %v1760_v24  ;;  %v1758_v50 = vsel %vm550_vm1, %v1194_v47, %v1665_v26  ;;  %v4804_v47 = vpop.f32.mrf.mxu1  ;;  %v4807_v42 = vpop.f32.mrf.mxu3 }
 0x2bd   : > { %1790 = vst.msk [vmem:[%s4764_s20 + $0x20] sm:$0xff] %vm822_vm2, %v1758_v50  ;;  %v4822_v50 = vpop.f32.mrf.mxu2 }
 0x2be   : > { %5825 = vst [vmem:[#allocation112_spill] sm:$0xff] %v4804_v47 }
 0x2c0   : > { %1522 = vrot.lane.b32.xlu2 %v4784_v44, %s3044_s10  ;;  %v4820_v29 = vpop.f32.mrf.mxu0 }
 0x2c1   : > { %1682 = vrot.lane.b32.xlu0 %v1607_v48, %s3043_s23  ;;  %1117 = vrot.lane.b32.xlu1 %v4787_v21, %s3044_s10  ;;  %v1608_v48 = vadd.f32 %v4496_v46, %v1576_v5  ;;  %5827 = vst [vmem:[#allocation114_spill] sm:$0xff] %v4820_v29  ;;  %v1577_v5 = vadd.f32 %v4640_v9, %v4306_v30 }
 0x2c2   : > { %v4795_v24 = vpop.permute.xlu2 %2030  ;;  %v1578_v30 = vadd.f32 %v4654_v16, %v4340_v11 }
 0x2c3   : > { %5823 = vst [vmem:[#allocation110_spill] sm:$0xff] %v4795_v24  ;;  %v1667_v32 = vpop.permute.xlu1 %1666  ;;  %v4799_v26 = vpop.permute.xlu0 %2026  ;;  %v1609_v21 = vadd.f32 %v4496_v46, %v1577_v5  ;;  %v1164_v5 = vadd.f32 %v4470_v12, %v3965_v52 }
 0x2c4   : > { %5824 = vst [vmem:[#allocation111_spill] sm:$0xff] %v4799_v26  ;;  %v1759_v20 = vsel %vm550_vm1, %v1195_v10, %v1667_v32  ;;  %v4824_v10 = vpop.f32.mrf.mxu1  ;;  %v4868_v52 = vpop.f32.mrf.mxu3 }
 0x2c5   : > { %1791 = vst.msk [vmem:[%s4764_s20 + $0x28] sm:$0xff] %vm822_vm2, %v1759_v20  ;;  %v4841_v24 = vpop.f32.mrf.mxu2  ;;  %v1199_v11 = vadd.f32 %v4496_v46, %v1164_v5 }
 0x2c6   : > { %5828 = vst [vmem:[#allocation115_spill] sm:$0xff] %v4824_v10 }
 0x2c8   : > { %2384 = vrot.lane.b32.xlu2 %v4807_v42, %s3044_s10 }
 0x2c9   : > { %2044 = vrot.lane.b32.xlu0 %v4804_v47, %s3044_s10  ;;  %1684 = vrot.lane.b32.xlu1 %v1608_v48, %s3043_s23  ;;  %v994_v47 = vpop.f32.mrf.mxu0 }
 0x2ca   : > { %v4814_v31 = vpop.permute.xlu2 %1510 }
 0x2cb   : > { %v4816_v19 = vpop.permute.xlu1 %2028  ;;  %v4818_v38 = vpop.permute.xlu0 %1506 }
 0x2cc   : > { %5826 = vst [vmem:[#allocation113_spill] sm:$0xff] %v4816_v19  ;;  %v4855_v26 = vpop.f32.mrf.mxu1 }
 0x2cd   : > { %5830 = vst [vmem:[#allocation117_spill] sm:$0xff] %v4855_v26 }
 0x2d0   : > { %1119 = vrot.lane.b32.xlu2 %v4820_v29, %s3044_s10 }
 0x2d1   : > { %1524 = vrot.lane.b32.xlu0 %v4822_v50, %s3044_s10  ;;  %2046 = vrot.lane.b32.xlu1 %v4824_v10, %s3044_s10  ;;  %v997_v19 = vpop.f32.mrf.mxu0 }
 0x2d2   : > { %v4834_v32 = vpop.permute.xlu2 %2372 }
 0x2d3   : > { %v4836_v20 = vpop.permute.xlu1 %1508  ;;  %v4838_v48 = vpop.permute.xlu0 %2368 }
 0x2d8   : > { %1686 = vrot.lane.b32.xlu2 %v1609_v21, %s3043_s23  ;;  %v1162_v21 = vadd.f32 %v4376_v28, %v3909_v54  ;;  %v1579_v54 = vadd.f32 %v4636_v23, %v4366_v53 }
 0x2d9   : > { %1121 = vrot.lane.b32.xlu0 %v994_v47, %s3044_s10  ;;  %1526 = vrot.lane.b32.xlu1 %v4841_v24, %s3044_s10  ;;  %v1610_v47 = vadd.f32 %v4496_v46, %v1578_v30 }
 0x2da   : > { %v4847_v10 = vpop.permute.xlu2 %1107  ;;  %v1197_v16 = vadd.f32 %v4496_v46, %v1162_v21  ;;  %v4882_v21 = vpop.f32.mrf.mxu1  ;;  %v1611_v53 = vadd.f32 %v4496_v46, %v1579_v54 }
 0x2db   : > { %5829 = vst [vmem:[#allocation116_spill] sm:$0xff] %v4847_v10  ;;  %v4851_v9 = vpop.permute.xlu1 %2370  ;;  %v4853_v29 = vpop.permute.xlu0 %1103 }
 0x2dc   : > { %5831 = vst [vmem:[#allocation118_spill] sm:$0xff] %v4882_v21 }
 0x2e0   : > { %2048 = vrot.lane.b32.xlu2 %v4855_v26, %s3044_s10  ;;  %v1397_v26 = vpop.f32.mrf.mxu2 }
 0x2e1   : > { %1688 = vrot.lane.b32.xlu0 %v1610_v47, %s3043_s23  ;;  %1123 = vrot.lane.b32.xlu1 %v997_v19, %s3044_s10  ;;  %v1163_v19 = vadd.f32 %v4454_v17, %v3934_v43 }
 0x2e2   : > { %v1675_v12 = vpop.permute.xlu2 %1674  ;;  %v4902_v54 = vpop.f32.mrf.mxu1 }
 0x2e3   : > { %v1763_v28 = vsel %vm550_vm1, %v1199_v11, %v1675_v12  ;;  %v4873_v30 = vpop.permute.xlu1 %1105  ;;  %v1671_v10 = vpop.permute.xlu0 %1670  ;;  %v1198_v23 = vadd.f32 %v4496_v46, %v1163_v19  ;;  %5832 = vst [vmem:[#allocation119_spill] sm:$0xff] %v4902_v54 }
 0x2e4   : > { %1795 = vst.msk [vmem:[%s4764_s20 + $0x68] sm:$0xff] %vm822_vm2, %v1763_v28  ;;  %v1761_v5 = vsel %vm550_vm1, %v1197_v16, %v1671_v10  ;;  %v1580_v10 = vadd.f32 %v4710_v39, %v4388_v51  ;;  %v4897_v16 = vpop.f32.mrf.mxu3  ;;  %v1581_v39 = vadd.f32 %v4728_v40, %v4420_v27 }
 0x2e5   : > { %1793 = vst.msk [vmem:[%s4764_s20 + $0x48] sm:$0xff] %vm822_vm2, %v1761_v5 }
 0x2e6   : > { %v1612_v12 = vadd.f32 %v4496_v46, %v1580_v10 }
 0x2e8   : > { %1528 = vrot.lane.b32.xlu2 %v1397_v26, %s3044_s10  ;;  %v1400_v26 = vpop.f32.mrf.mxu2 }
 0x2e9   : > { %2050 = vrot.lane.b32.xlu0 %v4882_v21, %s3044_s10  ;;  %1690 = vrot.lane.b32.xlu1 %v1611_v53, %s3043_s23  ;;  %v1613_v53 = vadd.f32 %v4496_v46, %v1581_v39  ;;  %v2298_v21 = vpop.f32.mrf.mxu0 }
 0x2ea   : > { %v4892_v47 = vpop.permute.xlu2 %2036 }
 0x2eb   : > { %v1673_v11 = vpop.permute.xlu1 %1672  ;;  %v4894_v43 = vpop.permute.xlu0 %2032 }
 0x2ec   : > { %v1762_v17 = vsel %vm550_vm1, %v1198_v23, %v1673_v11  ;;  %v4916_v19 = vpop.f32.mrf.mxu3 }
 0x2ed   : > { %1794 = vst.msk [vmem:[%s4764_s20 + $0x60] sm:$0xff] %vm822_vm2, %v1762_v17 }
 0x2f0   : > { %1692 = vrot.lane.b32.xlu2 %v1612_v12, %s3043_s23  ;;  %v1430_v23 = vpop.f32.mrf.mxu2 }
 0x2f1   : > { %1530 = vrot.lane.b32.xlu0 %v1400_v26, %s3044_s10  ;;  %2052 = vrot.lane.b32.xlu1 %v4902_v54, %s3044_s10  ;;  %v1564_v27 = vadd.f32 %v4286_v57, %v1430_v23  ;;  %v4932_v26 = vpop.f32.mrf.mxu1  ;;  %v1582_v57 = vadd.f32 %v4706_v14, %v4440_v6  ;;  %v1167_v23 = vadd.f32 %v4548_v41, %v4047_v25 }
 0x2f2   : > { %v4908_v51 = vpop.permute.xlu2 %1516  ;;  %5833 = vst [vmem:[#allocation120_spill] sm:$0xff] %v4932_v26  ;;  %v1584_v41 = vadd.f32 %v4836_v20, %v4498_v37 }
 0x2f3   : > { %v4912_v28 = vpop.permute.xlu1 %2034  ;;  %v4914_v5 = vpop.permute.xlu0 %1512  ;;  %v1596_v17 = vadd.f32 %v4496_v46, %v1564_v27  ;;  %v1165_v27 = vadd.f32 %v4450_v63, %v3992_v13  ;;  %v1202_v6 = vadd.f32 %v4496_v46, %v1167_v23  ;;  %v1166_v23 = vadd.f32 %v4530_v36, %v4023_v60 }
 0x2f4   : > { %v4951_v54 = vpop.f32.mrf.mxu3  ;;  %v2432_v60 = vadd.f32 %v4358_v0, %v4099_v35  ;;  %v2433_v35 = vadd.f32 %v4436_v2, %v4116_v49  ;;  %v2434_v0 = vadd.f32 %v4452_v15, %v4140_v62  ;;  %v2436_v15 = vadd.f32 %v4514_v3, %v4185_v18  ;;  %v5834_v3 = vld [vmem:[#allocation24_spill] sm:$0xff] }
 0x2f5   : > { %v1200_v25 = vadd.f32 %v4496_v46, %v1165_v27  ;;  %v1616_v27 = vadd.f32 %v4496_v46, %v1584_v41  ;;  %v1201_v20 = vadd.f32 %v4496_v46, %v1166_v23  ;;  %v2435_v62 = vadd.f32 %v4432_v8, %v4159_v61  ;;  %v5835_v8 = vld [vmem:[#allocation55_spill] sm:$0xff] }
 0x2f6   : > { %v2464_v41 = vadd.f32 %v4496_v46, %v2432_v60  ;;  %v2465_v23 = vadd.f32 %v4496_v46, %v2433_v35  ;;  %v1586_v61 = vadd.f32 %v4914_v5, %v4555_v4 }
 0x2f8   : > { %2390 = vrot.lane.b32.xlu2 %v4916_v19, %s3044_s10  ;;  %v1618_v4 = vadd.f32 %v4496_v46, %v1586_v61 }
 0x2f9   : > { %1694 = vrot.lane.b32.xlu0 %v1613_v53, %s3043_s23  ;;  %2388 = vrot.lane.b32.xlu1 %v4897_v16, %s3044_s10 }
 0x2fa   : > { %v4924_v10 = vpop.permute.xlu2 %2378 }
 0x2fb   : > { %v4927_v40 = vpop.permute.xlu1 %1514  ;;  %v4929_v11 = vpop.permute.xlu0 %2374 }
 0x2fc   : > { %v4975_v37 = vpop.f32.mrf.mxu3 }
 0x300   : > { %2054 = vrot.lane.b32.xlu2 %v4932_v26, %s3044_s10  ;;  %v1614_v26 = vadd.f32 %v4496_v46, %v1582_v57 }
 0x301   : > { %2386 = vrot.lane.b32.xlu0 %v4868_v52, %s3044_s10  ;;  %1660 = vrot.lane.b32.xlu1 %v1596_v17, %s3043_s23  ;;  %v1433_v17 = vpop.f32.mrf.mxu2 }
 0x302   : > { %v4939_v12 = vpop.permute.xlu2 %1113  ;;  %v1565_v13 = vadd.f32 %v4350_v33, %v1433_v17  ;;  %v1583_v17 = vadd.f32 %v4818_v38, %v4460_v34  ;;  %v1585_v38 = vadd.f32 %v4814_v31, %v4532_v58  ;;  %v1587_v58 = vadd.f32 %v4927_v40, %v4588_v1  ;;  %v5836_v40 = vld [vmem:[#allocation25_spill] sm:$0xff] }
 0x303   : > { %v4943_v39 = vpop.permute.xlu1 %2376  ;;  %v4945_v53 = vpop.permute.xlu0 %1109  ;;  %v2438_v1 = vadd.f32 %v5835_v8, %v5834_v3  ;;  %v5845_v3 = vld [vmem:[#allocation79_spill] sm:$0xff] }
 0x304   : > { %v1597_v33 = vadd.f32 %v4496_v46, %v1565_v13  ;;  %v1619_v60 = vadd.f32 %v4496_v46, %v1587_v58  ;;  %v1588_v8 = vadd.f32 %v4908_v51, %v5845_v3 }
 0x305   : > { %v2470_v5 = vadd.f32 %v4496_v46, %v2438_v1 }
 0x306   : > { %v1620_v51 = vadd.f32 %v4496_v46, %v1588_v8 }
 0x308   : > { %2396 = vrot.lane.b32.xlu2 %v2298_v21, %s3044_s10 }
 0x309   : > { %1696 = vrot.lane.b32.xlu1 %v1614_v26, %s3043_s23  ;;  %2392 = vrot.lane.b32.xlu0 %v4951_v54, %s3044_s10 }
 0x30a   : > { %v1681_v63 = vpop.permute.xlu2 %1680 }
 0x30b   : > { %v1766_v14 = vsel %vm550_vm1, %v1202_v6, %v1681_v63  ;;  %v4964_v57 = vpop.permute.xlu1 %1111  ;;  %v1677_v21 = vpop.permute.xlu0 %1676  ;;  %v1615_v63 = vadd.f32 %v4496_v46, %v1583_v17  ;;  %v2467_v17 = vadd.f32 %v4496_v46, %v2435_v62  ;;  %v5842_v62 = vld [vmem:[#allocation70_spill] sm:$0xff] }
 0x30c   : > { %1798 = vst.msk [vmem:[%s4764_s20 + $0xa0] sm:$0xff] %vm822_vm2, %v1766_v14  ;;  %v1764_v26 = vsel %vm550_vm1, %v1200_v25, %v1677_v21  ;;  %v2301_v14 = vpop.f32.mrf.mxu0 }
 0x30d   : > { %1796 = vst.msk [vmem:[%s4764_s20 + $0x80] sm:$0xff] %vm822_vm2, %v1764_v26 }
 0x310   : > { %1662 = vrot.lane.b32.xlu2 %v1597_v33, %s3043_s23  ;;  %v2466_v33 = vadd.f32 %v4496_v46, %v2434_v0  ;;  %v5839_v0 = vld [vmem:[#allocation2_spill] sm:$0xff] }
 0x311   : > { %2394 = vrot.lane.b32.xlu1 %v4975_v37, %s3044_s10  ;;  %1700 = vrot.lane.b32.xlu0 %v1616_v27, %s3043_s23  ;;  %v1617_v27 = vadd.f32 %v4496_v46, %v1585_v38  ;;  %v5840_v38 = vld [vmem:[#allocation58_spill] sm:$0xff] }
 0x312   : > { %v4984_v6 = vpop.permute.xlu2 %2042 }
 0x313   : > { %v1679_v36 = vpop.permute.xlu1 %1678  ;;  %v4988_v25 = vpop.permute.xlu0 %2038 }
 0x314   : > { %v1765_v13 = vsel %vm550_vm1, %v1201_v20, %v1679_v36  ;;  %v2468_v20 = vadd.f32 %v4496_v46, %v2436_v15  ;;  %v5837_v36 = vld [vmem:[#allocation59_spill] sm:$0xff]  ;;  %v5841_v15 = vld [vmem:[#allocation5_spill] sm:$0xff] }
 0x315   : > { %1797 = vst.msk [vmem:[%s4764_s20 + $0x88] sm:$0xff] %vm822_vm2, %v1765_v13  ;;  %v2437_v13 = vadd.f32 %v5837_v36, %v5836_v40  ;;  %v2439_v58 = vadd.f32 %v5842_v62, %v5841_v15  ;;  %v5850_v15 = vld [vmem:[#allocation4_spill] sm:$0xff]  ;;  %v5851_v62 = vld [vmem:[#allocation69_spill] sm:$0xff] }
 0x318   : > { %1698 = vrot.lane.b32.xlu2 %v1615_v63, %s3043_s23 }
 0x319   : > { %2528 = vrot.lane.b32.xlu1 %v2464_v41, %s3043_s23  ;;  %2398 = vrot.lane.b32.xlu0 %v2301_v14, %s3044_s10  ;;  %v5838_v14 = vld [vmem:[#allocation31_spill] sm:$0xff] }
 0x31a   : > { %v5000_v34 = vpop.permute.xlu2 %1522  ;;  %v1170_v35 = vadd.f32 %v4618_v55, %v5838_v14  ;;  %v2471_v14 = vadd.f32 %v4496_v46, %v2439_v58  ;;  %v2441_v58 = vadd.f32 %v5851_v62, %v5850_v15 }
 0x31b   : > { %v5006_v21 = vpop.permute.xlu1 %2040  ;;  %v5008_v26 = vpop.permute.xlu0 %1518 }
 0x31c   : > { %v2473_v8 = vadd.f32 %v4496_v46, %v2441_v58  ;;  %v5859_v58 = vld [vmem:[#allocation103_spill] sm:$0xff] }
 0x320   : > { %2530 = vrot.lane.b32.xlu2 %v2465_v23, %s3043_s23  ;;  %v1168_v23 = vadd.f32 %v5840_v38, %v5839_v0  ;;  %v5847_v0 = vld [vmem:[#allocation74_spill] sm:$0xff] }
 0x321   : > { %2532 = vrot.lane.b32.xlu0 %v2466_v33, %s3043_s23  ;;  %1702 = vrot.lane.b32.xlu1 %v1617_v27, %s3043_s23  ;;  %v2469_v33 = vadd.f32 %v4496_v46, %v2437_v13  ;;  %v1205_v27 = vadd.f32 %v4496_v46, %v1170_v35  ;;  %v5846_v35 = vld [vmem:[#allocation11_spill] sm:$0xff] }
 0x322   : > { %v5018_v49 = vpop.permute.xlu2 %2384  ;;  %v1203_v55 = vadd.f32 %v4496_v46, %v1168_v23  ;;  %v1169_v38 = vadd.f32 %v5847_v0, %v5846_v35  ;;  %v5855_v0 = vld [vmem:[#allocation16_spill] sm:$0xff] }
 0x323   : > { %v1521_v2 = vpop.permute.xlu1 %1520  ;;  %v5024_v31 = vpop.permute.xlu0 %2380 }
 0x328   : > { %2536 = vrot.lane.b32.xlu2 %v2468_v20, %s3043_s23 }
 0x329   : > { %1706 = vrot.lane.b32.xlu0 %v1619_v60, %s3043_s23  ;;  %2534 = vrot.lane.b32.xlu1 %v2467_v17, %s3043_s23  ;;  %v5843_v17 = vld [vmem:[#allocation28_spill] sm:$0xff]  ;;  %v5844_v60 = vld [vmem:[#allocation73_spill] sm:$0xff] }
 0x32a   : > { %v5034_v18 = vpop.permute.xlu2 %1119  ;;  %v2440_v61 = vadd.f32 %v5844_v60, %v5843_v17 }
 0x32b   : > { %v5040_v63 = vpop.permute.xlu1 %2382  ;;  %v5042_v41 = vpop.permute.xlu0 %1115 }
 0x32c   : > { %v2472_v23 = vadd.f32 %v4496_v46, %v2440_v61 }
 0x330   : > { %1704 = vrot.lane.b32.xlu2 %v1618_v4, %s3043_s23  ;;  %v1204_v4 = vadd.f32 %v4496_v46, %v1169_v38  ;;  %v2443_v38 = vadd.f32 %v4674_v22, %v5855_v0  ;;  %v5858_v22 = vld [vmem:[#allocation40_spill] sm:$0xff] }
 0x331   : > { %2538 = vrot.lane.b32.xlu0 %v2469_v33, %s3043_s23  ;;  %2540 = vrot.lane.b32.xlu1 %v2470_v5, %s3043_s23  ;;  %v5848_v5 = vld [vmem:[#allocation9_spill] sm:$0xff]  ;;  %v5849_v33 = vld [vmem:[#allocation86_spill] sm:$0xff] }
 0x332   : > { %v1687_v20 = vpop.permute.xlu2 %1686 }
 0x333   : > { %v1769_v1 = vsel %vm550_vm1, %v1205_v27, %v1687_v20  ;;  %v5063_v40 = vpop.permute.xlu1 %1117  ;;  %v1683_v36 = vpop.permute.xlu0 %1682  ;;  %v2442_v27 = vadd.f32 %v5849_v33, %v5848_v5  ;;  %v1590_v20 = vadd.f32 %v1521_v2, %v4678_v45  ;;  %v5852_v45 = vld [vmem:[#allocation84_spill] sm:$0xff]  ;;  %v5857_v5 = vld [vmem:[#allocation94_spill] sm:$0xff] }
 0x334   : > { %1801 = vst.msk [vmem:[%s4764_s20 + $0xc8] sm:$0xff] %vm822_vm2, %v1769_v1  ;;  %v1767_v13 = vsel %vm550_vm1, %v1203_v55, %v1683_v36  ;;  %v1589_v2 = vadd.f32 %v5008_v26, %v5852_v45  ;;  %v2475_v26 = vadd.f32 %v4496_v46, %v2443_v38 }
 0x335   : > { %1799 = vst.msk [vmem:[%s4764_s20 + $0xa8] sm:$0xff] %vm822_vm2, %v1767_v13  ;;  %v2474_v3 = vadd.f32 %v4496_v46, %v2442_v27  ;;  %v1622_v1 = vadd.f32 %v4496_v46, %v1590_v20  ;;  %v5853_v13 = vld [vmem:[#allocation35_spill] sm:$0xff]  ;;  %v2445_v20 = vadd.f32 %v5859_v58, %v5858_v22 }
 0x336   : > { %v1621_v27 = vadd.f32 %v4496_v46, %v1589_v2 }
 0x337   : > { %v2477_v38 = vadd.f32 %v4496_v46, %v2445_v20 }
 0x338   : > { %2542 = vrot.lane.b32.xlu2 %v2471_v14, %s3043_s23  ;;  %v5854_v14 = vld [vmem:[#allocation85_spill] sm:$0xff] }
 0x339   : > { %2544 = vrot.lane.b32.xlu0 %v2472_v23, %s3043_s23  ;;  %1708 = vrot.lane.b32.xlu1 %v1620_v51, %s3043_s23  ;;  %v2444_v35 = vadd.f32 %v5854_v14, %v5853_v13  ;;  %v5862_v14 = vld [vmem:[#allocation19_spill] sm:$0xff] }
 0x33a   : > { %v5081_v55 = vpop.permute.xlu2 %2048 }
 0x33b   : > { %v1685_v17 = vpop.permute.xlu1 %1684  ;;  %v5086_v60 = vpop.permute.xlu0 %2044  ;;  %v2476_v15 = vadd.f32 %v4496_v46, %v2444_v35  ;;  %v5863_v35 = vld [vmem:[#allocation72_spill] sm:$0xff] }
 0x33c   : > { %v1768_v61 = vsel %vm550_vm1, %v1204_v4, %v1685_v17  ;;  %v5856_v4 = vld [vmem:[#allocation34_spill] sm:$0xff]  ;;  %v1171_v0 = vadd.f32 %v5863_v35, %v5862_v14 }
 0x33d   : > { %1800 = vst.msk [vmem:[%s4764_s20 + $0xc0] sm:$0xff] %vm822_vm2, %v1768_v61  ;;  %v1173_v33 = vadd.f32 %v5857_v5, %v5856_v4  ;;  %v5860_v61 = vld [vmem:[#allocation44_spill] sm:$0xff] }
 0x33e   : > { %v5864_v5 = vld [vmem:[#allocation52_spill] sm:$0xff] }
 0x33f   : > { %v1208_v62 = vadd.f32 %v4496_v46, %v1173_v33  ;;  %v2448_v33 = vadd.f32 %v4838_v48, %v5864_v5 }
 0x340   : > { %2548 = vrot.lane.b32.xlu2 %v2474_v3, %s3043_s23  ;;  %v2446_v3 = vadd.f32 %v4744_v56, %v5860_v61  ;;  %v5867_v61 = vld [vmem:[#allocation12_spill] sm:$0xff] }
 0x341   : > { %1712 = vrot.lane.b32.xlu0 %v1622_v1, %s3043_s23  ;;  %2546 = vrot.lane.b32.xlu1 %v2473_v8, %s3043_s23  ;;  %v5861_v8 = vld [vmem:[#allocation99_spill] sm:$0xff]  ;;  %v2480_v48 = vadd.f32 %v4496_v46, %v2448_v33 }
 0x342   : > { %v1529_v36 = vpop.permute.xlu2 %1528  ;;  %v1591_v1 = vadd.f32 %v5000_v34, %v5861_v8  ;;  %v2478_v4 = vadd.f32 %v4496_v46, %v2446_v3  ;;  %v1206_v34 = vadd.f32 %v4496_v46, %v1171_v0  ;;  %v5868_v3 = vld [vmem:[#allocation91_spill] sm:$0xff]  ;;  %v5870_v0 = vld [vmem:[#allocation64_spill] sm:$0xff] }
 0x343   : > { %v5103_v23 = vpop.permute.xlu1 %2046  ;;  %v1525_v51 = vpop.permute.xlu0 %1524  ;;  %v1172_v8 = vadd.f32 %v5868_v3, %v5867_v61 }
 0x344   : > { %v1623_v56 = vadd.f32 %v4496_v46, %v1591_v1 }
 0x348   : > { %1710 = vrot.lane.b32.xlu2 %v1621_v27, %s3043_s23 }
 0x349   : > { %2550 = vrot.lane.b32.xlu0 %v2475_v26, %s3043_s23  ;;  %2552 = vrot.lane.b32.xlu1 %v2476_v15, %s3043_s23  ;;  %v5865_v15 = vld [vmem:[#allocation47_spill] sm:$0xff]  ;;  %v5866_v26 = vld [vmem:[#allocation102_spill] sm:$0xff] }
 0x34a   : > { %v1693_v17 = vpop.permute.xlu2 %1692 }
 0x34b   : > { %v1772_v45 = vsel %vm550_vm1, %v1208_v62, %v1693_v17  ;;  %v1527_v2 = vpop.permute.xlu1 %1526  ;;  %v5121_v13 = vpop.permute.xlu0 %1121  ;;  %v2447_v62 = vadd.f32 %v5866_v26, %v5865_v15 }
 0x34c   : > { %1804 = vst.msk [vmem:[%s4764_s20 + $0x100] sm:$0xff] %vm822_vm2, %v1772_v45  ;;  %v1593_v22 = vadd.f32 %v1527_v2, %v4784_v44  ;;  %v1207_v44 = vadd.f32 %v4496_v46, %v1172_v8  ;;  %v5869_v2 = vld [vmem:[#allocation104_spill] sm:$0xff]  ;;  %v5874_v8 = vld [vmem:[#allocation10_spill] sm:$0xff] }
 0x34d   : > { %v2479_v1 = vadd.f32 %v4496_v46, %v2447_v62  ;;  %v1592_v14 = vadd.f32 %v1525_v51, %v5869_v2 }
 0x34e   : > { %v1625_v45 = vadd.f32 %v4496_v46, %v1593_v22  ;;  %v5873_v22 = vld [vmem:[#allocation76_spill] sm:$0xff] }
 0x34f   : > { %v1624_v15 = vadd.f32 %v4496_v46, %v1592_v14 }
 0x350   : > { %2554 = vrot.lane.b32.xlu2 %v2477_v38, %s3043_s23  ;;  %v2450_v38 = vadd.f32 %v4834_v32, %v5870_v0  ;;  %v5872_v32 = vld [vmem:[#allocation68_spill] sm:$0xff] }
 0x351   : > { %2556 = vrot.lane.b32.xlu0 %v2478_v4, %s3043_s23  ;;  %1714 = vrot.lane.b32.xlu1 %v1623_v56, %s3043_s23  ;;  %v5871_v4 = vld [vmem:[#allocation57_spill] sm:$0xff] }
 0x352   : > { %v5136_v27 = vpop.permute.xlu2 %2390  ;;  %v2449_v56 = vadd.f32 %v4851_v9, %v5871_v4  ;;  %v2482_v26 = vadd.f32 %v4496_v46, %v2450_v38  ;;  %v2451_v9 = vadd.f32 %v4929_v11, %v5872_v32 }
 0x353   : > { %v5141_v58 = vpop.permute.xlu1 %1123  ;;  %v1689_v20 = vpop.permute.xlu0 %1688 }
 0x354   : > { %v1770_v17 = vsel %vm550_vm1, %v1206_v34, %v1689_v20  ;;  %v2481_v51 = vadd.f32 %v4496_v46, %v2449_v56  ;;  %v2452_v20 = vadd.f32 %v4943_v39, %v5873_v22  ;;  %v2483_v14 = vadd.f32 %v4496_v46, %v2451_v9  ;;  %v5879_v56 = vld [vmem:[#allocation83_spill] sm:$0xff]  ;;  %v5881_v22 = vld [vmem:[#allocation46_spill] sm:$0xff] }
 0x355   : > { %1802 = vst.msk [vmem:[%s4764_s20 + $0xe0] sm:$0xff] %vm822_vm2, %v1770_v17  ;;  %v1594_v17 = vadd.f32 %v1529_v36, %v4822_v50  ;;  %v5878_v36 = vld [vmem:[#allocation89_spill] sm:$0xff] }
 0x356   : > { %v2484_v11 = vadd.f32 %v4496_v46, %v2452_v20  ;;  %v2454_v38 = vadd.f32 %v5024_v31, %v5878_v36  ;;  %v1176_v20 = vadd.f32 %v4775_v7, %v5881_v22  ;;  %v5882_v31 = vld [vmem:[#allocation23_spill] sm:$0xff]  ;;  %v5884_v36 = vld [vmem:[#allocation8_spill] sm:$0xff] }
 0x357   : > { %v1626_v0 = vadd.f32 %v4496_v46, %v1594_v17  ;;  %v5883_v17 = vld [vmem:[#allocation27_spill] sm:$0xff] }
 0x358   : > { %2560 = vrot.lane.b32.xlu2 %v2480_v48, %s3043_s23  ;;  %v5875_v48 = vld [vmem:[#allocation14_spill] sm:$0xff] }
 0x359   : > { %1718 = vrot.lane.b32.xlu0 %v1625_v45, %s3043_s23  ;;  %2558 = vrot.lane.b32.xlu1 %v2479_v1, %s3043_s23  ;;  %v1158_v1 = vadd.f32 %v5875_v48, %v5874_v8  ;;  %v5876_v45 = vld [vmem:[#allocation39_spill] sm:$0xff]  ;;  %v1157_v8 = vadd.f32 %v5883_v17, %v5882_v31  ;;  %v5889_v17 = vld [vmem:[#allocation26_spill] sm:$0xff] }
 0x35a   : > { %v5156_v35 = vpop.permute.xlu2 %2054 }
 0x35b   : > { %v1691_v34 = vpop.permute.xlu1 %1690  ;;  %v5162_v5 = vpop.permute.xlu0 %2050  ;;  %v1193_v50 = vadd.f32 %v4496_v46, %v1158_v1  ;;  %v1211_v1 = vadd.f32 %v4496_v46, %v1176_v20  ;;  %v1192_v7 = vadd.f32 %v4496_v46, %v1157_v8  ;;  %v5890_v8 = vld [vmem:[#allocation53_spill] sm:$0xff] }
 0x35c   : > { %v1771_v33 = vsel %vm550_vm1, %v1207_v44, %v1691_v34  ;;  %v5877_v44 = vld [vmem:[#allocation90_spill] sm:$0xff]  ;;  %v2453_v34 = vadd.f32 %v4924_v10, %v5879_v56  ;;  %v2486_v10 = vadd.f32 %v4496_v46, %v2454_v38  ;;  %v5885_v38 = vld [vmem:[#allocation41_spill] sm:$0xff] }
 0x35d   : > { %1803 = vst.msk [vmem:[%s4764_s20 + $0xe8] sm:$0xff] %vm822_vm2, %v1771_v33  ;;  %v1174_v2 = vadd.f32 %v5877_v44, %v5876_v45  ;;  %v5880_v33 = vld [vmem:[#allocation97_spill] sm:$0xff] }
 0x35f   : > { %v1209_v39 = vadd.f32 %v4496_v46, %v1174_v2  ;;  %v2456_v2 = vadd.f32 %v5018_v49, %v4732_v59 }
 0x360   : > { %1716 = vrot.lane.b32.xlu2 %v1624_v15, %s3043_s23  ;;  %v2455_v15 = vadd.f32 %v5040_v63, %v5880_v33  ;;  %v2485_v63 = vadd.f32 %v4496_v46, %v2453_v34 }
 0x361   : > { %2562 = vrot.lane.b32.xlu0 %v2481_v51, %s3043_s23  ;;  %2564 = vrot.lane.b32.xlu1 %v2482_v26, %s3043_s23 }
 0x362   : > { %v5175_v62 = vpop.permute.xlu2 %2396  ;;  %v2487_v48 = vadd.f32 %v4496_v46, %v2455_v15  ;;  %v5888_v15 = vld [vmem:[#allocation108_spill] sm:$0xff] }
 0x363   : > { %v5180_v61 = vpop.permute.xlu1 %2052  ;;  %v1531_v3 = vpop.permute.xlu0 %1530 }
 0x364   : > { %v1595_v45 = vadd.f32 %v1531_v3, %v4841_v24  ;;  %v5886_v24 = vld [vmem:[#allocation43_spill] sm:$0xff]  ;;  %v5887_v3 = vld [vmem:[#allocation106_spill] sm:$0xff] }
 0x365   : > { %v1175_v56 = vadd.f32 %v5887_v3, %v5886_v24 }
 0x366   : > { %v1627_v59 = vadd.f32 %v4496_v46, %v1595_v45 }
 0x367   : > { %v1210_v33 = vadd.f32 %v4496_v46, %v1175_v56 }
 0x368   : > { %2566 = vrot.lane.b32.xlu2 %v2483_v14, %s3043_s23 }
 0x369   : > { %2568 = vrot.lane.b32.xlu0 %v2484_v11, %s3043_s23  ;;  %1720 = vrot.lane.b32.xlu1 %v1626_v0, %s3043_s23 }
 0x36a   : > { %v1663_v4 = vpop.permute.xlu2 %1662 }
 0x36b   : > { %v1757_v26 = vsel %vm550_vm1, %v1193_v50, %v1663_v4  ;;  %v2389_v51 = vpop.permute.xlu1 %2388  ;;  %v1695_v32 = vpop.permute.xlu0 %1694  ;;  %v2093_v4 = vadd.f32 %v5885_v38, %v5884_v36  ;;  %v5893_v38 = vld [vmem:[#allocation60_spill] sm:$0xff] }
 0x36c   : > { %1789 = vst.msk [vmem:[%s4764_s20 + $0x8] sm:$0xff] %vm822_vm2, %v1757_v26  ;;  %v1773_v9 = vsel %vm550_vm1, %v1209_v39, %v1695_v32  ;;  %v2458_v14 = vadd.f32 %v2389_v51, %v4807_v42  ;;  %v2488_v42 = vadd.f32 %v4496_v46, %v2456_v2  ;;  %v2459_v32 = vadd.f32 %v5136_v27, %v4868_v52 }
 0x36d   : > { %1805 = vst.msk [vmem:[%s4764_s20 + $0x108] sm:$0xff] %vm822_vm2, %v1773_v9  ;;  %v2125_v34 = vadd.f32 %v4496_v46, %v2093_v4  ;;  %v1179_v4 = vadd.f32 %v4873_v30, %v5893_v38 }
 0x36e   : > { %v2490_v49 = vadd.f32 %v4496_v46, %v2458_v14  ;;  %v2491_v52 = vadd.f32 %v4496_v46, %v2459_v32  ;;  %v2462_v14 = vadd.f32 %v5175_v62, %v4951_v54  ;;  %v5276_v54 = vld [vmem:[%s5541_s3] ss:$0 sm:$0xff] }
 0x36f   : > { %v1214_v30 = vadd.f32 %v5276_v54, %v1179_v4 }
 0x370   : > { %2572 = vrot.lane.b32.xlu2 %v2486_v10, %s3043_s23  ;;  %v2096_v10 = vadd.f32 %v5890_v8, %v5889_v17  ;;  %v2494_v3 = vadd.f32 %v5276_v54, %v2462_v14  ;;  %v5903_v14 = vld [vmem:[#allocation6_spill] sm:$0xff] }
 0x371   : > { %2574 = vrot.lane.b32.xlu0 %v2487_v48, %s3043_s23  ;;  %2570 = vrot.lane.b32.xlu1 %v2485_v63, %s3043_s23  ;;  %v5891_v63 = vld [vmem:[#allocation50_spill] sm:$0xff]  ;;  %v5892_v48 = vld [vmem:[#allocation105_spill] sm:$0xff] }
 0x372   : > { %v1699_v44 = vpop.permute.xlu2 %1698  ;;  %v2128_v27 = vadd.f32 %v4496_v46, %v2096_v10 }
 0x373   : > { %v1775_v11 = vsel %vm550_vm1, %v1211_v1, %v1699_v44  ;;  %v1661_v0 = vpop.permute.xlu1 %1660  ;;  %v2387_v50 = vpop.permute.xlu0 %2386  ;;  %v1177_v1 = vadd.f32 %v5892_v48, %v5891_v63 }
 0x374   : > { %1807 = vst.msk [vmem:[%s4764_s20 + $0x128] sm:$0xff] %vm822_vm2, %v1775_v11  ;;  %v1756_v39 = vsel %vm550_vm1, %v1192_v7, %v1661_v0  ;;  %v2457_v26 = vadd.f32 %v2387_v50, %v5888_v15 }
 0x375   : > { %1788 = vst.msk [vmem:[%s4764_s20] sm:$0xff] %vm822_vm2, %v1756_v39  ;;  %v1212_v45 = vadd.f32 %v4496_v46, %v1177_v1 }
 0x376   : > { %v2489_v7 = vadd.f32 %v4496_v46, %v2457_v26  ;;  %v5894_v46 = vld [vmem:[#allocation22_spill] sm:$0xff]  ;;  %v5896_v26 = vld [vmem:[#allocation13_spill] sm:$0xff] }
 0x378   : > { %1722 = vrot.lane.b32.xlu2 %v1627_v59, %s3043_s23 }
 0x379   : > { %2580 = vrot.lane.b32.xlu0 %v2490_v49, %s3043_s23  ;;  %2576 = vrot.lane.b32.xlu1 %v2488_v42, %s3043_s23 }
 0x37a   : > { %v2531_v51 = vpop.permute.xlu2 %2530 }
 0x37b   : > { %v2625_v9 = vsel %vm550_vm1, %v2125_v34, %v2531_v51  ;;  %v1697_v22 = vpop.permute.xlu1 %1696  ;;  %v2393_v20 = vpop.permute.xlu0 %2392  ;;  %v5897_v51 = vld [vmem:[#allocation65_spill] sm:$0xff] }
 0x37c   : > { %2955 = vst.msk [vmem:[%s4764_s20 + $0x18] sm:$0xff] %vm822_vm2, %v2625_v9  ;;  %v1774_v31 = vsel %vm550_vm1, %v1210_v33, %v1697_v22  ;;  %v2460_v44 = vadd.f32 %v2393_v20, %v4897_v16  ;;  %v5895_v16 = vld [vmem:[#allocation37_spill] sm:$0xff]  ;;  %v2099_v32 = vadd.f32 %v5897_v51, %v5896_v26  ;;  %v5898_v9 = vld [vmem:[#allocation20_spill] sm:$0xff] }
 0x37d   : > { %1806 = vst.msk [vmem:[%s4764_s20 + $0x120] sm:$0xff] %vm822_vm2, %v1774_v31  ;;  %v2092_v24 = vadd.f32 %v5895_v16, %v5894_v46  ;;  %v5899_v22 = vld [vmem:[#allocation36_spill] sm:$0xff]  ;;  %v5900_v31 = vld [vmem:[#allocation54_spill] sm:$0xff] }
 0x37e   : > { %v2492_v62 = vadd.f32 %v5276_v54, %v2460_v44  ;;  %v2094_v20 = vadd.f32 %v5899_v22, %v5898_v9  ;;  %v1178_v17 = vadd.f32 %v4853_v29, %v5900_v31  ;;  %v2131_v10 = vadd.f32 %v5276_v54, %v2099_v32  ;;  %v5902_v44 = vld [vmem:[#allocation82_spill] sm:$0xff] }
 0x37f   : > { %v2124_v56 = vadd.f32 %v5276_v54, %v2092_v24 }
 0x380   : > { %2578 = vrot.lane.b32.xlu2 %v2489_v7, %s3043_s23  ;;  %v1213_v63 = vadd.f32 %v5276_v54, %v1178_v17 }
 0x381   : > { %2582 = vrot.lane.b32.xlu1 %v2491_v52, %s3043_s23 }
 0x382   : > { %v2537_v2 = vpop.permute.xlu2 %2536 }
 0x383   : > { %v2628_v11 = vsel %vm550_vm1, %v2128_v27, %v2537_v2  ;;  %v2395_v0 = vpop.permute.xlu1 %2394  ;;  %v1701_v50 = vpop.permute.xlu0 %1700 }
 0x384   : > { %2958 = vst.msk [vmem:[%s4764_s20 + $0x50] sm:$0xff] %vm822_vm2, %v2628_v11  ;;  %v2461_v39 = vadd.f32 %v2395_v0, %v4916_v19  ;;  %v1776_v36 = vsel %vm550_vm1, %v1212_v45, %v1701_v50  ;;  %v5901_v45 = vld [vmem:[#allocation15_spill] sm:$0xff]  ;;  %v5904_v11 = vld [vmem:[#allocation49_spill] sm:$0xff]  ;;  %v5905_v50 = vld [vmem:[#allocation66_spill] sm:$0xff] }
 0x385   : > { %1808 = vst.msk [vmem:[%s4764_s20 + $0x140] sm:$0xff] %vm822_vm2, %v1776_v36  ;;  %v2102_v2 = vadd.f32 %v5902_v44, %v5901_v45  ;;  %v2095_v0 = vadd.f32 %v5904_v11, %v5903_v14 }
 0x386   : > { %v2493_v19 = vadd.f32 %v5276_v54, %v2461_v39  ;;  %v5906_v39 = vld [vmem:[#allocation116_spill] sm:$0xff] }
 0x387   : > { %v1180_v36 = vadd.f32 %v5906_v39, %v5905_v50  ;;  %v2134_v38 = vadd.f32 %v5276_v54, %v2102_v2  ;;  %v2127_v4 = vadd.f32 %v5276_v54, %v2095_v0  ;;  %v5917_v39 = vld [vmem:[#allocation51_spill] sm:$0xff] }
 0x388   : > { %2584 = vrot.lane.b32.xlu2 %v2492_v62, %s3043_s23  ;;  %2586 = vrot.lane.b32.xlu0 %v2493_v19, %s3043_s23 }
 0x389   : > { %2588 = vrot.lane.b32.xlu1 %v2494_v3, %s3043_s23  ;;  %v1215_v46 = vadd.f32 %v5276_v54, %v1180_v36  ;;  %v5918_v36 = vld [vmem:[#allocation113_spill] sm:$0xff] }
 0x38a   : > { %v1705_v59 = vpop.permute.xlu2 %1704 }
 0x38b   : > { %v1778_v42 = vsel %vm550_vm1, %v1214_v30, %v1705_v59  ;;  %v2529_v49 = vpop.permute.xlu1 %2528  ;;  %v2399_v34 = vpop.permute.xlu0 %2398 }
 0x38c   : > { %1810 = vst.msk [vmem:[%s4764_s20 + $0x160] sm:$0xff] %vm822_vm2, %v1778_v42  ;;  %v2624_v33 = vsel %vm550_vm1, %v2124_v56, %v2529_v49  ;;  %v2463_v15 = vadd.f32 %v2399_v34, %v4975_v37  ;;  %v2126_v37 = vadd.f32 %v5276_v54, %v2094_v20  ;;  %v5907_v56 = vld [vmem:[#allocation80_spill] sm:$0xff]  ;;  %v5908_v42 = vld [vmem:[#allocation3_spill] sm:$0xff] }
 0x38d   : > { %2954 = vst.msk [vmem:[%s4764_s20 + $0x10] sm:$0xff] %vm822_vm2, %v2624_v33  ;;  %v1182_v59 = vadd.f32 %v4964_v57, %v5907_v56  ;;  %v5909_v49 = vld [vmem:[#allocation48_spill] sm:$0xff]  ;;  %v5910_v33 = vld [vmem:[#allocation7_spill] sm:$0xff] }
 0x38e   : > { %v2495_v8 = vadd.f32 %v5276_v54, %v2463_v15  ;;  %v2097_v34 = vadd.f32 %v5909_v49, %v5908_v42  ;;  %v5911_v15 = vld [vmem:[#allocation63_spill] sm:$0xff] }
 0x38f   : > { %v2098_v26 = vadd.f32 %v5911_v15, %v5910_v33  ;;  %v1217_v51 = vadd.f32 %v5276_v54, %v1182_v59  ;;  %v5922_v33 = vld [vmem:[#allocation100_spill] sm:$0xff] }
 0x390   : > { %2590 = vrot.lane.b32.xlu2 %v2495_v8, %s3043_s23  ;;  %v2129_v32 = vadd.f32 %v5276_v54, %v2097_v34  ;;  %v1185_v15 = vadd.f32 %v5063_v40, %v5922_v33  ;;  %v5936_v33 = vld [vmem:[#allocation56_spill] sm:$0xff] }
 0x391   : > { %v2130_v9 = vadd.f32 %v5276_v54, %v2098_v26  ;;  %v5923_v26 = vld [vmem:[#allocation32_spill] sm:$0xff] }
 0x392   : > { %v2543_v48 = vpop.permute.xlu2 %2542 }
 0x393   : > { %v2631_v1 = vsel %vm550_vm1, %v2131_v10, %v2543_v48  ;;  %v1703_v7 = vpop.permute.xlu1 %1702  ;;  %v2533_v52 = vpop.permute.xlu0 %2532  ;;  %v5912_v10 = vld [vmem:[#allocation38_spill] sm:$0xff]  ;;  %v5914_v48 = vld [vmem:[#allocation21_spill] sm:$0xff] }
 0x394   : > { %2961 = vst.msk [vmem:[%s4764_s20 + $0x78] sm:$0xff] %vm822_vm2, %v2631_v1  ;;  %v1777_v29 = vsel %vm550_vm1, %v1213_v63, %v1703_v7  ;;  %v2626_v27 = vsel %vm550_vm1, %v2126_v37, %v2533_v52  ;;  %v5913_v37 = vld [vmem:[#allocation98_spill] sm:$0xff]  ;;  %v5916_v52 = vld [vmem:[#allocation71_spill] sm:$0xff] }
 0x395   : > { %1809 = vst.msk [vmem:[%s4764_s20 + $0x148] sm:$0xff] %vm822_vm2, %v1777_v29  ;;  %v2105_v63 = vadd.f32 %v5913_v37, %v5912_v10  ;;  %v5915_v1 = vld [vmem:[#allocation62_spill] sm:$0xff]  ;;  %v1181_v29 = vadd.f32 %v4945_v53, %v5916_v52 }
 0x396   : > { %2956 = vst.msk [vmem:[%s4764_s20 + $0x30] sm:$0xff] %vm822_vm2, %v2626_v27  ;;  %v2100_v7 = vadd.f32 %v5915_v1, %v5914_v48  ;;  %v5927_v1 = vld [vmem:[#allocation67_spill] sm:$0xff]  ;;  %v5928_v52 = vld [vmem:[#allocation42_spill] sm:$0xff] }
 0x397   : > { %v2137_v27 = vadd.f32 %v5276_v54, %v2105_v63  ;;  %v1216_v44 = vadd.f32 %v5276_v54, %v1181_v29  ;;  %v5929_v29 = vld [vmem:[#allocation93_spill] sm:$0xff] }
 0x398   : > { %v2132_v45 = vadd.f32 %v5276_v54, %v2100_v7  ;;  %v2111_v7 = vadd.f32 %v4912_v28, %v5927_v1 }
 0x39a   : > { %v2549_v16 = vpop.permute.xlu2 %2548 }
 0x39b   : > { %v2634_v24 = vsel %vm550_vm1, %v2134_v38, %v2549_v16  ;;  %v2535_v62 = vpop.permute.xlu1 %2534  ;;  %v1707_v19 = vpop.permute.xlu0 %1706  ;;  %v2108_v38 = vadd.f32 %v5918_v36, %v5917_v39  ;;  %v5931_v36 = vld [vmem:[#allocation88_spill] sm:$0xff] }
 0x39c   : > { %2964 = vst.msk [vmem:[%s4764_s20 + $0xb0] sm:$0xff] %vm822_vm2, %v2634_v24  ;;  %v2627_v3 = vsel %vm550_vm1, %v2127_v4, %v2535_v62  ;;  %v1779_v30 = vsel %vm550_vm1, %v1215_v46, %v1707_v19  ;;  %v5919_v4 = vld [vmem:[#allocation17_spill] sm:$0xff]  ;;  %v5920_v46 = vld [vmem:[#allocation78_spill] sm:$0xff]  ;;  %v5921_v24 = vld [vmem:[#allocation87_spill] sm:$0xff] }
 0x39d   : > { %2957 = vst.msk [vmem:[%s4764_s20 + $0x38] sm:$0xff] %vm822_vm2, %v2627_v3  ;;  %v2101_v16 = vadd.f32 %v5920_v46, %v5919_v4  ;;  %v1183_v62 = vadd.f32 %v4939_v12, %v5921_v24  ;;  %v2140_v19 = vadd.f32 %v5276_v54, %v2108_v38  ;;  %v2114_v38 = vadd.f32 %v5006_v21, %v5931_v36  ;;  %v5932_v4 = vld [vmem:[#allocation45_spill] sm:$0xff]  ;;  %v5933_v46 = vld [vmem:[#allocation111_spill] sm:$0xff] }
 0x39e   : > { %1811 = vst.msk [vmem:[%s4764_s20 + $0x168] sm:$0xff] %vm822_vm2, %v1779_v30  ;;  %v5934_v24 = vld [vmem:[#allocation33_spill] sm:$0xff] }
 0x39f   : > { %v2133_v3 = vadd.f32 %v5276_v54, %v2101_v16  ;;  %v1218_v30 = vadd.f32 %v5276_v54, %v1183_v62  ;;  %v2107_v16 = vadd.f32 %v5933_v46, %v5932_v4  ;;  %v1186_v62 = vadd.f32 %v5034_v18, %v5934_v24  ;;  %v5945_v46 = vld [vmem:[#allocation120_spill] sm:$0xff] }
 0x3a2   : > { %v1711_v22 = vpop.permute.xlu2 %1710 }
 0x3a3   : > { %v1781_v57 = vsel %vm550_vm1, %v1217_v51, %v1711_v22  ;;  %v2541_v20 = vpop.permute.xlu1 %2540  ;;  %v2539_v31 = vpop.permute.xlu0 %2538  ;;  %v5924_v51 = vld [vmem:[#allocation77_spill] sm:$0xff]  ;;  %v5926_v22 = vld [vmem:[#allocation95_spill] sm:$0xff] }
 0x3a4   : > { %1813 = vst.msk [vmem:[%s4764_s20 + $0x188] sm:$0xff] %vm822_vm2, %v1781_v57  ;;  %v2630_v17 = vsel %vm550_vm1, %v2130_v9, %v2541_v20  ;;  %v2629_v8 = vsel %vm550_vm1, %v2129_v32, %v2539_v31  ;;  %v2103_v32 = vadd.f32 %v5924_v51, %v5923_v26  ;;  %v5925_v9 = vld [vmem:[#allocation18_spill] sm:$0xff]  ;;  %v1220_v20 = vadd.f32 %v5276_v54, %v1185_v15  ;;  %v5938_v51 = vld [vmem:[#allocation61_spill] sm:$0xff] }
 0x3a5   : > { %2960 = vst.msk [vmem:[%s4764_s20 + $0x70] sm:$0xff] %vm822_vm2, %v2630_v17  ;;  %v2104_v57 = vadd.f32 %v5926_v22, %v5925_v9  ;;  %v5937_v15 = vld [vmem:[#allocation110_spill] sm:$0xff] }
 0x3a6   : > { %2959 = vst.msk [vmem:[%s4764_s20 + $0x58] sm:$0xff] %vm822_vm2, %v2629_v8  ;;  %v2135_v31 = vadd.f32 %v5276_v54, %v2103_v32  ;;  %v2109_v26 = vadd.f32 %v5937_v15, %v5936_v33  ;;  %v2110_v32 = vadd.f32 %v4894_v43, %v5938_v51 }
 0x3a7   : > { %v2136_v17 = vadd.f32 %v5276_v54, %v2104_v57 }
 0x3a8   : > { %v2141_v22 = vadd.f32 %v5276_v54, %v2109_v26  ;;  %v2142_v57 = vadd.f32 %v5276_v54, %v2110_v32  ;;  %v5950_v32 = vld [vmem:[#allocation118_spill] sm:$0xff] }
 0x3aa   : > { %v2555_v2 = vpop.permute.xlu2 %2554 }
 0x3ab   : > { %v2637_v14 = vsel %vm550_vm1, %v2137_v27, %v2555_v2  ;;  %v1709_v11 = vpop.permute.xlu1 %1708  ;;  %v2545_v0 = vpop.permute.xlu0 %2544  ;;  %v2106_v27 = vadd.f32 %v5929_v29, %v5928_v52  ;;  %v2143_v2 = vadd.f32 %v5276_v54, %v2111_v7 }
 0x3ac   : > { %2967 = vst.msk [vmem:[%s4764_s20 + $0xd8] sm:$0xff] %vm822_vm2, %v2637_v14  ;;  %v1780_v50 = vsel %vm550_vm1, %v1216_v44, %v1709_v11  ;;  %v2632_v53 = vsel %vm550_vm1, %v2132_v45, %v2545_v0  ;;  %v5930_v45 = vld [vmem:[#allocation92_spill] sm:$0xff] }
 0x3ad   : > { %1812 = vst.msk [vmem:[%s4764_s20 + $0x180] sm:$0xff] %vm822_vm2, %v1780_v50  ;;  %v1184_v44 = vadd.f32 %v5042_v41, %v5930_v45  ;;  %v2138_v14 = vadd.f32 %v5276_v54, %v2106_v27 }
 0x3ae   : > { %2962 = vst.msk [vmem:[%s4764_s20 + $0x90] sm:$0xff] %vm822_vm2, %v2632_v53 }
 0x3af   : > { %v1219_v11 = vadd.f32 %v5276_v54, %v1184_v44 }
 0x3b2   : > { %v2561_v56 = vpop.permute.xlu2 %2560 }
 0x3b3   : > { %v2640_v59 = vsel %vm550_vm1, %v2140_v19, %v2561_v56  ;;  %v2547_v42 = vpop.permute.xlu1 %2546  ;;  %v1713_v49 = vpop.permute.xlu0 %1712  ;;  %v2146_v19 = vadd.f32 %v5276_v54, %v2114_v38 }
 0x3b4   : > { %2970 = vst.msk [vmem:[%s4764_s20 + $0x110] sm:$0xff] %vm822_vm2, %v2640_v59  ;;  %v2633_v34 = vsel %vm550_vm1, %v2133_v3, %v2547_v42  ;;  %v1782_v12 = vsel %vm550_vm1, %v1218_v30, %v1713_v49  ;;  %v2139_v3 = vadd.f32 %v5276_v54, %v2107_v16  ;;  %v1221_v30 = vadd.f32 %v5276_v54, %v1186_v62  ;;  %v5946_v16 = vld [vmem:[#allocation30_spill] sm:$0xff]  ;;  %v5947_v62 = vld [vmem:[#allocation112_spill] sm:$0xff] }
 0x3b5   : > { %2963 = vst.msk [vmem:[%s4764_s20 + $0x98] sm:$0xff] %vm822_vm2, %v2633_v34  ;;  %v5935_v34 = vld [vmem:[#allocation114_spill] sm:$0xff]  ;;  %v2123_v24 = vadd.f32 %v5946_v16, %v5945_v46 }
 0x3b6   : > { %1814 = vst.msk [vmem:[%s4764_s20 + $0x1a0] sm:$0xff] %vm822_vm2, %v1782_v12  ;;  %v1188_v12 = vadd.f32 %v5141_v58, %v5935_v34 }
 0x3b8   : > { %v1223_v9 = vadd.f32 %v5276_v54, %v1188_v12  ;;  %v5949_v12 = vld [vmem:[#allocation115_spill] sm:$0xff] }
 0x3b9   : > { %v2119_v33 = vadd.f32 %v5162_v5, %v5949_v12 }
 0x3ba   : > { %v1717_v8 = vpop.permute.xlu2 %1716 }
 0x3bb   : > { %v1784_v40 = vsel %vm550_vm1, %v1220_v20, %v1717_v8  ;;  %v2553_v10 = vpop.permute.xlu1 %2552  ;;  %v2551_v37 = vpop.permute.xlu0 %2550  ;;  %v2151_v15 = vadd.f32 %v5276_v54, %v2119_v33 }
 0x3bc   : > { %1816 = vst.msk [vmem:[%s4764_s20 + $0x1c0] sm:$0xff] %vm822_vm2, %v1784_v40  ;;  %v2636_v63 = vsel %vm550_vm1, %v2136_v17, %v2553_v10  ;;  %v2635_v48 = vsel %vm550_vm1, %v2135_v31, %v2551_v37  ;;  %v5939_v40 = vld [vmem:[#allocation107_spill] sm:$0xff] }
 0x3bd   : > { %2966 = vst.msk [vmem:[%s4764_s20 + $0xd0] sm:$0xff] %vm822_vm2, %v2636_v63  ;;  %v2117_v10 = vadd.f32 %v5103_v23, %v5939_v40  ;;  %v5940_v37 = vld [vmem:[#allocation75_spill] sm:$0xff] }
 0x3be   : > { %2965 = vst.msk [vmem:[%s4764_s20 + $0xb8] sm:$0xff] %vm822_vm2, %v2635_v48  ;;  %v2112_v63 = vadd.f32 %v4892_v47, %v5940_v37  ;;  %v5941_v48 = vld [vmem:[#allocation109_spill] sm:$0xff] }
 0x3bf   : > { %v1187_v1 = vadd.f32 %v5121_v13, %v5941_v48  ;;  %v2149_v7 = vadd.f32 %v5276_v54, %v2117_v10 }
 0x3c0   : > { %v2144_v52 = vadd.f32 %v5276_v54, %v2112_v63 }
 0x3c1   : > { %v1222_v29 = vadd.f32 %v5276_v54, %v1187_v1 }
 0x3c2   : > { %v2567_v0 = vpop.permute.xlu2 %2566 }
 0x3c3   : > { %v2643_v28 = vsel %vm550_vm1, %v2143_v2, %v2567_v0  ;;  %v1715_v50 = vpop.permute.xlu1 %1714  ;;  %v2557_v53 = vpop.permute.xlu0 %2556  ;;  %v5942_v2 = vld [vmem:[#allocation117_spill] sm:$0xff] }
 0x3c4   : > { %2973 = vst.msk [vmem:[%s4764_s20 + $0x138] sm:$0xff] %vm822_vm2, %v2643_v28  ;;  %v1783_v39 = vsel %vm550_vm1, %v1219_v11, %v1715_v50  ;;  %v2638_v41 = vsel %vm550_vm1, %v2138_v14, %v2557_v53  ;;  %v2120_v14 = vadd.f32 %v5180_v61, %v5942_v2  ;;  %v5943_v11 = vld [vmem:[#allocation96_spill] sm:$0xff]  ;;  %v5944_v28 = vld [vmem:[#allocation81_spill] sm:$0xff] }
 0x3c5   : > { %1815 = vst.msk [vmem:[%s4764_s20 + $0x1a8] sm:$0xff] %vm822_vm2, %v1783_v39  ;;  %v2115_v0 = vadd.f32 %v4984_v6, %v5943_v11  ;;  %v2113_v50 = vadd.f32 %v4988_v25, %v5944_v28 }
 0x3c6   : > { %2968 = vst.msk [vmem:[%s4764_s20 + $0xf0] sm:$0xff] %vm822_vm2, %v2638_v41  ;;  %v2152_v53 = vadd.f32 %v5276_v54, %v2120_v14 }
 0x3c7   : > { %v2147_v39 = vadd.f32 %v5276_v54, %v2115_v0  ;;  %v2145_v41 = vadd.f32 %v5276_v54, %v2113_v50 }
 0x3ca   : > { %v2573_v56 = vpop.permute.xlu2 %2572 }
 0x3cb   : > { %v2646_v21 = vsel %vm550_vm1, %v2146_v19, %v2573_v56  ;;  %v2559_v59 = vpop.permute.xlu1 %2558  ;;  %v1719_v42 = vpop.permute.xlu0 %1718  ;;  %v2118_v19 = vadd.f32 %v5081_v55, %v5947_v62  ;;  %v2155_v56 = vadd.f32 %v5276_v54, %v2123_v24 }
 0x3cc   : > { %2976 = vst.msk [vmem:[%s4764_s20 + $0x170] sm:$0xff] %vm822_vm2, %v2646_v21  ;;  %v2639_v49 = vsel %vm550_vm1, %v2139_v3, %v2559_v59  ;;  %v1785_v18 = vsel %vm550_vm1, %v1221_v30, %v1719_v42  ;;  %v5948_v3 = vld [vmem:[#allocation101_spill] sm:$0xff] }
 0x3cd   : > { %2969 = vst.msk [vmem:[%s4764_s20 + $0xf8] sm:$0xff] %vm822_vm2, %v2639_v49  ;;  %v2116_v30 = vadd.f32 %v5086_v60, %v5948_v3  ;;  %v2150_v21 = vadd.f32 %v5276_v54, %v2118_v19 }
 0x3ce   : > { %1817 = vst.msk [vmem:[%s4764_s20 + $0x1c8] sm:$0xff] %vm822_vm2, %v1785_v18 }
 0x3cf   : > { %v2148_v59 = vadd.f32 %v5276_v54, %v2116_v30 }
 0x3d2   : > { %v1723_v20 = vpop.permute.xlu2 %1722 }
 0x3d3   : > { %v1787_v58 = vsel %vm550_vm1, %v1223_v9, %v1723_v20  ;;  %v2565_v31 = vpop.permute.xlu1 %2564  ;;  %v2563_v17 = vpop.permute.xlu0 %2562  ;;  %v2121_v9 = vadd.f32 %v5156_v35, %v5950_v32 }
 0x3d4   : > { %1819 = vst.msk [vmem:[%s4764_s20 + $0x1e8] sm:$0xff] %vm822_vm2, %v1787_v58  ;;  %v2642_v8 = vsel %vm550_vm1, %v2142_v57, %v2565_v31  ;;  %v2641_v43 = vsel %vm550_vm1, %v2141_v22, %v2563_v17  ;;  %v5951_v22 = vld [vmem:[#allocation119_spill] sm:$0xff]  ;;  %v5952_v57 = vld [vmem:[#allocation29_spill] sm:$0xff] }
 0x3d5   : > { %2972 = vst.msk [vmem:[%s4764_s20 + $0x130] sm:$0xff] %vm822_vm2, %v2642_v8  ;;  %v2122_v20 = vadd.f32 %v5952_v57, %v5951_v22  ;;  %v2153_v58 = vadd.f32 %v5276_v54, %v2121_v9 }
 0x3d6   : > { %2971 = vst.msk [vmem:[%s4764_s20 + $0x118] sm:$0xff] %vm822_vm2, %v2641_v43 }
 0x3d7   : > { %v2154_v31 = vadd.f32 %v5276_v54, %v2122_v20 }
 0x3da   : > { %v2579_v27 = vpop.permute.xlu2 %2578 }
 0x3db   : > { %v2649_v23 = vsel %vm550_vm1, %v2149_v7, %v2579_v27  ;;  %v1721_v45 = vpop.permute.xlu1 %1720  ;;  %v2569_v44 = vpop.permute.xlu0 %2568 }
 0x3dc   : > { %2979 = vst.msk [vmem:[%s4764_s20 + $0x198] sm:$0xff] %vm822_vm2, %v2649_v23  ;;  %v1786_v47 = vsel %vm550_vm1, %v1222_v29, %v1721_v45  ;;  %v2644_v13 = vsel %vm550_vm1, %v2144_v52, %v2569_v44 }
 0x3dd   : > { %1818 = vst.msk [vmem:[%s4764_s20 + $0x1e0] sm:$0xff] %vm822_vm2, %v1786_v47 }
 0x3de   : > { %2974 = vst.msk [vmem:[%s4764_s20 + $0x150] sm:$0xff] %vm822_vm2, %v2644_v13 }
 0x3e2   : > { %v2585_v36 = vpop.permute.xlu2 %2584 }
 0x3e3   : > { %v2652_v61 = vsel %vm550_vm1, %v2152_v53, %v2585_v36  ;;  %v2571_v38 = vpop.permute.xlu1 %2570  ;;  %v2575_v4 = vpop.permute.xlu0 %2574 }
 0x3e4   : > { %2982 = vst.msk [vmem:[%s4764_s20 + $0x1d0] sm:$0xff] %vm822_vm2, %v2652_v61  ;;  %v2645_v6 = vsel %vm550_vm1, %v2145_v41, %v2571_v38  ;;  %v2647_v25 = vsel %vm550_vm1, %v2147_v39, %v2575_v4 }
 0x3e5   : > { %2975 = vst.msk [vmem:[%s4764_s20 + $0x158] sm:$0xff] %vm822_vm2, %v2645_v6 }
 0x3e6   : > { %2977 = vst.msk [vmem:[%s4764_s20 + $0x178] sm:$0xff] %vm822_vm2, %v2647_v25 }
 0x3ea   : > { %v2591_v42 = vpop.permute.xlu2 %2590 }
 0x3eb   : > { %v2655_v49 = vsel %vm550_vm1, %v2155_v56, %v2591_v42  ;;  %v2577_v18 = vpop.permute.xlu1 %2576  ;;  %v2581_v34 = vpop.permute.xlu0 %2580 }
 0x3ec   : > { %2985 = vst.msk [vmem:[%s4764_s20 + $0x1f8] sm:$0xff] %vm822_vm2, %v2655_v49  ;;  %v2648_v55 = vsel %vm550_vm1, %v2148_v59, %v2577_v18  ;;  %v2650_v60 = vsel %vm550_vm1, %v2150_v21, %v2581_v34 }
 0x3ed   : > { %2978 = vst.msk [vmem:[%s4764_s20 + $0x190] sm:$0xff] %vm822_vm2, %v2648_v55 }
 0x3ee   : > { %2980 = vst.msk [vmem:[%s4764_s20 + $0x1b0] sm:$0xff] %vm822_vm2, %v2650_v60 }
 0x3f3   : > { %v2583_v26 = vpop.permute.xlu1 %2582 }
 0x3f4   : > { %v2651_v51 = vsel %vm550_vm1, %v2151_v15, %v2583_v26 }
 0x3f5   : > { %2981 = vst.msk [vmem:[%s4764_s20 + $0x1b8] sm:$0xff] %vm822_vm2, %v2651_v51 }
 0x3fa   : > { %v2587_v5 = vpop.permute.xlu0 %2586 }
 0x3fb   : > { %v2653_v17 = vsel %vm550_vm1, %v2153_v58, %v2587_v5  ;;  %v2589_v8 = vpop.permute.xlu1 %2588 }
 0x3fc   : > { %2983 = vst.msk [vmem:[%s4764_s20 + $0x1d8] sm:$0xff] %vm822_vm2, %v2653_v17  ;;  %v2654_v43 = vsel %vm550_vm1, %v2154_v31, %v2589_v8 }
 0x3fd   : > { %2984 = vst.msk [vmem:[%s4764_s20 + $0x1f0] sm:$0xff] %vm822_vm2, %v2654_v43 }
 0x3fe PF: > { %s14_s17 = sadd.s32 1, %s3041_s17   ;;  %s5953_s15 = smov %s3037_s16 }
 0x3ff   : > { %p11_p5 = scmp.ge.s32.totalorder %s14_s17, 4   ;;  %s5954_s16 = smov %s5956_s18 }
 0x401   :  { %13 = sbr.rel (!%p11_p5) target bundleno = 2 (0x2), region = 73 }

</bundles_post_ra>
